<compile_context>
chip_gen: v5e
topology: v5e:2x2
jax: 0.10.0
libtpu: 0.0.40
codegen_flags: <defaults>
</compile_context>

<pallas_src>
import numpy as np
import jax
import jax.numpy as jnp
from jax import lax
from jax.experimental import pallas as pl
from jax.experimental.pallas import tpu as pltpu

LN_EPS = 1e-5


def _round_up(n, m):
    return ((n + m - 1) // m) * m


def _pick_time_block(T, want):
    """Largest TB <= want with T % TB == 0 and TB % 8 == 0 (sublane rule), else T."""
    want = min(want, T)
    if want >= T:
        return T
    for tb in range(want, 7, -1):
        if T % tb == 0 and tb % 8 == 0:
            return tb
    return T  # whole sequence as one block (block == full dim satisfies tiling rule)


def _reorder_pad_gates(w, H, Hp):
    """w: (4H, D) rows in PyTorch gate order (i, f, g, o).
    Returns (D, 4Hp): columns in kernel gate order (i, f, o, g), zero-padded H -> Hp."""
    wi, wf, wg, wo = jnp.split(w.astype(jnp.float32), 4, axis=0)   # each (H, D)
    D = w.shape[1]
    out = jnp.zeros((4, Hp, D), jnp.float32)
    out = out.at[0, :H].set(wi)
    out = out.at[1, :H].set(wf)
    out = out.at[2, :H].set(wo)
    out = out.at[3, :H].set(wg)
    return out.reshape(4 * Hp, D).T                                 # (D, 4Hp)


def _make_kernel(TB, Hp, H_real):
    n_sig = 3 * Hp  # contiguous sigmoid slab: gate order in-kernel is (i, f, o, g)

    def masked_ln(v, gamma, beta):
        # LayerNorm over the real H columns only; padded columns of v are exactly 0.
        if H_real == Hp:
            mu = jnp.mean(v, axis=-1, keepdims=True)
            d = v - mu
            var = jnp.mean(d * d, axis=-1, keepdims=True)
        else:
            mask = (lax.broadcasted_iota(jnp.int32, (1, Hp), 1) < H_real
                    ).astype(jnp.float32)
            inv_n = 1.0 / H_real
            mu = jnp.sum(v * mask, axis=-1, keepdims=True) * inv_n
            d = (v - mu) * mask
            var = jnp.sum(d * d, axis=-1, keepdims=True) * inv_n
        return d * lax.rsqrt(var + LN_EPS) * gamma + beta

    def kernel(gx_ref, whh_ref, gamma_ref, beta_ref,
               out_ref, hn_ref, cn_ref, h_scr, c_scr):
        t = pl.program_id(1)

        @pl.when(t == 0)
        def _():
            h_scr[...] = jnp.zeros_like(h_scr)
            c_scr[...] = jnp.zeros_like(c_scr)

        whh = whh_ref[...]          # resident, grid-invariant (DMA elided across steps)
        gamma = gamma_ref[...]
        beta = beta_ref[...]
        h = h_scr[...]              # f32 state carried in vregs within the block
        c = c_scr[...]

        ln_h = None
        for tt in range(TB):        # static unrolled inner loop over the time block
            # Per-step work is only the recurrent matmul; x-projection + bias were
            # hoisted into gx (precomputed for all timesteps).
            gates = (jnp.dot(h.astype(whh.dtype), whh,
                             preferred_element_type=jnp.float32)
                     + gx_ref[:, tt, :].astype(jnp.float32))        # (B_BLK, 4Hp)
            sig = jax.nn.sigmoid(gates[:, :n_sig])                  # one EUP slab (i,f,o)
            i_g = sig[:, 0 * Hp:1 * Hp]
            f_g = sig[:, 1 * Hp:2 * Hp]
            o_g = sig[:, 2 * Hp:3 * Hp]
            g_g = jnp.tanh(gates[:, n_sig:])
            c = f_g * c + i_g * g_g
            h = o_g * jnp.tanh(c)
            ln_h = masked_ln(h, gamma, beta)
            out_ref[:, tt, :] = ln_h                                # 128-lane-dense store

        h_scr[...] = h
        c_scr[...] = c

        @pl.when(t == pl.num_programs(1) - 1)
        def _():
            hn_ref[...] = ln_h                                      # reuse LN(h_T)
            cn_ref[...] = masked_ln(c, gamma, beta)

    return kernel


def lstm_layernorm(x, w_ih, w_hh, b_ih, b_hh, gamma, beta, *,
                   time_block=8, compute_dtype=jnp.float32):
    """x: (B, T, I) batch-first. Returns (LN(h_t) (B,T,H), (LN(h_T) (B,1,H), LN(c_T) (B,1,H))).
    compute_dtype controls the MXU-input dtype for gates_x / W_hh (bf16 on v6e/v7x)."""
    B, T, I = x.shape
    H = gamma.shape[0]
    Hp = _round_up(H, 128)      # lane-dense hidden dim
    B_BLK = 8                   # sublane-aligned batch block
    Bp = _round_up(B, B_BLK)
    TB = _pick_time_block(T, time_block)
    NB = Bp // B_BLK
    NT = T // TB
    f32 = jnp.float32

    # ---- hoisted input projection (one big matmul, bias folded in, batch-first) ----
    wih_p = _reorder_pad_gates(w_ih, H, Hp)                               # (I, 4Hp)
    bias_p = _reorder_pad_gates((b_ih + b_hh).reshape(-1, 1), H, Hp)      # (1, 4Hp)
    gx = jnp.einsum('bti,ig->btg', x.astype(f32), wih_p) + bias_p         # (B, T, 4Hp)
    gx_p = jnp.zeros((Bp, T, 4 * Hp), f32).at[:B].set(gx).astype(compute_dtype)

    whh_p = jnp.zeros((Hp, 4 * Hp), f32).at[:H].set(
        _reorder_pad_gates(w_hh, H, Hp)).astype(compute_dtype)            # (Hp, 4Hp)

    gamma_p = jnp.zeros((1, Hp), f32).at[0, :H].set(gamma.astype(f32))
    beta_p = jnp.zeros((1, Hp), f32).at[0, :H].set(beta.astype(f32))

    kernel = _make_kernel(TB, Hp, H)

    grid_spec = pltpu.PrefetchScalarGridSpec(
        num_scalar_prefetch=0,
        grid=(NB, NT),                                                    # (batch, time)
        in_specs=[
            pl.BlockSpec((B_BLK, TB, 4 * Hp), lambda b, t: (b, t, 0)),    # gates_x block
            pl.BlockSpec((Hp, 4 * Hp), lambda b, t: (0, 0)),              # W_hh^T (resident)
            pl.BlockSpec((1, Hp), lambda b, t: (0, 0)),                   # gamma
            pl.BlockSpec((1, Hp), lambda b, t: (0, 0)),                   # beta
        ],
        out_specs=(
            pl.BlockSpec((B_BLK, TB, Hp), lambda b, t: (b, t, 0)),        # LN(h_t)
            pl.BlockSpec((B_BLK, Hp), lambda b, t: (b, 0)),               # LN(h_T)
            pl.BlockSpec((B_BLK, Hp), lambda b, t: (b, 0)),               # LN(c_T)
        ),
        scratch_shapes=[
            pltpu.VMEM((B_BLK, Hp), jnp.float32),                         # h state
            pltpu.VMEM((B_BLK, Hp), jnp.float32),                         # c state
        ],
    )
    # Note (v7x): for large H, also single-buffer the grid-invariant W_hh spec and set
    # pltpu.CompilerParams(vmem_limit_bytes=...) to fit the 64 MiB/TC VMEM budget.
    out_p, hn_p, cn_p = pl.pallas_call(
        kernel,
        out_shape=(
            jax.ShapeDtypeStruct((Bp, T, Hp), jnp.float32),
            jax.ShapeDtypeStruct((Bp, Hp), jnp.float32),
            jax.ShapeDtypeStruct((Bp, Hp), jnp.float32),
        ),
        grid_spec=grid_spec,
        compiler_params=pltpu.CompilerParams(
            dimension_semantics=("parallel", "arbitrary")),
    )(gx_p, whh_p, gamma_p, beta_p)

    lstm_states = out_p[:B, :, :H]                                        # (B, T, H)
    hn = hn_p[:B, :H].reshape(B, 1, H)
    cn = cn_p[:B, :H].reshape(B, 1, H)
    return lstm_states, (hn, cn)


# ----------------------------- pure-JAX reference ------------------------------
def _layernorm(v, gamma, beta):
    mu = jnp.mean(v, axis=-1, keepdims=True)
    var = jnp.mean((v - mu) ** 2, axis=-1, keepdims=True)
    return (v - mu) * lax.rsqrt(var + LN_EPS) * gamma + beta


def reference_lstm_layernorm(x, w_ih, w_hh, b_ih, b_hh, gamma, beta):
    """Pure-JAX reference matching PyTorch nn.LSTM(batch_first=True) + nn.LayerNorm."""
    B, T, I = x.shape
    H = gamma.shape[0]
    h = jnp.zeros((B, H), jnp.float32)
    c = jnp.zeros((B, H), jnp.float32)

    def step(carry, x_t):
        h, c = carry
        gates = x_t @ w_ih.T + h @ w_hh.T + b_ih + b_hh
        i = jax.nn.sigmoid(gates[:, 0 * H:1 * H])
        f = jax.nn.sigmoid(gates[:, 1 * H:2 * H])
        g = jnp.tanh(gates[:, 2 * H:3 * H])
        o = jax.nn.sigmoid(gates[:, 3 * H:4 * H])
        c = f * c + i * g
        h = o * jnp.tanh(c)
        return (h, c), h

    (hT, cT), hs = lax.scan(step, (h, c), jnp.transpose(x, (1, 0, 2)))
    hs = jnp.transpose(hs, (1, 0, 2))
    ln = lambda v: _layernorm(v, gamma, beta)
    return ln(hs), (ln(hT).reshape(B, 1, H), ln(cT).reshape(B, 1, H))


if __name__ == "__main__":
    B, T, I, H = 2, 16, 16, 32

    key = jax.random.PRNGKey(0)
    kx, k1, k2, k3, k4 = jax.random.split(key, 5)
    k_bound = 1.0 / np.sqrt(H)   # PyTorch nn.LSTM default init: U(-1/sqrt(H), 1/sqrt(H))
    x = jax.random.normal(kx, (B, T, I), jnp.float32)
    w_ih = jax.random.uniform(k1, (4 * H, I), jnp.float32, -k_bound, k_bound)
    w_hh = jax.random.uniform(k2, (4 * H, H), jnp.float32, -k_bound, k_bound)
    b_ih = jax.random.uniform(k3, (4 * H,), jnp.float32, -k_bound, k_bound)
    b_hh = jax.random.uniform(k4, (4 * H,), jnp.float32, -k_bound, k_bound)
    gamma = jnp.ones((H,), jnp.float32)    # nn.LayerNorm default weight
    beta = jnp.zeros((H,), jnp.float32)    # nn.LayerNorm default bias

    ref_out, (ref_hn, ref_cn) = reference_lstm_layernorm(
        x, w_ih, w_hh, b_ih, b_hh, gamma, beta)

    # f32 path (v5e-friendly: all vector math in f32) — tight tolerance.
    out, (hn, cn) = jax.block_until_ready(
        lstm_layernorm(x, w_ih, w_hh, b_ih, b_hh, gamma, beta))
    np.testing.assert_allclose(np.asarray(out), np.asarray(ref_out), rtol=2e-5, atol=2e-5)
    np.testing.assert_allclose(np.asarray(hn), np.asarray(ref_hn), rtol=2e-5, atol=2e-5)
    np.testing.assert_allclose(np.asarray(cn), np.asarray(ref_cn), rtol=2e-5, atol=2e-5)
    assert out.shape == (B, T, H) and hn.shape == (B, 1, H) and cn.shape == (B, 1, H)

    # bf16-MXU path (v6e/v7x: halves gates_x / W_hh DMA + VMEM) — loose tolerance.
    out_bf, (hn_bf, cn_bf) = jax.block_until_ready(
        lstm_layernorm(x, w_ih, w_hh, b_ih, b_hh, gamma, beta,
                       compute_dtype=jnp.bfloat16))
    np.testing.assert_allclose(np.asarray(out_bf), np.asarray(ref_out), rtol=5e-2, atol=5e-2)
    np.testing.assert_allclose(np.asarray(hn_bf), np.asarray(ref_hn), rtol=5e-2, atol=5e-2)
    np.testing.assert_allclose(np.asarray(cn_bf), np.asarray(ref_cn), rtol=5e-2, atol=5e-2)

    print("KERNEL_OK")
</pallas_src>

<mosaic_0001>
module attributes {stable_mosaic.version = 11 : i64} {
  func.func @kernel(%arg0: i32, %arg1: i32, %arg2: memref<8x8x512xf32, #tpu.memory_space<vmem>>, %arg3: memref<128x512xf32, #tpu.memory_space<vmem>>, %arg4: memref<1x128xf32, #tpu.memory_space<vmem>>, %arg5: memref<1x128xf32, #tpu.memory_space<vmem>>, %arg6: memref<8x8x128xf32, #tpu.memory_space<vmem>>, %arg7: memref<8x128xf32, #tpu.memory_space<vmem>>, %arg8: memref<8x128xf32, #tpu.memory_space<vmem>>, %arg9: memref<8x128xf32, #tpu.memory_space<vmem>>, %arg10: memref<8x128xf32, #tpu.memory_space<vmem>>) attributes {dimension_semantics = [#tpu.dimension_semantics<parallel>, #tpu.dimension_semantics<arbitrary>], iteration_bounds = array<i64: 1, 2>, scalar_prefetch = 0 : i64, scratch_operands = 2 : i64, tpu.core_type = #tpu.core_type<tc>, window_params = [{transform_indices = @transform_0, window_bounds = array<i64: 8, 8, 512>}, {pipeline_mode = #tpu.pipeline_mode<synchronous>, transform_indices = @transform_1, window_bounds = array<i64: 128, 512>}, {pipeline_mode = #tpu.pipeline_mode<synchronous>, transform_indices = @transform_2, window_bounds = array<i64: 1, 128>}, {pipeline_mode = #tpu.pipeline_mode<synchronous>, transform_indices = @transform_3, window_bounds = array<i64: 1, 128>}, {transform_indices = @transform_4, window_bounds = array<i64: 8, 8, 128>}, {transform_indices = @transform_5, window_bounds = array<i64: 8, 128>}, {transform_indices = @transform_6, window_bounds = array<i64: 8, 128>}]} {
    %c0_i32 = arith.constant 0 : i32
    %0 = arith.cmpi eq, %arg1, %c0_i32 : i32
    %1 = arith.extui %0 : i1 to i32
    %c0_i32_0 = arith.constant 0 : i32
    %2 = arith.cmpi ne, %1, %c0_i32_0 : i32
    scf.if %2 {
      %cst_118 = arith.constant 0.000000e+00 : f32
      %429 = vector.broadcast %cst_118 : f32 to vector<8x128xf32>
      %c0_119 = arith.constant 0 : index
      %c0_120 = arith.constant 0 : index
      %430 = vector.load %arg9[%c0_119, %c0_120] : memref<8x128xf32, #tpu.memory_space<vmem>>, vector<8x128xf32>
      tpu.vector_store %arg9[%c0_119, %c0_120], %429 {strides = array<i32>} : memref<8x128xf32, #tpu.memory_space<vmem>>, vector<8x128xf32>,
      %cst_121 = arith.constant 0.000000e+00 : f32
      %431 = vector.broadcast %cst_121 : f32 to vector<8x128xf32>
      %c0_122 = arith.constant 0 : index
      %c0_123 = arith.constant 0 : index
      %432 = vector.load %arg10[%c0_122, %c0_123] : memref<8x128xf32, #tpu.memory_space<vmem>>, vector<8x128xf32>
      tpu.vector_store %arg10[%c0_122, %c0_123], %431 {strides = array<i32>} : memref<8x128xf32, #tpu.memory_space<vmem>>, vector<8x128xf32>,
    } else {
    }
    %c0 = arith.constant 0 : index
    %c0_1 = arith.constant 0 : index
    %3 = vector.load %arg3[%c0, %c0_1] : memref<128x512xf32, #tpu.memory_space<vmem>>, vector<128x512xf32>
    %c0_2 = arith.constant 0 : index
    %c0_3 = arith.constant 0 : index
    %4 = vector.load %arg4[%c0_2, %c0_3] : memref<1x128xf32, #tpu.memory_space<vmem>>, vector<1x128xf32>
    %c0_4 = arith.constant 0 : index
    %c0_5 = arith.constant 0 : index
    %5 = vector.load %arg5[%c0_4, %c0_5] : memref<1x128xf32, #tpu.memory_space<vmem>>, vector<1x128xf32>
    %c0_6 = arith.constant 0 : index
    %c0_7 = arith.constant 0 : index
    %6 = vector.load %arg9[%c0_6, %c0_7] : memref<8x128xf32, #tpu.memory_space<vmem>>, vector<8x128xf32>
    %c0_8 = arith.constant 0 : index
    %c0_9 = arith.constant 0 : index
    %7 = vector.load %arg10[%c0_8, %c0_9] : memref<8x128xf32, #tpu.memory_space<vmem>>, vector<8x128xf32>
    %cst = arith.constant dense<0.000000e+00> : vector<8x512xf32>
    %8 = tpu.matmul %6, %3, %cst {dimension_numbers = #tpu.dot_dimension_numbers<[1], [0], [0], [1], [0, 0, 1, 1], [], []>} : vector<8x128xf32>, vector<128x512xf32>, vector<8x512xf32> -> vector<8x512xf32>
    %c0_10 = arith.constant 0 : index
    %c0_11 = arith.constant 0 : index
    %c0_12 = arith.constant 0 : index
    %9 = vector.load %arg2[%c0_10, %c0_11, %c0_12] : memref<8x8x512xf32, #tpu.memory_space<vmem>>, vector<8x1x512xf32>
    %10 = vector.shape_cast %9 : vector<8x1x512xf32> to vector<8x512xf32>
    %11 = arith.addf %8, %10 : vector<8x512xf32>
    %12 = vector.extract_strided_slice %11 {offsets = [0, 0], sizes = [8, 384], strides = [1, 1]} : vector<8x512xf32> to vector<8x384xf32>
    %13 = arith.negf %12 : vector<8x384xf32>
    %14 = math.exp %13 : vector<8x384xf32>
    %cst_13 = arith.constant 1.000000e+00 : f32
    %15 = vector.broadcast %cst_13 : f32 to vector<8x384xf32>
    %16 = arith.addf %15, %14 : vector<8x384xf32>
    %17 = arith.divf %15, %16 : vector<8x384xf32>
    %18 = vector.extract_strided_slice %17 {offsets = [0, 0], sizes = [8, 128], strides = [1, 1]} : vector<8x384xf32> to vector<8x128xf32>
    %19 = vector.extract_strided_slice %17 {offsets = [0, 128], sizes = [8, 128], strides = [1, 1]} : vector<8x384xf32> to vector<8x128xf32>
    %20 = vector.extract_strided_slice %17 {offsets = [0, 256], sizes = [8, 128], strides = [1, 1]} : vector<8x384xf32> to vector<8x128xf32>
    %21 = vector.extract_strided_slice %11 {offsets = [0, 384], sizes = [8, 128], strides = [1, 1]} : vector<8x512xf32> to vector<8x128xf32>
    %22 = math.tanh %21 : vector<8x128xf32>
    %23 = arith.mulf %19, %7 : vector<8x128xf32>
    %24 = arith.mulf %18, %22 : vector<8x128xf32>
    %25 = arith.addf %23, %24 : vector<8x128xf32>
    %26 = math.tanh %25 : vector<8x128xf32>
    %27 = arith.mulf %20, %26 : vector<8x128xf32>
    %28 = tpu.iota {dimensions = array<i32: 1>} : vector<1x128xi32>
    %c32_i32 = arith.constant 32 : i32
    %29 = vector.broadcast %c32_i32 : i32 to vector<1x128xi32>
    %30 = arith.cmpi slt, %28, %29 : vector<1x128xi32>
    %31 = arith.extui %30 : vector<1x128xi1> to vector<1x128xi32>
    %32 = arith.sitofp %31 : vector<1x128xi32> to vector<1x128xf32>
    %33 = vector.broadcast %32 : vector<1x128xf32> to vector<8x128xf32>
    %34 = arith.mulf %27, %33 : vector<8x128xf32>
    %cst_14 = arith.constant dense<0.000000e+00> : vector<8xf32>
    %35 = vector.multi_reduction <add>, %34, %cst_14 [1] : vector<8x128xf32> to vector<8xf32>
    %36 = vector.shape_cast %35 : vector<8xf32> to vector<8x1xf32>
    %cst_15 = arith.constant 3.125000e-02 : f32
    %37 = vector.broadcast %cst_15 : f32 to vector<8x1xf32>
    %38 = arith.mulf %36, %37 : vector<8x1xf32>
    %39 = vector.broadcast %38 : vector<8x1xf32> to vector<8x128xf32>
    %40 = arith.subf %27, %39 : vector<8x128xf32>
    %41 = vector.broadcast %32 : vector<1x128xf32> to vector<8x128xf32>
    %42 = arith.mulf %40, %41 : vector<8x128xf32>
    %43 = arith.mulf %42, %42 : vector<8x128xf32>
    %cst_16 = arith.constant dense<0.000000e+00> : vector<8xf32>
    %44 = vector.multi_reduction <add>, %43, %cst_16 [1] : vector<8x128xf32> to vector<8xf32>
    %45 = vector.shape_cast %44 : vector<8xf32> to vector<8x1xf32>
    %cst_17 = arith.constant 3.125000e-02 : f32
    %46 = vector.broadcast %cst_17 : f32 to vector<8x1xf32>
    %47 = arith.mulf %45, %46 : vector<8x1xf32>
    %cst_18 = arith.constant 9.99999974E-6 : f32
    %48 = vector.broadcast %cst_18 : f32 to vector<8x1xf32>
    %49 = arith.addf %47, %48 : vector<8x1xf32>
    %50 = math.rsqrt %49 : vector<8x1xf32>
    %51 = vector.broadcast %50 : vector<8x1xf32> to vector<8x128xf32>
    %52 = arith.mulf %42, %51 : vector<8x128xf32>
    %53 = vector.broadcast %4 : vector<1x128xf32> to vector<8x128xf32>
    %54 = arith.mulf %52, %53 : vector<8x128xf32>
    %55 = vector.broadcast %5 : vector<1x128xf32> to vector<8x128xf32>
    %56 = arith.addf %54, %55 : vector<8x128xf32>
    %c0_19 = arith.constant 0 : index
    %c0_20 = arith.constant 0 : index
    %c0_21 = arith.constant 0 : index
    %57 = vector.load %arg6[%c0_19, %c0_20, %c0_21] : memref<8x8x128xf32, #tpu.memory_space<vmem>>, vector<8x1x128xf32>
    %58 = vector.shape_cast %57 : vector<8x1x128xf32> to vector<8x128xf32>
    %59 = vector.shape_cast %56 : vector<8x128xf32> to vector<8x1x128xf32>
    tpu.vector_store %arg6[%c0_19, %c0_20, %c0_21], %59 {strides = array<i32>} : memref<8x8x128xf32, #tpu.memory_space<vmem>>, vector<8x1x128xf32>,
    %cst_22 = arith.constant dense<0.000000e+00> : vector<8x512xf32>
    %60 = tpu.matmul %27, %3, %cst_22 {dimension_numbers = #tpu.dot_dimension_numbers<[1], [0], [0], [1], [0, 0, 1, 1], [], []>} : vector<8x128xf32>, vector<128x512xf32>, vector<8x512xf32> -> vector<8x512xf32>
    %c0_23 = arith.constant 0 : index
    %c1 = arith.constant 1 : index
    %c0_24 = arith.constant 0 : index
    %61 = vector.load %arg2[%c0_23, %c1, %c0_24] : memref<8x8x512xf32, #tpu.memory_space<vmem>>, vector<8x1x512xf32>
    %62 = vector.shape_cast %61 : vector<8x1x512xf32> to vector<8x512xf32>
    %63 = arith.addf %60, %62 : vector<8x512xf32>
    %64 = vector.extract_strided_slice %63 {offsets = [0, 0], sizes = [8, 384], strides = [1, 1]} : vector<8x512xf32> to vector<8x384xf32>
    %65 = arith.negf %64 : vector<8x384xf32>
    %66 = math.exp %65 : vector<8x384xf32>
    %cst_25 = arith.constant 1.000000e+00 : f32
    %67 = vector.broadcast %cst_25 : f32 to vector<8x384xf32>
    %68 = arith.addf %67, %66 : vector<8x384xf32>
    %69 = arith.divf %67, %68 : vector<8x384xf32>
    %70 = vector.extract_strided_slice %69 {offsets = [0, 0], sizes = [8, 128], strides = [1, 1]} : vector<8x384xf32> to vector<8x128xf32>
    %71 = vector.extract_strided_slice %69 {offsets = [0, 128], sizes = [8, 128], strides = [1, 1]} : vector<8x384xf32> to vector<8x128xf32>
    %72 = vector.extract_strided_slice %69 {offsets = [0, 256], sizes = [8, 128], strides = [1, 1]} : vector<8x384xf32> to vector<8x128xf32>
    %73 = vector.extract_strided_slice %63 {offsets = [0, 384], sizes = [8, 128], strides = [1, 1]} : vector<8x512xf32> to vector<8x128xf32>
    %74 = math.tanh %73 : vector<8x128xf32>
    %75 = arith.mulf %71, %25 : vector<8x128xf32>
    %76 = arith.mulf %70, %74 : vector<8x128xf32>
    %77 = arith.addf %75, %76 : vector<8x128xf32>
    %78 = math.tanh %77 : vector<8x128xf32>
    %79 = arith.mulf %72, %78 : vector<8x128xf32>
    %80 = tpu.iota {dimensions = array<i32: 1>} : vector<1x128xi32>
    %c32_i32_26 = arith.constant 32 : i32
    %81 = vector.broadcast %c32_i32_26 : i32 to vector<1x128xi32>
    %82 = arith.cmpi slt, %80, %81 : vector<1x128xi32>
    %83 = arith.extui %82 : vector<1x128xi1> to vector<1x128xi32>
    %84 = arith.sitofp %83 : vector<1x128xi32> to vector<1x128xf32>
    %85 = vector.broadcast %84 : vector<1x128xf32> to vector<8x128xf32>
    %86 = arith.mulf %79, %85 : vector<8x128xf32>
    %cst_27 = arith.constant dense<0.000000e+00> : vector<8xf32>
    %87 = vector.multi_reduction <add>, %86, %cst_27 [1] : vector<8x128xf32> to vector<8xf32>
    %88 = vector.shape_cast %87 : vector<8xf32> to vector<8x1xf32>
    %cst_28 = arith.constant 3.125000e-02 : f32
    %89 = vector.broadcast %cst_28 : f32 to vector<8x1xf32>
    %90 = arith.mulf %88, %89 : vector<8x1xf32>
    %91 = vector.broadcast %90 : vector<8x1xf32> to vector<8x128xf32>
    %92 = arith.subf %79, %91 : vector<8x128xf32>
    %93 = vector.broadcast %84 : vector<1x128xf32> to vector<8x128xf32>
    %94 = arith.mulf %92, %93 : vector<8x128xf32>
    %95 = arith.mulf %94, %94 : vector<8x128xf32>
    %cst_29 = arith.constant dense<0.000000e+00> : vector<8xf32>
    %96 = vector.multi_reduction <add>, %95, %cst_29 [1] : vector<8x128xf32> to vector<8xf32>
    %97 = vector.shape_cast %96 : vector<8xf32> to vector<8x1xf32>
    %cst_30 = arith.constant 3.125000e-02 : f32
    %98 = vector.broadcast %cst_30 : f32 to vector<8x1xf32>
    %99 = arith.mulf %97, %98 : vector<8x1xf32>
    %cst_31 = arith.constant 9.99999974E-6 : f32
    %100 = vector.broadcast %cst_31 : f32 to vector<8x1xf32>
    %101 = arith.addf %99, %100 : vector<8x1xf32>
    %102 = math.rsqrt %101 : vector<8x1xf32>
    %103 = vector.broadcast %102 : vector<8x1xf32> to vector<8x128xf32>
    %104 = arith.mulf %94, %103 : vector<8x128xf32>
    %105 = vector.broadcast %4 : vector<1x128xf32> to vector<8x128xf32>
    %106 = arith.mulf %104, %105 : vector<8x128xf32>
    %107 = vector.broadcast %5 : vector<1x128xf32> to vector<8x128xf32>
    %108 = arith.addf %106, %107 : vector<8x128xf32>
    %c0_32 = arith.constant 0 : index
    %c1_33 = arith.constant 1 : index
    %c0_34 = arith.constant 0 : index
    %109 = vector.load %arg6[%c0_32, %c1_33, %c0_34] : memref<8x8x128xf32, #tpu.memory_space<vmem>>, vector<8x1x128xf32>
    %110 = vector.shape_cast %109 : vector<8x1x128xf32> to vector<8x128xf32>
    %111 = vector.shape_cast %108 : vector<8x128xf32> to vector<8x1x128xf32>
    tpu.vector_store %arg6[%c0_32, %c1_33, %c0_34], %111 {strides = array<i32>} : memref<8x8x128xf32, #tpu.memory_space<vmem>>, vector<8x1x128xf32>,
    %cst_35 = arith.constant dense<0.000000e+00> : vector<8x512xf32>
    %112 = tpu.matmul %79, %3, %cst_35 {dimension_numbers = #tpu.dot_dimension_numbers<[1], [0], [0], [1], [0, 0, 1, 1], [], []>} : vector<8x128xf32>, vector<128x512xf32>, vector<8x512xf32> -> vector<8x512xf32>
    %c0_36 = arith.constant 0 : index
    %c2 = arith.constant 2 : index
    %c0_37 = arith.constant 0 : index
    %113 = vector.load %arg2[%c0_36, %c2, %c0_37] : memref<8x8x512xf32, #tpu.memory_space<vmem>>, vector<8x1x512xf32>
    %114 = vector.shape_cast %113 : vector<8x1x512xf32> to vector<8x512xf32>
    %115 = arith.addf %112, %114 : vector<8x512xf32>
    %116 = vector.extract_strided_slice %115 {offsets = [0, 0], sizes = [8, 384], strides = [1, 1]} : vector<8x512xf32> to vector<8x384xf32>
    %117 = arith.negf %116 : vector<8x384xf32>
    %118 = math.exp %117 : vector<8x384xf32>
    %cst_38 = arith.constant 1.000000e+00 : f32
    %119 = vector.broadcast %cst_38 : f32 to vector<8x384xf32>
    %120 = arith.addf %119, %118 : vector<8x384xf32>
    %121 = arith.divf %119, %120 : vector<8x384xf32>
    %122 = vector.extract_strided_slice %121 {offsets = [0, 0], sizes = [8, 128], strides = [1, 1]} : vector<8x384xf32> to vector<8x128xf32>
    %123 = vector.extract_strided_slice %121 {offsets = [0, 128], sizes = [8, 128], strides = [1, 1]} : vector<8x384xf32> to vector<8x128xf32>
    %124 = vector.extract_strided_slice %121 {offsets = [0, 256], sizes = [8, 128], strides = [1, 1]} : vector<8x384xf32> to vector<8x128xf32>
    %125 = vector.extract_strided_slice %115 {offsets = [0, 384], sizes = [8, 128], strides = [1, 1]} : vector<8x512xf32> to vector<8x128xf32>
    %126 = math.tanh %125 : vector<8x128xf32>
    %127 = arith.mulf %123, %77 : vector<8x128xf32>
    %128 = arith.mulf %122, %126 : vector<8x128xf32>
    %129 = arith.addf %127, %128 : vector<8x128xf32>
    %130 = math.tanh %129 : vector<8x128xf32>
    %131 = arith.mulf %124, %130 : vector<8x128xf32>
    %132 = tpu.iota {dimensions = array<i32: 1>} : vector<1x128xi32>
    %c32_i32_39 = arith.constant 32 : i32
    %133 = vector.broadcast %c32_i32_39 : i32 to vector<1x128xi32>
    %134 = arith.cmpi slt, %132, %133 : vector<1x128xi32>
    %135 = arith.extui %134 : vector<1x128xi1> to vector<1x128xi32>
    %136 = arith.sitofp %135 : vector<1x128xi32> to vector<1x128xf32>
    %137 = vector.broadcast %136 : vector<1x128xf32> to vector<8x128xf32>
    %138 = arith.mulf %131, %137 : vector<8x128xf32>
    %cst_40 = arith.constant dense<0.000000e+00> : vector<8xf32>
    %139 = vector.multi_reduction <add>, %138, %cst_40 [1] : vector<8x128xf32> to vector<8xf32>
    %140 = vector.shape_cast %139 : vector<8xf32> to vector<8x1xf32>
    %cst_41 = arith.constant 3.125000e-02 : f32
    %141 = vector.broadcast %cst_41 : f32 to vector<8x1xf32>
    %142 = arith.mulf %140, %141 : vector<8x1xf32>
    %143 = vector.broadcast %142 : vector<8x1xf32> to vector<8x128xf32>
    %144 = arith.subf %131, %143 : vector<8x128xf32>
    %145 = vector.broadcast %136 : vector<1x128xf32> to vector<8x128xf32>
    %146 = arith.mulf %144, %145 : vector<8x128xf32>
    %147 = arith.mulf %146, %146 : vector<8x128xf32>
    %cst_42 = arith.constant dense<0.000000e+00> : vector<8xf32>
    %148 = vector.multi_reduction <add>, %147, %cst_42 [1] : vector<8x128xf32> to vector<8xf32>
    %149 = vector.shape_cast %148 : vector<8xf32> to vector<8x1xf32>
    %cst_43 = arith.constant 3.125000e-02 : f32
    %150 = vector.broadcast %cst_43 : f32 to vector<8x1xf32>
    %151 = arith.mulf %149, %150 : vector<8x1xf32>
    %cst_44 = arith.constant 9.99999974E-6 : f32
    %152 = vector.broadcast %cst_44 : f32 to vector<8x1xf32>
    %153 = arith.addf %151, %152 : vector<8x1xf32>
    %154 = math.rsqrt %153 : vector<8x1xf32>
    %155 = vector.broadcast %154 : vector<8x1xf32> to vector<8x128xf32>
    %156 = arith.mulf %146, %155 : vector<8x128xf32>
    %157 = vector.broadcast %4 : vector<1x128xf32> to vector<8x128xf32>
    %158 = arith.mulf %156, %157 : vector<8x128xf32>
    %159 = vector.broadcast %5 : vector<1x128xf32> to vector<8x128xf32>
    %160 = arith.addf %158, %159 : vector<8x128xf32>
    %c0_45 = arith.constant 0 : index
    %c2_46 = arith.constant 2 : index
    %c0_47 = arith.constant 0 : index
    %161 = vector.load %arg6[%c0_45, %c2_46, %c0_47] : memref<8x8x128xf32, #tpu.memory_space<vmem>>, vector<8x1x128xf32>
    %162 = vector.shape_cast %161 : vector<8x1x128xf32> to vector<8x128xf32>
    %163 = vector.shape_cast %160 : vector<8x128xf32> to vector<8x1x128xf32>
    tpu.vector_store %arg6[%c0_45, %c2_46, %c0_47], %163 {strides = array<i32>} : memref<8x8x128xf32, #tpu.memory_space<vmem>>, vector<8x1x128xf32>,
    %cst_48 = arith.constant dense<0.000000e+00> : vector<8x512xf32>
    %164 = tpu.matmul %131, %3, %cst_48 {dimension_numbers = #tpu.dot_dimension_numbers<[1], [0], [0], [1], [0, 0, 1, 1], [], []>} : vector<8x128xf32>, vector<128x512xf32>, vector<8x512xf32> -> vector<8x512xf32>
    %c0_49 = arith.constant 0 : index
    %c3 = arith.constant 3 : index
    %c0_50 = arith.constant 0 : index
    %165 = vector.load %arg2[%c0_49, %c3, %c0_50] : memref<8x8x512xf32, #tpu.memory_space<vmem>>, vector<8x1x512xf32>
    %166 = vector.shape_cast %165 : vector<8x1x512xf32> to vector<8x512xf32>
    %167 = arith.addf %164, %166 : vector<8x512xf32>
    %168 = vector.extract_strided_slice %167 {offsets = [0, 0], sizes = [8, 384], strides = [1, 1]} : vector<8x512xf32> to vector<8x384xf32>
    %169 = arith.negf %168 : vector<8x384xf32>
    %170 = math.exp %169 : vector<8x384xf32>
    %cst_51 = arith.constant 1.000000e+00 : f32
    %171 = vector.broadcast %cst_51 : f32 to vector<8x384xf32>
    %172 = arith.addf %171, %170 : vector<8x384xf32>
    %173 = arith.divf %171, %172 : vector<8x384xf32>
    %174 = vector.extract_strided_slice %173 {offsets = [0, 0], sizes = [8, 128], strides = [1, 1]} : vector<8x384xf32> to vector<8x128xf32>
    %175 = vector.extract_strided_slice %173 {offsets = [0, 128], sizes = [8, 128], strides = [1, 1]} : vector<8x384xf32> to vector<8x128xf32>
    %176 = vector.extract_strided_slice %173 {offsets = [0, 256], sizes = [8, 128], strides = [1, 1]} : vector<8x384xf32> to vector<8x128xf32>
    %177 = vector.extract_strided_slice %167 {offsets = [0, 384], sizes = [8, 128], strides = [1, 1]} : vector<8x512xf32> to vector<8x128xf32>
    %178 = math.tanh %177 : vector<8x128xf32>
    %179 = arith.mulf %175, %129 : vector<8x128xf32>
    %180 = arith.mulf %174, %178 : vector<8x128xf32>
    %181 = arith.addf %179, %180 : vector<8x128xf32>
    %182 = math.tanh %181 : vector<8x128xf32>
    %183 = arith.mulf %176, %182 : vector<8x128xf32>
    %184 = tpu.iota {dimensions = array<i32: 1>} : vector<1x128xi32>
    %c32_i32_52 = arith.constant 32 : i32
    %185 = vector.broadcast %c32_i32_52 : i32 to vector<1x128xi32>
    %186 = arith.cmpi slt, %184, %185 : vector<1x128xi32>
    %187 = arith.extui %186 : vector<1x128xi1> to vector<1x128xi32>
    %188 = arith.sitofp %187 : vector<1x128xi32> to vector<1x128xf32>
    %189 = vector.broadcast %188 : vector<1x128xf32> to vector<8x128xf32>
    %190 = arith.mulf %183, %189 : vector<8x128xf32>
    %cst_53 = arith.constant dense<0.000000e+00> : vector<8xf32>
    %191 = vector.multi_reduction <add>, %190, %cst_53 [1] : vector<8x128xf32> to vector<8xf32>
    %192 = vector.shape_cast %191 : vector<8xf32> to vector<8x1xf32>
    %cst_54 = arith.constant 3.125000e-02 : f32
    %193 = vector.broadcast %cst_54 : f32 to vector<8x1xf32>
    %194 = arith.mulf %192, %193 : vector<8x1xf32>
    %195 = vector.broadcast %194 : vector<8x1xf32> to vector<8x128xf32>
    %196 = arith.subf %183, %195 : vector<8x128xf32>
    %197 = vector.broadcast %188 : vector<1x128xf32> to vector<8x128xf32>
    %198 = arith.mulf %196, %197 : vector<8x128xf32>
    %199 = arith.mulf %198, %198 : vector<8x128xf32>
    %cst_55 = arith.constant dense<0.000000e+00> : vector<8xf32>
    %200 = vector.multi_reduction <add>, %199, %cst_55 [1] : vector<8x128xf32> to vector<8xf32>
    %201 = vector.shape_cast %200 : vector<8xf32> to vector<8x1xf32>
    %cst_56 = arith.constant 3.125000e-02 : f32
    %202 = vector.broadcast %cst_56 : f32 to vector<8x1xf32>
    %203 = arith.mulf %201, %202 : vector<8x1xf32>
    %cst_57 = arith.constant 9.99999974E-6 : f32
    %204 = vector.broadcast %cst_57 : f32 to vector<8x1xf32>
    %205 = arith.addf %203, %204 : vector<8x1xf32>
    %206 = math.rsqrt %205 : vector<8x1xf32>
    %207 = vector.broadcast %206 : vector<8x1xf32> to vector<8x128xf32>
    %208 = arith.mulf %198, %207 : vector<8x128xf32>
    %209 = vector.broadcast %4 : vector<1x128xf32> to vector<8x128xf32>
    %210 = arith.mulf %208, %209 : vector<8x128xf32>
    %211 = vector.broadcast %5 : vector<1x128xf32> to vector<8x128xf32>
    %212 = arith.addf %210, %211 : vector<8x128xf32>
    %c0_58 = arith.constant 0 : index
    %c3_59 = arith.constant 3 : index
    %c0_60 = arith.constant 0 : index
    %213 = vector.load %arg6[%c0_58, %c3_59, %c0_60] : memref<8x8x128xf32, #tpu.memory_space<vmem>>, vector<8x1x128xf32>
    %214 = vector.shape_cast %213 : vector<8x1x128xf32> to vector<8x128xf32>
    %215 = vector.shape_cast %212 : vector<8x128xf32> to vector<8x1x128xf32>
    tpu.vector_store %arg6[%c0_58, %c3_59, %c0_60], %215 {strides = array<i32>} : memref<8x8x128xf32, #tpu.memory_space<vmem>>, vector<8x1x128xf32>,
    %cst_61 = arith.constant dense<0.000000e+00> : vector<8x512xf32>
    %216 = tpu.matmul %183, %3, %cst_61 {dimension_numbers = #tpu.dot_dimension_numbers<[1], [0], [0], [1], [0, 0, 1, 1], [], []>} : vector<8x128xf32>, vector<128x512xf32>, vector<8x512xf32> -> vector<8x512xf32>
    %c0_62 = arith.constant 0 : index
    %c4 = arith.constant 4 : index
    %c0_63 = arith.constant 0 : index
    %217 = vector.load %arg2[%c0_62, %c4, %c0_63] : memref<8x8x512xf32, #tpu.memory_space<vmem>>, vector<8x1x512xf32>
    %218 = vector.shape_cast %217 : vector<8x1x512xf32> to vector<8x512xf32>
    %219 = arith.addf %216, %218 : vector<8x512xf32>
    %220 = vector.extract_strided_slice %219 {offsets = [0, 0], sizes = [8, 384], strides = [1, 1]} : vector<8x512xf32> to vector<8x384xf32>
    %221 = arith.negf %220 : vector<8x384xf32>
    %222 = math.exp %221 : vector<8x384xf32>
    %cst_64 = arith.constant 1.000000e+00 : f32
    %223 = vector.broadcast %cst_64 : f32 to vector<8x384xf32>
    %224 = arith.addf %223, %222 : vector<8x384xf32>
    %225 = arith.divf %223, %224 : vector<8x384xf32>
    %226 = vector.extract_strided_slice %225 {offsets = [0, 0], sizes = [8, 128], strides = [1, 1]} : vector<8x384xf32> to vector<8x128xf32>
    %227 = vector.extract_strided_slice %225 {offsets = [0, 128], sizes = [8, 128], strides = [1, 1]} : vector<8x384xf32> to vector<8x128xf32>
    %228 = vector.extract_strided_slice %225 {offsets = [0, 256], sizes = [8, 128], strides = [1, 1]} : vector<8x384xf32> to vector<8x128xf32>
    %229 = vector.extract_strided_slice %219 {offsets = [0, 384], sizes = [8, 128], strides = [1, 1]} : vector<8x512xf32> to vector<8x128xf32>
    %230 = math.tanh %229 : vector<8x128xf32>
    %231 = arith.mulf %227, %181 : vector<8x128xf32>
    %232 = arith.mulf %226, %230 : vector<8x128xf32>
    %233 = arith.addf %231, %232 : vector<8x128xf32>
    %234 = math.tanh %233 : vector<8x128xf32>
    %235 = arith.mulf %228, %234 : vector<8x128xf32>
    %236 = tpu.iota {dimensions = array<i32: 1>} : vector<1x128xi32>
    %c32_i32_65 = arith.constant 32 : i32
    %237 = vector.broadcast %c32_i32_65 : i32 to vector<1x128xi32>
    %238 = arith.cmpi slt, %236, %237 : vector<1x128xi32>
    %239 = arith.extui %238 : vector<1x128xi1> to vector<1x128xi32>
    %240 = arith.sitofp %239 : vector<1x128xi32> to vector<1x128xf32>
    %241 = vector.broadcast %240 : vector<1x128xf32> to vector<8x128xf32>
    %242 = arith.mulf %235, %241 : vector<8x128xf32>
    %cst_66 = arith.constant dense<0.000000e+00> : vector<8xf32>
    %243 = vector.multi_reduction <add>, %242, %cst_66 [1] : vector<8x128xf32> to vector<8xf32>
    %244 = vector.shape_cast %243 : vector<8xf32> to vector<8x1xf32>
    %cst_67 = arith.constant 3.125000e-02 : f32
    %245 = vector.broadcast %cst_67 : f32 to vector<8x1xf32>
    %246 = arith.mulf %244, %245 : vector<8x1xf32>
    %247 = vector.broadcast %246 : vector<8x1xf32> to vector<8x128xf32>
    %248 = arith.subf %235, %247 : vector<8x128xf32>
    %249 = vector.broadcast %240 : vector<1x128xf32> to vector<8x128xf32>
    %250 = arith.mulf %248, %249 : vector<8x128xf32>
    %251 = arith.mulf %250, %250 : vector<8x128xf32>
    %cst_68 = arith.constant dense<0.000000e+00> : vector<8xf32>
    %252 = vector.multi_reduction <add>, %251, %cst_68 [1] : vector<8x128xf32> to vector<8xf32>
    %253 = vector.shape_cast %252 : vector<8xf32> to vector<8x1xf32>
    %cst_69 = arith.constant 3.125000e-02 : f32
    %254 = vector.broadcast %cst_69 : f32 to vector<8x1xf32>
    %255 = arith.mulf %253, %254 : vector<8x1xf32>
    %cst_70 = arith.constant 9.99999974E-6 : f32
    %256 = vector.broadcast %cst_70 : f32 to vector<8x1xf32>
    %257 = arith.addf %255, %256 : vector<8x1xf32>
    %258 = math.rsqrt %257 : vector<8x1xf32>
    %259 = vector.broadcast %258 : vector<8x1xf32> to vector<8x128xf32>
    %260 = arith.mulf %250, %259 : vector<8x128xf32>
    %261 = vector.broadcast %4 : vector<1x128xf32> to vector<8x128xf32>
    %262 = arith.mulf %260, %261 : vector<8x128xf32>
    %263 = vector.broadcast %5 : vector<1x128xf32> to vector<8x128xf32>
    %264 = arith.addf %262, %263 : vector<8x128xf32>
    %c0_71 = arith.constant 0 : index
    %c4_72 = arith.constant 4 : index
    %c0_73 = arith.constant 0 : index
    %265 = vector.load %arg6[%c0_71, %c4_72, %c0_73] : memref<8x8x128xf32, #tpu.memory_space<vmem>>, vector<8x1x128xf32>
    %266 = vector.shape_cast %265 : vector<8x1x128xf32> to vector<8x128xf32>
    %267 = vector.shape_cast %264 : vector<8x128xf32> to vector<8x1x128xf32>
    tpu.vector_store %arg6[%c0_71, %c4_72, %c0_73], %267 {strides = array<i32>} : memref<8x8x128xf32, #tpu.memory_space<vmem>>, vector<8x1x128xf32>,
    %cst_74 = arith.constant dense<0.000000e+00> : vector<8x512xf32>
    %268 = tpu.matmul %235, %3, %cst_74 {dimension_numbers = #tpu.dot_dimension_numbers<[1], [0], [0], [1], [0, 0, 1, 1], [], []>} : vector<8x128xf32>, vector<128x512xf32>, vector<8x512xf32> -> vector<8x512xf32>
    %c0_75 = arith.constant 0 : index
    %c5 = arith.constant 5 : index
    %c0_76 = arith.constant 0 : index
    %269 = vector.load %arg2[%c0_75, %c5, %c0_76] : memref<8x8x512xf32, #tpu.memory_space<vmem>>, vector<8x1x512xf32>
    %270 = vector.shape_cast %269 : vector<8x1x512xf32> to vector<8x512xf32>
    %271 = arith.addf %268, %270 : vector<8x512xf32>
    %272 = vector.extract_strided_slice %271 {offsets = [0, 0], sizes = [8, 384], strides = [1, 1]} : vector<8x512xf32> to vector<8x384xf32>
    %273 = arith.negf %272 : vector<8x384xf32>
    %274 = math.exp %273 : vector<8x384xf32>
    %cst_77 = arith.constant 1.000000e+00 : f32
    %275 = vector.broadcast %cst_77 : f32 to vector<8x384xf32>
    %276 = arith.addf %275, %274 : vector<8x384xf32>
    %277 = arith.divf %275, %276 : vector<8x384xf32>
    %278 = vector.extract_strided_slice %277 {offsets = [0, 0], sizes = [8, 128], strides = [1, 1]} : vector<8x384xf32> to vector<8x128xf32>
    %279 = vector.extract_strided_slice %277 {offsets = [0, 128], sizes = [8, 128], strides = [1, 1]} : vector<8x384xf32> to vector<8x128xf32>
    %280 = vector.extract_strided_slice %277 {offsets = [0, 256], sizes = [8, 128], strides = [1, 1]} : vector<8x384xf32> to vector<8x128xf32>
    %281 = vector.extract_strided_slice %271 {offsets = [0, 384], sizes = [8, 128], strides = [1, 1]} : vector<8x512xf32> to vector<8x128xf32>
    %282 = math.tanh %281 : vector<8x128xf32>
    %283 = arith.mulf %279, %233 : vector<8x128xf32>
    %284 = arith.mulf %278, %282 : vector<8x128xf32>
    %285 = arith.addf %283, %284 : vector<8x128xf32>
    %286 = math.tanh %285 : vector<8x128xf32>
    %287 = arith.mulf %280, %286 : vector<8x128xf32>
    %288 = tpu.iota {dimensions = array<i32: 1>} : vector<1x128xi32>
    %c32_i32_78 = arith.constant 32 : i32
    %289 = vector.broadcast %c32_i32_78 : i32 to vector<1x128xi32>
    %290 = arith.cmpi slt, %288, %289 : vector<1x128xi32>
    %291 = arith.extui %290 : vector<1x128xi1> to vector<1x128xi32>
    %292 = arith.sitofp %291 : vector<1x128xi32> to vector<1x128xf32>
    %293 = vector.broadcast %292 : vector<1x128xf32> to vector<8x128xf32>
    %294 = arith.mulf %287, %293 : vector<8x128xf32>
    %cst_79 = arith.constant dense<0.000000e+00> : vector<8xf32>
    %295 = vector.multi_reduction <add>, %294, %cst_79 [1] : vector<8x128xf32> to vector<8xf32>
    %296 = vector.shape_cast %295 : vector<8xf32> to vector<8x1xf32>
    %cst_80 = arith.constant 3.125000e-02 : f32
    %297 = vector.broadcast %cst_80 : f32 to vector<8x1xf32>
    %298 = arith.mulf %296, %297 : vector<8x1xf32>
    %299 = vector.broadcast %298 : vector<8x1xf32> to vector<8x128xf32>
    %300 = arith.subf %287, %299 : vector<8x128xf32>
    %301 = vector.broadcast %292 : vector<1x128xf32> to vector<8x128xf32>
    %302 = arith.mulf %300, %301 : vector<8x128xf32>
    %303 = arith.mulf %302, %302 : vector<8x128xf32>
    %cst_81 = arith.constant dense<0.000000e+00> : vector<8xf32>
    %304 = vector.multi_reduction <add>, %303, %cst_81 [1] : vector<8x128xf32> to vector<8xf32>
    %305 = vector.shape_cast %304 : vector<8xf32> to vector<8x1xf32>
    %cst_82 = arith.constant 3.125000e-02 : f32
    %306 = vector.broadcast %cst_82 : f32 to vector<8x1xf32>
    %307 = arith.mulf %305, %306 : vector<8x1xf32>
    %cst_83 = arith.constant 9.99999974E-6 : f32
    %308 = vector.broadcast %cst_83 : f32 to vector<8x1xf32>
    %309 = arith.addf %307, %308 : vector<8x1xf32>
    %310 = math.rsqrt %309 : vector<8x1xf32>
    %311 = vector.broadcast %310 : vector<8x1xf32> to vector<8x128xf32>
    %312 = arith.mulf %302, %311 : vector<8x128xf32>
    %313 = vector.broadcast %4 : vector<1x128xf32> to vector<8x128xf32>
    %314 = arith.mulf %312, %313 : vector<8x128xf32>
    %315 = vector.broadcast %5 : vector<1x128xf32> to vector<8x128xf32>
    %316 = arith.addf %314, %315 : vector<8x128xf32>
    %c0_84 = arith.constant 0 : index
    %c5_85 = arith.constant 5 : index
    %c0_86 = arith.constant 0 : index
    %317 = vector.load %arg6[%c0_84, %c5_85, %c0_86] : memref<8x8x128xf32, #tpu.memory_space<vmem>>, vector<8x1x128xf32>
    %318 = vector.shape_cast %317 : vector<8x1x128xf32> to vector<8x128xf32>
    %319 = vector.shape_cast %316 : vector<8x128xf32> to vector<8x1x128xf32>
    tpu.vector_store %arg6[%c0_84, %c5_85, %c0_86], %319 {strides = array<i32>} : memref<8x8x128xf32, #tpu.memory_space<vmem>>, vector<8x1x128xf32>,
    %cst_87 = arith.constant dense<0.000000e+00> : vector<8x512xf32>
    %320 = tpu.matmul %287, %3, %cst_87 {dimension_numbers = #tpu.dot_dimension_numbers<[1], [0], [0], [1], [0, 0, 1, 1], [], []>} : vector<8x128xf32>, vector<128x512xf32>, vector<8x512xf32> -> vector<8x512xf32>
    %c0_88 = arith.constant 0 : index
    %c6 = arith.constant 6 : index
    %c0_89 = arith.constant 0 : index
    %321 = vector.load %arg2[%c0_88, %c6, %c0_89] : memref<8x8x512xf32, #tpu.memory_space<vmem>>, vector<8x1x512xf32>
    %322 = vector.shape_cast %321 : vector<8x1x512xf32> to vector<8x512xf32>
    %323 = arith.addf %320, %322 : vector<8x512xf32>
    %324 = vector.extract_strided_slice %323 {offsets = [0, 0], sizes = [8, 384], strides = [1, 1]} : vector<8x512xf32> to vector<8x384xf32>
    %325 = arith.negf %324 : vector<8x384xf32>
    %326 = math.exp %325 : vector<8x384xf32>
    %cst_90 = arith.constant 1.000000e+00 : f32
    %327 = vector.broadcast %cst_90 : f32 to vector<8x384xf32>
    %328 = arith.addf %327, %326 : vector<8x384xf32>
    %329 = arith.divf %327, %328 : vector<8x384xf32>
    %330 = vector.extract_strided_slice %329 {offsets = [0, 0], sizes = [8, 128], strides = [1, 1]} : vector<8x384xf32> to vector<8x128xf32>
    %331 = vector.extract_strided_slice %329 {offsets = [0, 128], sizes = [8, 128], strides = [1, 1]} : vector<8x384xf32> to vector<8x128xf32>
    %332 = vector.extract_strided_slice %329 {offsets = [0, 256], sizes = [8, 128], strides = [1, 1]} : vector<8x384xf32> to vector<8x128xf32>
    %333 = vector.extract_strided_slice %323 {offsets = [0, 384], sizes = [8, 128], strides = [1, 1]} : vector<8x512xf32> to vector<8x128xf32>
    %334 = math.tanh %333 : vector<8x128xf32>
    %335 = arith.mulf %331, %285 : vector<8x128xf32>
    %336 = arith.mulf %330, %334 : vector<8x128xf32>
    %337 = arith.addf %335, %336 : vector<8x128xf32>
    %338 = math.tanh %337 : vector<8x128xf32>
    %339 = arith.mulf %332, %338 : vector<8x128xf32>
    %340 = tpu.iota {dimensions = array<i32: 1>} : vector<1x128xi32>
    %c32_i32_91 = arith.constant 32 : i32
    %341 = vector.broadcast %c32_i32_91 : i32 to vector<1x128xi32>
    %342 = arith.cmpi slt, %340, %341 : vector<1x128xi32>
    %343 = arith.extui %342 : vector<1x128xi1> to vector<1x128xi32>
    %344 = arith.sitofp %343 : vector<1x128xi32> to vector<1x128xf32>
    %345 = vector.broadcast %344 : vector<1x128xf32> to vector<8x128xf32>
    %346 = arith.mulf %339, %345 : vector<8x128xf32>
    %cst_92 = arith.constant dense<0.000000e+00> : vector<8xf32>
    %347 = vector.multi_reduction <add>, %346, %cst_92 [1] : vector<8x128xf32> to vector<8xf32>
    %348 = vector.shape_cast %347 : vector<8xf32> to vector<8x1xf32>
    %cst_93 = arith.constant 3.125000e-02 : f32
    %349 = vector.broadcast %cst_93 : f32 to vector<8x1xf32>
    %350 = arith.mulf %348, %349 : vector<8x1xf32>
    %351 = vector.broadcast %350 : vector<8x1xf32> to vector<8x128xf32>
    %352 = arith.subf %339, %351 : vector<8x128xf32>
    %353 = vector.broadcast %344 : vector<1x128xf32> to vector<8x128xf32>
    %354 = arith.mulf %352, %353 : vector<8x128xf32>
    %355 = arith.mulf %354, %354 : vector<8x128xf32>
    %cst_94 = arith.constant dense<0.000000e+00> : vector<8xf32>
    %356 = vector.multi_reduction <add>, %355, %cst_94 [1] : vector<8x128xf32> to vector<8xf32>
    %357 = vector.shape_cast %356 : vector<8xf32> to vector<8x1xf32>
    %cst_95 = arith.constant 3.125000e-02 : f32
    %358 = vector.broadcast %cst_95 : f32 to vector<8x1xf32>
    %359 = arith.mulf %357, %358 : vector<8x1xf32>
    %cst_96 = arith.constant 9.99999974E-6 : f32
    %360 = vector.broadcast %cst_96 : f32 to vector<8x1xf32>
    %361 = arith.addf %359, %360 : vector<8x1xf32>
    %362 = math.rsqrt %361 : vector<8x1xf32>
    %363 = vector.broadcast %362 : vector<8x1xf32> to vector<8x128xf32>
    %364 = arith.mulf %354, %363 : vector<8x128xf32>
    %365 = vector.broadcast %4 : vector<1x128xf32> to vector<8x128xf32>
    %366 = arith.mulf %364, %365 : vector<8x128xf32>
    %367 = vector.broadcast %5 : vector<1x128xf32> to vector<8x128xf32>
    %368 = arith.addf %366, %367 : vector<8x128xf32>
    %c0_97 = arith.constant 0 : index
    %c6_98 = arith.constant 6 : index
    %c0_99 = arith.constant 0 : index
    %369 = vector.load %arg6[%c0_97, %c6_98, %c0_99] : memref<8x8x128xf32, #tpu.memory_space<vmem>>, vector<8x1x128xf32>
    %370 = vector.shape_cast %369 : vector<8x1x128xf32> to vector<8x128xf32>
    %371 = vector.shape_cast %368 : vector<8x128xf32> to vector<8x1x128xf32>
    tpu.vector_store %arg6[%c0_97, %c6_98, %c0_99], %371 {strides = array<i32>} : memref<8x8x128xf32, #tpu.memory_space<vmem>>, vector<8x1x128xf32>,
    %cst_100 = arith.constant dense<0.000000e+00> : vector<8x512xf32>
    %372 = tpu.matmul %339, %3, %cst_100 {dimension_numbers = #tpu.dot_dimension_numbers<[1], [0], [0], [1], [0, 0, 1, 1], [], []>} : vector<8x128xf32>, vector<128x512xf32>, vector<8x512xf32> -> vector<8x512xf32>
    %c0_101 = arith.constant 0 : index
    %c7 = arith.constant 7 : index
    %c0_102 = arith.constant 0 : index
    %373 = vector.load %arg2[%c0_101, %c7, %c0_102] : memref<8x8x512xf32, #tpu.memory_space<vmem>>, vector<8x1x512xf32>
    %374 = vector.shape_cast %373 : vector<8x1x512xf32> to vector<8x512xf32>
    %375 = arith.addf %372, %374 : vector<8x512xf32>
    %376 = vector.extract_strided_slice %375 {offsets = [0, 0], sizes = [8, 384], strides = [1, 1]} : vector<8x512xf32> to vector<8x384xf32>
    %377 = arith.negf %376 : vector<8x384xf32>
    %378 = math.exp %377 : vector<8x384xf32>
    %cst_103 = arith.constant 1.000000e+00 : f32
    %379 = vector.broadcast %cst_103 : f32 to vector<8x384xf32>
    %380 = arith.addf %379, %378 : vector<8x384xf32>
    %381 = arith.divf %379, %380 : vector<8x384xf32>
    %382 = vector.extract_strided_slice %381 {offsets = [0, 0], sizes = [8, 128], strides = [1, 1]} : vector<8x384xf32> to vector<8x128xf32>
    %383 = vector.extract_strided_slice %381 {offsets = [0, 128], sizes = [8, 128], strides = [1, 1]} : vector<8x384xf32> to vector<8x128xf32>
    %384 = vector.extract_strided_slice %381 {offsets = [0, 256], sizes = [8, 128], strides = [1, 1]} : vector<8x384xf32> to vector<8x128xf32>
    %385 = vector.extract_strided_slice %375 {offsets = [0, 384], sizes = [8, 128], strides = [1, 1]} : vector<8x512xf32> to vector<8x128xf32>
    %386 = math.tanh %385 : vector<8x128xf32>
    %387 = arith.mulf %383, %337 : vector<8x128xf32>
    %388 = arith.mulf %382, %386 : vector<8x128xf32>
    %389 = arith.addf %387, %388 : vector<8x128xf32>
    %390 = math.tanh %389 : vector<8x128xf32>
    %391 = arith.mulf %384, %390 : vector<8x128xf32>
    %392 = tpu.iota {dimensions = array<i32: 1>} : vector<1x128xi32>
    %c32_i32_104 = arith.constant 32 : i32
    %393 = vector.broadcast %c32_i32_104 : i32 to vector<1x128xi32>
    %394 = arith.cmpi slt, %392, %393 : vector<1x128xi32>
    %395 = arith.extui %394 : vector<1x128xi1> to vector<1x128xi32>
    %396 = arith.sitofp %395 : vector<1x128xi32> to vector<1x128xf32>
    %397 = vector.broadcast %396 : vector<1x128xf32> to vector<8x128xf32>
    %398 = arith.mulf %391, %397 : vector<8x128xf32>
    %cst_105 = arith.constant dense<0.000000e+00> : vector<8xf32>
    %399 = vector.multi_reduction <add>, %398, %cst_105 [1] : vector<8x128xf32> to vector<8xf32>
    %400 = vector.shape_cast %399 : vector<8xf32> to vector<8x1xf32>
    %cst_106 = arith.constant 3.125000e-02 : f32
    %401 = vector.broadcast %cst_106 : f32 to vector<8x1xf32>
    %402 = arith.mulf %400, %401 : vector<8x1xf32>
    %403 = vector.broadcast %402 : vector<8x1xf32> to vector<8x128xf32>
    %404 = arith.subf %391, %403 : vector<8x128xf32>
    %405 = vector.broadcast %396 : vector<1x128xf32> to vector<8x128xf32>
    %406 = arith.mulf %404, %405 : vector<8x128xf32>
    %407 = arith.mulf %406, %406 : vector<8x128xf32>
    %cst_107 = arith.constant dense<0.000000e+00> : vector<8xf32>
    %408 = vector.multi_reduction <add>, %407, %cst_107 [1] : vector<8x128xf32> to vector<8xf32>
    %409 = vector.shape_cast %408 : vector<8xf32> to vector<8x1xf32>
    %cst_108 = arith.constant 3.125000e-02 : f32
    %410 = vector.broadcast %cst_108 : f32 to vector<8x1xf32>
    %411 = arith.mulf %409, %410 : vector<8x1xf32>
    %cst_109 = arith.constant 9.99999974E-6 : f32
    %412 = vector.broadcast %cst_109 : f32 to vector<8x1xf32>
    %413 = arith.addf %411, %412 : vector<8x1xf32>
    %414 = math.rsqrt %413 : vector<8x1xf32>
    %415 = vector.broadcast %414 : vector<8x1xf32> to vector<8x128xf32>
    %416 = arith.mulf %406, %415 : vector<8x128xf32>
    %417 = vector.broadcast %4 : vector<1x128xf32> to vector<8x128xf32>
    %418 = arith.mulf %416, %417 : vector<8x128xf32>
    %419 = vector.broadcast %5 : vector<1x128xf32> to vector<8x128xf32>
    %420 = arith.addf %418, %419 : vector<8x128xf32>
    %c0_110 = arith.constant 0 : index
    %c7_111 = arith.constant 7 : index
    %c0_112 = arith.constant 0 : index
    %421 = vector.load %arg6[%c0_110, %c7_111, %c0_112] : memref<8x8x128xf32, #tpu.memory_space<vmem>>, vector<8x1x128xf32>
    %422 = vector.shape_cast %421 : vector<8x1x128xf32> to vector<8x128xf32>
    %423 = vector.shape_cast %420 : vector<8x128xf32> to vector<8x1x128xf32>
    tpu.vector_store %arg6[%c0_110, %c7_111, %c0_112], %423 {strides = array<i32>} : memref<8x8x128xf32, #tpu.memory_space<vmem>>, vector<8x1x128xf32>,
    %c0_113 = arith.constant 0 : index
    %c0_114 = arith.constant 0 : index
    %424 = vector.load %arg9[%c0_113, %c0_114] : memref<8x128xf32, #tpu.memory_space<vmem>>, vector<8x128xf32>
    tpu.vector_store %arg9[%c0_113, %c0_114], %391 {strides = array<i32>} : memref<8x128xf32, #tpu.memory_space<vmem>>, vector<8x128xf32>,
    %c0_115 = arith.constant 0 : index
    %c0_116 = arith.constant 0 : index
    %425 = vector.load %arg10[%c0_115, %c0_116] : memref<8x128xf32, #tpu.memory_space<vmem>>, vector<8x128xf32>
    tpu.vector_store %arg10[%c0_115, %c0_116], %389 {strides = array<i32>} : memref<8x128xf32, #tpu.memory_space<vmem>>, vector<8x128xf32>,
    %c1_i32 = arith.constant 1 : i32
    %426 = arith.cmpi eq, %arg1, %c1_i32 : i32
    %427 = arith.extui %426 : i1 to i32
    %c0_i32_117 = arith.constant 0 : i32
    %428 = arith.cmpi ne, %427, %c0_i32_117 : i32
    scf.if %428 {
      %c0_118 = arith.constant 0 : index
      %c0_119 = arith.constant 0 : index
      %429 = vector.load %arg7[%c0_118, %c0_119] : memref<8x128xf32, #tpu.memory_space<vmem>>, vector<8x128xf32>
      tpu.vector_store %arg7[%c0_118, %c0_119], %420 {strides = array<i32>} : memref<8x128xf32, #tpu.memory_space<vmem>>, vector<8x128xf32>,
      %430 = tpu.iota {dimensions = array<i32: 1>} : vector<1x128xi32>
      %c32_i32_120 = arith.constant 32 : i32
      %431 = vector.broadcast %c32_i32_120 : i32 to vector<1x128xi32>
      %432 = arith.cmpi slt, %430, %431 : vector<1x128xi32>
      %433 = arith.extui %432 : vector<1x128xi1> to vector<1x128xi32>
      %434 = arith.sitofp %433 : vector<1x128xi32> to vector<1x128xf32>
      %435 = vector.broadcast %434 : vector<1x128xf32> to vector<8x128xf32>
      %436 = arith.mulf %389, %435 : vector<8x128xf32>
      %cst_121 = arith.constant dense<0.000000e+00> : vector<8xf32>
      %437 = vector.multi_reduction <add>, %436, %cst_121 [1] : vector<8x128xf32> to vector<8xf32>
      %438 = vector.shape_cast %437 : vector<8xf32> to vector<8x1xf32>
      %cst_122 = arith.constant 3.125000e-02 : f32
      %439 = vector.broadcast %cst_122 : f32 to vector<8x1xf32>
      %440 = arith.mulf %438, %439 : vector<8x1xf32>
      %441 = vector.broadcast %440 : vector<8x1xf32> to vector<8x128xf32>
      %442 = arith.subf %389, %441 : vector<8x128xf32>
      %443 = vector.broadcast %434 : vector<1x128xf32> to vector<8x128xf32>
      %444 = arith.mulf %442, %443 : vector<8x128xf32>
      %445 = arith.mulf %444, %444 : vector<8x128xf32>
      %cst_123 = arith.constant dense<0.000000e+00> : vector<8xf32>
      %446 = vector.multi_reduction <add>, %445, %cst_123 [1] : vector<8x128xf32> to vector<8xf32>
      %447 = vector.shape_cast %446 : vector<8xf32> to vector<8x1xf32>
      %cst_124 = arith.constant 3.125000e-02 : f32
      %448 = vector.broadcast %cst_124 : f32 to vector<8x1xf32>
      %449 = arith.mulf %447, %448 : vector<8x1xf32>
      %cst_125 = arith.constant 9.99999974E-6 : f32
      %450 = vector.broadcast %cst_125 : f32 to vector<8x1xf32>
      %451 = arith.addf %449, %450 : vector<8x1xf32>
      %452 = math.rsqrt %451 : vector<8x1xf32>
      %453 = vector.broadcast %452 : vector<8x1xf32> to vector<8x128xf32>
      %454 = arith.mulf %444, %453 : vector<8x128xf32>
      %455 = vector.broadcast %4 : vector<1x128xf32> to vector<8x128xf32>
      %456 = arith.mulf %454, %455 : vector<8x128xf32>
      %457 = vector.broadcast %5 : vector<1x128xf32> to vector<8x128xf32>
      %458 = arith.addf %456, %457 : vector<8x128xf32>
      %c0_126 = arith.constant 0 : index
      %c0_127 = arith.constant 0 : index
      %459 = vector.load %arg8[%c0_126, %c0_127] : memref<8x128xf32, #tpu.memory_space<vmem>>, vector<8x128xf32>
      tpu.vector_store %arg8[%c0_126, %c0_127], %458 {strides = array<i32>} : memref<8x128xf32, #tpu.memory_space<vmem>>, vector<8x128xf32>,
    } else {
    }
    return
  }
  func.func @transform_0(%arg0: i32, %arg1: i32) -> (i32, i32, i32) {
    %c0_i32 = arith.constant 0 : i32
    %c0_i32_0 = arith.constant 0 : i32
    return %arg0, %arg1, %c0_i32 : i32, i32, i32
  }
  func.func @transform_1(%arg0: i32, %arg1: i32) -> (i32, i32) {
    %c0_i32 = arith.constant 0 : i32
    %c0_i32_0 = arith.constant 0 : i32
    %c0_i32_1 = arith.constant 0 : i32
    return %c0_i32, %c0_i32_0 : i32, i32
  }
  func.func @transform_2(%arg0: i32, %arg1: i32) -> (i32, i32) {
    %c0_i32 = arith.constant 0 : i32
    %c0_i32_0 = arith.constant 0 : i32
    %c0_i32_1 = arith.constant 0 : i32
    return %c0_i32, %c0_i32_0 : i32, i32
  }
  func.func @transform_3(%arg0: i32, %arg1: i32) -> (i32, i32) {
    %c0_i32 = arith.constant 0 : i32
    %c0_i32_0 = arith.constant 0 : i32
    %c0_i32_1 = arith.constant 0 : i32
    return %c0_i32, %c0_i32_0 : i32, i32
  }
  func.func @transform_4(%arg0: i32, %arg1: i32) -> (i32, i32, i32) {
    %c0_i32 = arith.constant 0 : i32
    %c0_i32_0 = arith.constant 0 : i32
    return %arg0, %arg1, %c0_i32 : i32, i32, i32
  }
  func.func @transform_5(%arg0: i32, %arg1: i32) -> (i32, i32) {
    %c0_i32 = arith.constant 0 : i32
    %c0_i32_0 = arith.constant 0 : i32
    return %arg0, %c0_i32 : i32, i32
  }
  func.func @transform_6(%arg0: i32, %arg1: i32) -> (i32, i32) {
    %c0_i32 = arith.constant 0 : i32
    %c0_i32_0 = arith.constant 0 : i32
    return %arg0, %c0_i32 : i32, i32
  }
}

</mosaic_0001>

<bundles_post_ra>
// kernel: tpu_custom_call.1
= control target key start
LH: loop header
LB: loop body
LE: loop exit
PB: predicated region body
PF: predicated region fallthrough
CT: control target
= control target key end

     0   :  { %s4491_s0 = inlined_call_operand.hbm [shape: f32[8,16,512], index: 0, kind: input, shape index: {}]   ;;  %s4492_s1 = inlined_call_operand.hbm [shape: f32[128,512], index: 1, kind: input, shape index: {}]   ;;  %s4493_s2 = inlined_call_operand.vmem [shape: f32[1,128], index: 2, kind: input, shape index: {}]   ;;  %s4494_s3 = inlined_call_operand.vmem [shape: f32[1,128], index: 3, kind: input, shape index: {}]   ;;  %s4495_s4 = inlined_call_operand.hbm [shape: f32[8,16,128], index: 4, kind: output, shape index: {0}]   ;;  %s4496_s5 = inlined_call_operand.hbm [shape: f32[8,128], index: 5, kind: output, shape index: {1}]   ;;  %s4497_s6 = inlined_call_operand.hbm [shape: f32[8,128], index: 6, kind: output, shape index: {2}]  }
   0x1   :  { %4619 = sst [smem:[#allocation52_spill]] %s4492_s1 }
   0x2   :  { %12 = vsyncpa [#allocation5], 0 }
   0x3   :  { %14 = vsyncpa [#allocation5 + $0x1], 0 }
   0x4   :  { %15 = vsyncpa [#allocation8], 0 }
   0x5   :  { %16 = vsyncpa [#allocation6], 0 }
   0x6   :  { %18 = vsyncpa [#allocation6 + $0x1], 0 }
   0x7   :  { %19 = vsyncpa [#allocation11], 0  ;;  %s3169_s21 = smov 0   ;;  %s3171_s22 = smov 0  }
   0x8   :  { %s3173_s23 = smov 0   ;;  %s3175_s24 = smov 0  }
   0x9   :  { %s3177_s25 = smov 0   ;;  %s3179_s26 = smov 0  }
   0xa LB: > { %4620 = sst [smem:[#allocation17_spill]] %s3101_s21  ;;  %s2497_s27 = sadd.s32 4294967295, %s3121_s26   ;;  %s3121_s26 = sphi %s3179_s26, %s25_s26   ;;  %s3117_s25 = sphi %s3177_s25, %s4792_s25   ;;  %s3113_s24 = sphi %s3175_s24, %s4791_s24   ;;  %s3109_s23 = sphi %s3173_s23, %s4790_s23   ;;  %s3105_s22 = sphi %s3171_s22, %s4789_s22   ;;  %s3101_s21 = sphi %s3169_s21, %s4788_s21  }
   0xb   : > { %4621 = sst [smem:[#allocation18_spill]] %s3121_s26  ;;  %s2498_s28 = sadd.s32 4294967294, %s3121_s26  }
   0xc   : > { %p59_p0 = scmp.ne.s32.totalorder %s3105_s22, %s3101_s21  ;;  %p3203_p1 = scmp.eq.s32.totalorder %s2497_s27, 0 }
   0xd   : > { %p3207_p2 = scmp.eq.s32.totalorder %s2497_s27, 1  ;;  %p154_p3 = scmp.eq.s32.totalorder %s2498_s28, 1 }
   0xe   : > { %p3213_p4 = por %p3203_p1, %p59_p0  ;;  %p2499_p5 = scmp.ge.s32.totalorder %s3121_s26, 1 }
   0xf   : > { %p3218_p6 = por %p154_p3, %p59_p0  ;;  %p213_p7 = scmp.lt.s32.totalorder %s3121_s26, 3 }
  0x10   : > { %s4627_s1 = sld [smem:[#allocation52_spill]]  ;;  %s3123_s13 = smov [#allocation7]  }
  0x11   : > { %s4625_s8 = scalar_select %p3218_p6, 1, 0 }
  0x12   : > { %p3226_p8 = pnand %p2499_p5, %p213_p7  ;;  %s226_s14 = sshll.u32 %s3123_s13, 4  ;;  %s227_s14 = int_to_ptr.vmem [resolvable:$true] %s226_s14 }
  0x13   : > { %4626 = sst [smem:[#allocation19_spill]] %s4625_s8  ;;  %p2501_p11 = scmp.ge.s32.totalorder %s3121_s26, 2 }
  0x14   : > { %p2624_p9 = pneg %p3226_p8  ;;  %s4498_s15 = smov 512  }
  0x15   : > { %s4499_s16 = smov 32   ;;  %s34_s17 = sadd.s32 1, %s3117_s25 }
  0x16   : > { %s224_s11 = sshll.u32 %s4627_s1, 4  ;;  %p2625_p10 = pnand %p2624_p9, %p3203_p1  ;;  %s225_s11 = int_to_ptr.hbm [resolvable:$true] %s224_s11 }
  0x17   : > { %p35_p12 = scmp.ge.s32.totalorder %s34_s17, 2  ;;  %s46_s18 = sadd.s32 1, %s3109_s23 }
  0x18   : > { %2627 = dma.hbm_to_vmem [thread:$0]  (!%p2625_p10), %s225_s11, 8192, %s227_s14, [#allocation8], %s4498_s15, %s4498_s15, %s4499_s16  }
  0x19   : > { %p53_p13 = scmp.ne.s32.totalorder %s3109_s23, %s3105_s22  ;;  %p54_p0 = scmp.eq.s32.totalorder %s3121_s26, 0 }
  0x1a   : > { %s4794_s17 = smov (%p35_p12, %s34_s17), 0  ;;  %p2637_p7 = scmp.lt.s32.totalorder %s3121_s26, 2 }
  0x1b   : > { %4629 = sst [smem:[#allocation20_spill]] %s4794_s17  ;;  %p3245_p3 = por %p54_p0, %p53_p13 }
  0x1c   : > { %p3251_p5 = por %p3207_p2, %p53_p13  ;;  %s42_s27 = ssub.s32 %s3117_s25, %s4794_s17 }
  0x1d   : > { %p44_p9 = scmp.eq.s32.totalorder %s42_s27, 0  ;;  %s246_s28 = sand.u32 1, %s3109_s23  }
  0x1e   : > { %s2502_s9 = sshll.u32 %s246_s28, 8  ;;  %s2607_s11 = sshll.u32 %s3117_s25, 5 }
  0x1f   : > { %s3260_s10 = scalar_select %p44_p9, %s3109_s23, %s46_s18  }
  0x20   : > { %s258_s15 = scalar_lea.hbm %s4491_s0, %s2607_s11  ;;  %s250_s16 = scalar_lea.vmem [#allocation4], %s2502_s9 }
  0x21   : > { %s261_s1 = sshll.u32 %s250_s16, 4  ;;  %s259_s8 = sshll.u32 %s258_s15, 4  ;;  %s262_s1 = int_to_ptr.vmem [resolvable:$true] %s261_s1  ;;  %s260_s8 = int_to_ptr.hbm [resolvable:$true] %s259_s8 }
  0x22   : > { %p2629_p10 = pnand %p2637_p7, %p3245_p3  ;;  %s247_s21 = scalar_lea.sflag [#allocation5], %s246_s28 }
  0x23   : > { %s3126_s17 = smov 1024   ;;  %s4632_s26 = smov 32  }
  0x24   : > { %s4633_s27 = smov 512   ;;  %273 = sbr.rel (%p3226_p8) target bundleno = 2027 (0x7eb), region = 36 }
  0x25   : > { %2631 = dma.hbm_to_vmem [thread:$0]  (!%p2629_p10), %s260_s8, 4096, %s262_s1, %s247_s21, %s3126_s17, %s4633_s27, %s4632_s26  }
  0x29   : > { %s3273_s18 = sand.u32 1, %s3105_s22  }
  0x2a   : > { %s2506_s16 = sshll.u32 %s3273_s18, 8  ;;  %s276_s15 = scalar_lea.sflag [#allocation5], %s3273_s18 }
  0x2b   : > { %s3277_s9 = scalar_lea.vmem [#allocation4], %s2506_s16 }
  0x2c   : > { %3084 = dma.done.wait (%p3213_p4), %s276_s15, 4096  }
  0x2d   : > { %3086 = vsyncadd (%p3213_p4), %s276_s15, 4294963200 }
  0x2e   : > { %3088 = dma.done.wait (%p3203_p1), [#allocation8], 8192  }
  0x2f   : > { %3090 = vsyncadd (%p3203_p1), [#allocation8], 4294959104  ;;  %s2508_s1 = sshll.u32 %s3273_s18, 6  ;;  %p2509_p8 = scmp.ne.s32.totalorder %s3113_s24, 0 }
  0x30   : > { %s3288_s21 = scalar_lea.vmem [#allocation9], %s2508_s1 }
  0x31   : > { %319 = sbr.rel (%p2509_p8) target bundleno = 57 (0x39), region = 48 }
  0x36   : > { %v3127_v0 = vmov 0.0  }
  0x37   : > { %320 = vst [vmem:[#allocation2] sm:$0xff] %v3127_v0 }
  0x38   : > { %321 = vst [vmem:[#allocation3] sm:$0xff] %v3127_v0 }
  0x39 PF: > { %v3291_v1 = vld [vmem:[#allocation7 + $0x1e0] sm:$0xff]  ;;  %v3293_v2 = vld [vmem:[#allocation7 + $0x1e8] sm:$0xff]  ;;  %v3295_v3 = vld [vmem:[#allocation7 + $0x1f0] sm:$0xff]  ;;  %p2598_p1 = scmp.ne.s32.totalorder %s3113_s24, 1 }
  0x3a   : > { %436 = vmatpush.msra.mxu0 %v3291_v1  ;;  %456 = vmatpush.msra.mxu1 %v3293_v2  ;;  %v3299_v4 = vld [vmem:[#allocation7 + $0x1c0] sm:$0xff]  ;;  %v3301_v5 = vld [vmem:[#allocation7 + $0x1c8] sm:$0xff]  ;;  %v3303_v6 = vld [vmem:[#allocation7 + $0x1d0] sm:$0xff] }
  0x3b   : > { %476 = vmatpush.msra.mxu2 %v3295_v3  ;;  %v3306_v7 = vld [vmem:[#allocation7 + $0x1a0] sm:$0xff]  ;;  %v3308_v8 = vld [vmem:[#allocation7 + $0x1a8] sm:$0xff]  ;;  %v3312_v9 = vld [vmem:[#allocation7 + $0x1b0] sm:$0xff] }
  0x3c   : > { %437 = vmatpush.msra.mxu0 %v3299_v4  ;;  %457 = vmatpush.msra.mxu1 %v3301_v5  ;;  %v3315_v10 = vld [vmem:[#allocation7 + $0x180] sm:$0xff]  ;;  %v3317_v11 = vld [vmem:[#allocation7 + $0x188] sm:$0xff]  ;;  %v3321_v12 = vld [vmem:[#allocation7 + $0x190] sm:$0xff] }
  0x3d   : > { %477 = vmatpush.msra.mxu2 %v3303_v6  ;;  %v3324_v13 = vld [vmem:[#allocation7 + $0x160] sm:$0xff]  ;;  %v3326_v14 = vld [vmem:[#allocation7 + $0x168] sm:$0xff]  ;;  %v3330_v15 = vld [vmem:[#allocation7 + $0x170] sm:$0xff] }
  0x3e   : > { %438 = vmatpush.msra.mxu0 %v3306_v7  ;;  %458 = vmatpush.msra.mxu1 %v3308_v8  ;;  %v3333_v16 = vld [vmem:[#allocation7 + $0x140] sm:$0xff]  ;;  %v3335_v17 = vld [vmem:[#allocation7 + $0x148] sm:$0xff]  ;;  %v3337_v18 = vld [vmem:[#allocation7 + $0x1f8] sm:$0xff] }
  0x3f   : > { %478 = vmatpush.msra.mxu2 %v3312_v9  ;;  %v3341_v19 = vld [vmem:[#allocation7 + $0x150] sm:$0xff]  ;;  %v3343_v20 = vld [vmem:[#allocation7 + $0x1d8] sm:$0xff]  ;;  %v3346_v21 = vld [vmem:[#allocation7 + $0x120] sm:$0xff]  ;;  %496 = vmatpush.msra.mxu3 %v3337_v18 }
  0x40   : > { %439 = vmatpush.msra.mxu0 %v3315_v10  ;;  %459 = vmatpush.msra.mxu1 %v3317_v11  ;;  %v3348_v22 = vld [vmem:[#allocation7 + $0x128] sm:$0xff]  ;;  %v3353_v23 = vld [vmem:[#allocation7 + $0x130] sm:$0xff]  ;;  %v3355_v24 = vld [vmem:[#allocation7 + $0x1b8] sm:$0xff] }
  0x41   : > { %479 = vmatpush.msra.mxu2 %v3321_v12  ;;  %v3358_v25 = vld [vmem:[#allocation7 + $0x100] sm:$0xff]  ;;  %v3360_v26 = vld [vmem:[#allocation7 + $0x108] sm:$0xff]  ;;  %497 = vmatpush.msra.mxu3 %v3343_v20  ;;  %v3365_v27 = vld [vmem:[#allocation7 + $0x110] sm:$0xff] }
  0x42   : > { %440 = vmatpush.msra.mxu0 %v3324_v13  ;;  %460 = vmatpush.msra.mxu1 %v3326_v14  ;;  %v3367_v28 = vld [vmem:[#allocation7 + $0x198] sm:$0xff]  ;;  %v3370_v29 = vld [vmem:[#allocation7 + $0xe0] sm:$0xff]  ;;  %v3372_v30 = vld [vmem:[#allocation7 + $0xe8] sm:$0xff] }
  0x43   : > { %480 = vmatpush.msra.mxu2 %v3330_v15  ;;  %498 = vmatpush.msra.mxu3 %v3355_v24  ;;  %v3377_v31 = vld [vmem:[#allocation7 + $0xf0] sm:$0xff]  ;;  %v3379_v32 = vld [vmem:[#allocation7 + $0x178] sm:$0xff]  ;;  %v3382_v33 = vld [vmem:[#allocation7 + $0xc0] sm:$0xff] }
  0x44   : > { %441 = vmatpush.msra.mxu0 %v3333_v16  ;;  %461 = vmatpush.msra.mxu1 %v3335_v17  ;;  %v3384_v34 = vld [vmem:[#allocation7 + $0xc8] sm:$0xff]  ;;  %v3389_v35 = vld [vmem:[#allocation7 + $0xd0] sm:$0xff]  ;;  %v3391_v36 = vld [vmem:[#allocation7 + $0x158] sm:$0xff] }
  0x45   : > { %481 = vmatpush.msra.mxu2 %v3341_v19  ;;  %4634 = vst [vmem:[#allocation21_spill] sm:$0xff] %v3384_v34  ;;  %499 = vmatpush.msra.mxu3 %v3367_v28  ;;  %v3394_v37 = vld [vmem:[#allocation7 + $0xa0] sm:$0xff]  ;;  %v3396_v38 = vld [vmem:[#allocation7 + $0xa8] sm:$0xff]  ;;  %v3401_v39 = vld [vmem:[#allocation7 + $0xb0] sm:$0xff] }
  0x46   : > { %442 = vmatpush.msra.mxu0 %v3346_v21  ;;  %462 = vmatpush.msra.mxu1 %v3348_v22  ;;  %4635 = vst [vmem:[#allocation22_spill] sm:$0xff] %v3389_v35  ;;  %v3403_v40 = vld [vmem:[#allocation7 + $0x80] sm:$0xff]  ;;  %v3405_v41 = vld [vmem:[#allocation7 + $0x138] sm:$0xff]  ;;  %v3408_v42 = vld [vmem:[#allocation7 + $0x88] sm:$0xff] }
  0x47   : > { %482 = vmatpush.msra.mxu2 %v3353_v23  ;;  %4636 = vst [vmem:[#allocation23_spill] sm:$0xff] %v3394_v37  ;;  %500 = vmatpush.msra.mxu3 %v3379_v32  ;;  %v3410_v43 = vld [vmem:[#allocation7 + $0x90] sm:$0xff]  ;;  %v3412_v44 = vld [vmem:[#allocation7 + $0x60] sm:$0xff]  ;;  %v3417_v45 = vld [vmem:[#allocation7 + $0x68] sm:$0xff] }
  0x48   : > { %443 = vmatpush.msra.mxu0 %v3358_v25  ;;  %463 = vmatpush.msra.mxu1 %v3360_v26  ;;  %4637 = vst [vmem:[#allocation24_spill] sm:$0xff] %v3396_v38  ;;  %v3419_v46 = vld [vmem:[#allocation7 + $0x70] sm:$0xff]  ;;  %v3421_v47 = vld [vmem:[#allocation7 + $0x118] sm:$0xff]  ;;  %v3424_v48 = vld [vmem:[#allocation7 + $0x40] sm:$0xff] }
  0x49   : > { %483 = vmatpush.msra.mxu2 %v3365_v27  ;;  %4638 = vst [vmem:[#allocation25_spill] sm:$0xff] %v3401_v39  ;;  %501 = vmatpush.msra.mxu3 %v3391_v36  ;;  %v3426_v49 = vld [vmem:[#allocation7 + $0x48] sm:$0xff]  ;;  %v3432_v51 = vld [vmem:[#allocation7 + $0x50] sm:$0xff]  ;;  %v3434_v52 = vld [vmem:[#allocation7 + $0xf8] sm:$0xff] }
  0x4a   : > { %444 = vmatpush.msra.mxu0 %v3370_v29  ;;  %464 = vmatpush.msra.mxu1 %v3372_v30  ;;  %4639 = vst [vmem:[#allocation26_spill] sm:$0xff] %v3403_v40  ;;  %v390_v50 = vld [vmem:[%s3277_s9] ss:$8 sm:$0xf] }
  0x4b   : > { %484 = vmatpush.msra.mxu2 %v3377_v31  ;;  %4640 = vst [vmem:[#allocation27_spill] sm:$0xff] %v3408_v42  ;;  %502 = vmatpush.msra.mxu3 %v3405_v41  ;;  %v2510_v53 = vld [vmem:[%s3277_s9 + $0x20] ss:$8 sm:$0xf] }
  0x4c   : > { %445 = vmatpush.msra.mxu0 %v3382_v33  ;;  %465 = vmatpush.msra.mxu1 %v3384_v34  ;;  %4641 = vst [vmem:[#allocation28_spill] sm:$0xff] %v3410_v43  ;;  %v3438_v54 = vld [vmem:[#allocation7 + $0x20] sm:$0xff]  ;;  %v3440_v55 = vld [vmem:[#allocation7 + $0x28] sm:$0xff]  ;;  %v3447_v58 = vld [vmem:[#allocation7 + $0x30] sm:$0xff] }
  0x4d   : > { %485 = vmatpush.msra.mxu2 %v3389_v35  ;;  %4642 = vst [vmem:[#allocation29_spill] sm:$0xff] %v3412_v44  ;;  %503 = vmatpush.msra.mxu3 %v3421_v47  ;;  %v2511_v56 = vld [vmem:[%s3277_s9 + $0x40] ss:$8 sm:$0xf] }
  0x4e   : > { %446 = vmatpush.msra.mxu0 %v3394_v37  ;;  %466 = vmatpush.msra.mxu1 %v3396_v38  ;;  %4643 = vst [vmem:[#allocation30_spill] sm:$0xff] %v3417_v45  ;;  %v2512_v57 = vld [vmem:[%s3277_s9 + $0x60] ss:$8 sm:$0xf] }
  0x4f   : > { %4644 = vst [vmem:[#allocation31_spill] sm:$0xff] %v3419_v46  ;;  %486 = vmatpush.msra.mxu2 %v3401_v39  ;;  %v3449_v59 = vld [vmem:[#allocation7 + $0xd8] sm:$0xff]  ;;  %v3453_v61 = vld [vmem:[#allocation7] sm:$0xff]  ;;  %v3455_v62 = vld [vmem:[#allocation7 + $0x8] sm:$0xff]  ;;  %504 = vmatpush.msra.mxu3 %v3434_v52 }
  0x50   : > { %4645 = vst [vmem:[#allocation32_spill] sm:$0xff] %v3424_v48  ;;  %447 = vmatpush.msra.mxu0 %v3403_v40  ;;  %467 = vmatpush.msra.mxu1 %v3408_v42  ;;  %v2513_v60 = vld [vmem:[%s3277_s9 + $0x80] ss:$8 sm:$0xf] }
  0x51   : > { %4646 = vst [vmem:[#allocation33_spill] sm:$0xff] %v3426_v49  ;;  %487 = vmatpush.msra.mxu2 %v3410_v43  ;;  %v3460_v63 = vld [vmem:[#allocation7 + $0xb8] sm:$0xff]  ;;  %505 = vmatpush.msra.mxu3 %v3449_v59 }
  0x52   : > { %4647 = vst [vmem:[#allocation34_spill] sm:$0xff] %v3432_v51  ;;  %448 = vmatpush.msra.mxu0 %v3412_v44  ;;  %468 = vmatpush.msra.mxu1 %v3417_v45  ;;  %v2514_v0 = vld [vmem:[%s3277_s9 + $0xa0] ss:$8 sm:$0xf] }
  0x53   : > { %4648 = vst [vmem:[#allocation35_spill] sm:$0xff] %v3438_v54  ;;  %488 = vmatpush.msra.mxu2 %v3419_v46  ;;  %v2515_v46 = vld [vmem:[%s3277_s9 + $0xc0] ss:$8 sm:$0xf]  ;;  %506 = vmatpush.msra.mxu3 %v3460_v63 }
  0x54   : > { %4649 = vst [vmem:[#allocation36_spill] sm:$0xff] %v3440_v55  ;;  %449 = vmatpush.msra.mxu0 %v3424_v48  ;;  %469 = vmatpush.msra.mxu1 %v3426_v49  ;;  %v2516_v48 = vld [vmem:[%s3277_s9 + $0xe0] ss:$8 sm:$0xf] }
  0x55   : > { %4650 = vst [vmem:[#allocation37_spill] sm:$0xff] %v3447_v58  ;;  %489 = vmatpush.msra.mxu2 %v3432_v51 }
  0x56   : > { %4651 = vst [vmem:[#allocation38_spill] sm:$0xff] %v3449_v59  ;;  %450 = vmatpush.msra.mxu0 %v3438_v54  ;;  %470 = vmatpush.msra.mxu1 %v3440_v55 }
  0x57   : > { %413 = vst [vmem:[#allocation1] ss:$9 sm:$0xff] %v390_v50  ;;  %v3464_v50 = vld [vmem:[#allocation7 + $0x10] sm:$0xff]  ;;  %490 = vmatpush.msra.mxu2 %v3447_v58 }
  0x58   : > { %4652 = vst [vmem:[#allocation39_spill] sm:$0xff] %v3453_v61  ;;  %451 = vmatpush.msra.mxu0 %v3453_v61  ;;  %471 = vmatpush.msra.mxu1 %v3455_v62 }
  0x59   : > { %4653 = vst [vmem:[#allocation40_spill] sm:$0xff] %v3455_v62  ;;  %491 = vmatpush.msra.mxu2 %v3464_v50 }
  0x5a   : > { %415 = vst [vmem:[#allocation1 + $0x1] ss:$9 sm:$0xff] %v2510_v53  ;;  %v388_v53 = vld [vmem:[#allocation2] sm:$0xff]  ;;  %684 = vmatpush.msrb.mxu0 %v3291_v1  ;;  %704 = vmatpush.msrb.mxu1 %v3293_v2 }
  0x5b   : > { %4654 = vst [vmem:[#allocation41_spill] sm:$0xff] %v3460_v63  ;;  %452 = vmatmul.f32.vlgmr.msra.gmra.mxu0 %v388_v53  ;;  %472 = vmatmul.f32.vlgmr.msra.gmra.mxu1 %v388_v53 }
  0x5c   : > { %417 = vst [vmem:[#allocation1 + $0x2] ss:$9 sm:$0xff] %v2511_v56  ;;  %v3475_v56 = vld [vmem:[#allocation7 + $0x98] sm:$0xff]  ;;  %492 = vmatmul.f32.vlgmr.msra.gmra.mxu2 %v388_v53  ;;  %685 = vmatpush.msrb.mxu0 %v3299_v4 }
  0x5d   : > { %4655 = vst [vmem:[#allocation42_spill] sm:$0xff] %v3464_v50  ;;  %507 = vmatpush.msra.mxu3 %v3475_v56  ;;  %724 = vmatpush.msrb.mxu2 %v3295_v3 }
  0x5e   : > { %419 = vst [vmem:[#allocation1 + $0x3] ss:$9 sm:$0xff] %v2512_v57  ;;  %v3478_v57 = vld [vmem:[#allocation7 + $0x78] sm:$0xff]  ;;  %705 = vmatpush.msrb.mxu1 %v3301_v5  ;;  %686 = vmatpush.msrb.mxu0 %v3306_v7 }
  0x5f   : > { %421 = vst [vmem:[#allocation1 + $0x4] ss:$9 sm:$0xff] %v2513_v60  ;;  %v3482_v60 = vld [vmem:[#allocation7 + $0x58] sm:$0xff]  ;;  %508 = vmatpush.msra.mxu3 %v3478_v57  ;;  %725 = vmatpush.msrb.mxu2 %v3303_v6 }
  0x60   : > { %423 = vst [vmem:[#allocation1 + $0x5] ss:$9 sm:$0xff] %v2514_v0  ;;  %706 = vmatpush.msrb.mxu1 %v3308_v8  ;;  %687 = vmatpush.msrb.mxu0 %v3315_v10  ;;  %v4661_v0 = vld [vmem:[#allocation31_spill] sm:$0xff] }
  0x61   : > { %4656 = vst [vmem:[#allocation43_spill] sm:$0xff] %v3475_v56  ;;  %509 = vmatpush.msra.mxu3 %v3482_v60  ;;  %726 = vmatpush.msrb.mxu2 %v3312_v9 }
  0x62   : > { %425 = vst [vmem:[#allocation1 + $0x6] ss:$9 sm:$0xff] %v2515_v46  ;;  %v3488_v46 = vld [vmem:[#allocation7 + $0x38] sm:$0xff]  ;;  %707 = vmatpush.msrb.mxu1 %v3317_v11  ;;  %688 = vmatpush.msrb.mxu0 %v3324_v13 }
  0x63   : > { %427 = vst [vmem:[#allocation1 + $0x7] ss:$9 sm:$0xff] %v2516_v48  ;;  %v3494_v48 = vld [vmem:[#allocation7 + $0x18] sm:$0xff]  ;;  %510 = vmatpush.msra.mxu3 %v3488_v46  ;;  %727 = vmatpush.msrb.mxu2 %v3321_v12 }
  0x64   : > { %4657 = vst [vmem:[#allocation44_spill] sm:$0xff] %v3478_v57  ;;  %708 = vmatpush.msrb.mxu1 %v3326_v14  ;;  %689 = vmatpush.msrb.mxu0 %v3333_v16 }
  0x65   : > { %4658 = vst [vmem:[#allocation45_spill] sm:$0xff] %v3482_v60  ;;  %511 = vmatpush.msra.mxu3 %v3494_v48  ;;  %728 = vmatpush.msrb.mxu2 %v3330_v15 }
  0x66   : > { %4659 = vst [vmem:[#allocation46_spill] sm:$0xff] %v3488_v46  ;;  %512 = vmatmul.f32.vlgmr.msra.gmra.mxu3 %v388_v53  ;;  %709 = vmatpush.msrb.mxu1 %v3335_v17  ;;  %v4662_v53 = vld [vmem:[#allocation32_spill] sm:$0xff] }
  0x67   : > { %4660 = vst [vmem:[#allocation47_spill] sm:$0xff] %v3494_v48  ;;  %744 = vmatpush.msrb.mxu3 %v3337_v18  ;;  %729 = vmatpush.msrb.mxu2 %v3341_v19 }
  0x68   : > { %690 = vmatpush.msrb.mxu0 %v3346_v21  ;;  %710 = vmatpush.msrb.mxu1 %v3348_v22 }
  0x69   : > { %745 = vmatpush.msrb.mxu3 %v3343_v20  ;;  %730 = vmatpush.msrb.mxu2 %v3353_v23 }
  0x6a   : > { %691 = vmatpush.msrb.mxu0 %v3358_v25  ;;  %711 = vmatpush.msrb.mxu1 %v3360_v26 }
  0x6b   : > { %746 = vmatpush.msrb.mxu3 %v3355_v24  ;;  %731 = vmatpush.msrb.mxu2 %v3365_v27 }
  0x6c   : > { %692 = vmatpush.msrb.mxu0 %v3370_v29  ;;  %712 = vmatpush.msrb.mxu1 %v3372_v30 }
  0x6d   : > { %747 = vmatpush.msrb.mxu3 %v3367_v28  ;;  %732 = vmatpush.msrb.mxu2 %v3377_v31 }
  0x6e   : > { %693 = vmatpush.msrb.mxu0 %v3382_v33  ;;  %713 = vmatpush.msrb.mxu1 %v3384_v34 }
  0x6f   : > { %748 = vmatpush.msrb.mxu3 %v3379_v32  ;;  %733 = vmatpush.msrb.mxu2 %v3389_v35 }
  0x70   : > { %694 = vmatpush.msrb.mxu0 %v3394_v37  ;;  %714 = vmatpush.msrb.mxu1 %v3396_v38 }
  0x71   : > { %749 = vmatpush.msrb.mxu3 %v3391_v36  ;;  %734 = vmatpush.msrb.mxu2 %v3401_v39 }
  0x72   : > { %695 = vmatpush.msrb.mxu0 %v3403_v40  ;;  %715 = vmatpush.msrb.mxu1 %v3408_v42 }
  0x73   : > { %750 = vmatpush.msrb.mxu3 %v3405_v41  ;;  %735 = vmatpush.msrb.mxu2 %v3410_v43 }
  0x74   : > { %696 = vmatpush.msrb.mxu0 %v3412_v44  ;;  %716 = vmatpush.msrb.mxu1 %v3417_v45 }
  0x75   : > { %751 = vmatpush.msrb.mxu3 %v3421_v47  ;;  %736 = vmatpush.msrb.mxu2 %v4661_v0 }
  0x76   : > { %697 = vmatpush.msrb.mxu0 %v4662_v53  ;;  %717 = vmatpush.msrb.mxu1 %v3426_v49 }
  0x77   : > { %752 = vmatpush.msrb.mxu3 %v3434_v52  ;;  %737 = vmatpush.msrb.mxu2 %v3432_v51 }
  0x78   : > { %698 = vmatpush.msrb.mxu0 %v3438_v54  ;;  %718 = vmatpush.msrb.mxu1 %v3440_v55 }
  0x79   : > { %753 = vmatpush.msrb.mxu3 %v3449_v59  ;;  %738 = vmatpush.msrb.mxu2 %v3447_v58 }
  0x7a   : > { %699 = vmatpush.msrb.mxu0 %v3453_v61  ;;  %719 = vmatpush.msrb.mxu1 %v3455_v62 }
  0x7b   : > { %754 = vmatpush.msrb.mxu3 %v3460_v63  ;;  %739 = vmatpush.msrb.mxu2 %v3464_v50 }
  0x7c   : > { %921 = vmatpush.msra.mxu0 %v3291_v1  ;;  %941 = vmatpush.msra.mxu1 %v3293_v2 }
  0x7d   : > { %755 = vmatpush.msrb.mxu3 %v3475_v56  ;;  %961 = vmatpush.msra.mxu2 %v3295_v3 }
  0x7e   : > { %922 = vmatpush.msra.mxu0 %v3299_v4  ;;  %942 = vmatpush.msra.mxu1 %v3301_v5 }
  0x7f   : > { %756 = vmatpush.msrb.mxu3 %v3478_v57  ;;  %962 = vmatpush.msra.mxu2 %v3303_v6 }
  0x80   : > { %923 = vmatpush.msra.mxu0 %v3306_v7  ;;  %943 = vmatpush.msra.mxu1 %v3308_v8 }
  0x81   : > { %757 = vmatpush.msrb.mxu3 %v3482_v60  ;;  %963 = vmatpush.msra.mxu2 %v3312_v9 }
  0x82   : > { %924 = vmatpush.msra.mxu0 %v3315_v10  ;;  %944 = vmatpush.msra.mxu1 %v3317_v11 }
  0x83   : > { %758 = vmatpush.msrb.mxu3 %v3488_v46  ;;  %964 = vmatpush.msra.mxu2 %v3321_v12 }
  0x84   : > { %925 = vmatpush.msra.mxu0 %v3324_v13  ;;  %945 = vmatpush.msra.mxu1 %v3326_v14 }
  0x85   : > { %759 = vmatpush.msrb.mxu3 %v3494_v48  ;;  %965 = vmatpush.msra.mxu2 %v3330_v15 }
  0x86   : > { %926 = vmatpush.msra.mxu0 %v3333_v16  ;;  %946 = vmatpush.msra.mxu1 %v3335_v17 }
  0x87   : > { %981 = vmatpush.msra.mxu3 %v3337_v18  ;;  %966 = vmatpush.msra.mxu2 %v3341_v19 }
  0x88   : > { %927 = vmatpush.msra.mxu0 %v3346_v21  ;;  %947 = vmatpush.msra.mxu1 %v3348_v22 }
  0x89   : > { %982 = vmatpush.msra.mxu3 %v3343_v20  ;;  %967 = vmatpush.msra.mxu2 %v3353_v23 }
  0x8a   : > { %928 = vmatpush.msra.mxu0 %v3358_v25  ;;  %948 = vmatpush.msra.mxu1 %v3360_v26 }
  0x8b   : > { %983 = vmatpush.msra.mxu3 %v3355_v24  ;;  %968 = vmatpush.msra.mxu2 %v3365_v27 }
  0x8c   : > { %929 = vmatpush.msra.mxu0 %v3370_v29  ;;  %949 = vmatpush.msra.mxu1 %v3372_v30 }
  0x8d   : > { %984 = vmatpush.msra.mxu3 %v3367_v28  ;;  %969 = vmatpush.msra.mxu2 %v3377_v31 }
  0x8e   : > { %930 = vmatpush.msra.mxu0 %v3382_v33  ;;  %950 = vmatpush.msra.mxu1 %v3384_v34 }
  0x8f   : > { %985 = vmatpush.msra.mxu3 %v3379_v32  ;;  %970 = vmatpush.msra.mxu2 %v3389_v35  ;;  %v579_v35 = vlaneseq }
  0x90   : > { %931 = vmatpush.msra.mxu0 %v3394_v37  ;;  %951 = vmatpush.msra.mxu1 %v3396_v38 }
  0x91   : > { %986 = vmatpush.msra.mxu3 %v3391_v36  ;;  %971 = vmatpush.msra.mxu2 %v3401_v39 }
  0x92   : > { %932 = vmatpush.msra.mxu0 %v3403_v40  ;;  %952 = vmatpush.msra.mxu1 %v3408_v42 }
  0x93   : > { %987 = vmatpush.msra.mxu3 %v3405_v41  ;;  %972 = vmatpush.msra.mxu2 %v3410_v43 }
  0x94   : > { %933 = vmatpush.msra.mxu0 %v3412_v44  ;;  %953 = vmatpush.msra.mxu1 %v3417_v45 }
  0x95   : > { %988 = vmatpush.msra.mxu3 %v3421_v47  ;;  %973 = vmatpush.msra.mxu2 %v4661_v0 }
  0x96   : > { %934 = vmatpush.msra.mxu0 %v4662_v53  ;;  %954 = vmatpush.msra.mxu1 %v3426_v49 }
  0x97   : > { %989 = vmatpush.msra.mxu3 %v3434_v52  ;;  %974 = vmatpush.msra.mxu2 %v3432_v51 }
  0x98   : > { %935 = vmatpush.msra.mxu0 %v3438_v54  ;;  %955 = vmatpush.msra.mxu1 %v3440_v55  ;;  %v428_v54 = vld [vmem:[#allocation1] sm:$0xff]  ;;  %v429_v55 = vld [vmem:[#allocation1 + $0x9] sm:$0xff] }
  0x99   : > { %990 = vmatpush.msra.mxu3 %v3449_v59  ;;  %975 = vmatpush.msra.mxu2 %v3447_v58 }
  0x9a   : > { %936 = vmatpush.msra.mxu0 %v3453_v61  ;;  %956 = vmatpush.msra.mxu1 %v3455_v62  ;;  %v430_v62 = vld [vmem:[#allocation1 + $0x12] sm:$0xff] }
  0x9b   : > { %991 = vmatpush.msra.mxu3 %v3460_v63  ;;  %976 = vmatpush.msra.mxu2 %v3464_v50 }
  0x9d   : > { %992 = vmatpush.msra.mxu3 %v3475_v56 }
  0x9f   : > { %993 = vmatpush.msra.mxu3 %v3478_v57 }
  0xa1   : > { %994 = vmatpush.msra.mxu3 %v3482_v60 }
  0xa3   : > { %995 = vmatpush.msra.mxu3 %v3488_v46 }
  0xa5   : > { %996 = vmatpush.msra.mxu3 %v3494_v48  ;;  %v431_v48 = vld [vmem:[#allocation1 + $0x1b] sm:$0xff] }
  0xd8   : > { %v453_v51 = vpop.f32.mrf.mxu0  ;;  %v473_v49 = vpop.f32.mrf.mxu1 }
  0xd9   : > { %v454_v58 = vadd.f32 %v453_v51, %v428_v54  ;;  %v474_v53 = vadd.f32 %v473_v49, %v429_v55 }
  0xdb   : > { %v2517_v0 = vmul.f32 -1.442695, %v454_v58  ;;  %v2518_v61 = vmul.f32 -1.442695, %v474_v53 }
  0xdd   : > { %2705 = vpow2.f32 %v2517_v0 }
  0xde   : > { %2707 = vpow2.f32 %v2518_v61 }
  0xdf   : > { %v493_v50 = vpop.f32.mrf.mxu2 }
  0xe0   : > { %v494_v45 = vadd.f32 %v493_v50, %v430_v62 }
  0xe2   : > { %v2519_v57 = vmul.f32 -1.442695, %v494_v45 }
  0xe3   : > { %v2706_v44 = vpop.eup %2705 }
  0xe4   : > { %v2708_v60 = vpop.eup %2707  ;;  %v525_v56 = vadd.f32 1.0, %v2706_v44  ;;  %2709 = vpow2.f32 %v2519_v57 }
  0xe5   : > { %v526_v46 = vadd.f32 1.0, %v2708_v60 }
  0xe6   : > { %2711 = vrcp.f32 %v525_v56  ;;  %v539_v50 = vand.u32 2147483648, %v525_v56  ;;  %v537_v57 = vand.u32 2147483647, %v525_v56  ;;  %vm533_vm2 = vweird.f32 %v525_v56 }
  0xe7   : > { %2713 = vrcp.f32 %v526_v46  ;;  %v554_v53 = vand.u32 2147483648, %v526_v46  ;;  %v552_v42 = vand.u32 2147483647, %v526_v46  ;;  %vm548_vm3 = vweird.f32 %v526_v46 }
  0xe8   : > { %vm538_vm6 = vcmp.eq.f32.partialorder %v537_v57, 8.507059e+37  ;;  %v2523_v57 = vld [vmem:[%s3277_s9 + $0x41] ss:$8 sm:$0xf] }
  0xe9   : > { %v513_v43 = vpop.f32.mrf.mxu3  ;;  %vm553_vm7 = vcmp.eq.f32.partialorder %v552_v42, 8.507059e+37  ;;  %v3128_v42 = vmov 0.0   ;;  %665 = vst [vmem:[#allocation1 + $0x2] ss:$9 sm:$0xff] %v2523_v57 }
  0xea   : > { %v2710_v51 = vpop.eup %2709  ;;  %v514_v54 = vadd.f32 %v513_v43, %v431_v48 }
  0xeb   : > { %v527_v49 = vadd.f32 1.0, %v2710_v51  ;;  %v540_v51 = vor.u32 1.1754944e-38, %v539_v50  ;;  %v580_v50 = vand.u32 127, %v579_v35 }
  0xec   : > { %v2712_v55 = vpop.eup %2711 }
  0xed   : > { %v2714_v58 = vpop.eup %2713  ;;  %v529_v0 = vmul.f32 %v2712_v55, %v525_v56  ;;  %2715 = vrcp.f32 %v527_v49  ;;  %vm534_vm0 = vweird.f32 %v2712_v55  ;;  %vm563_vm9 = vweird.f32 %v527_v49 }
  0xee   : > { %v544_v61 = vmul.f32 %v2714_v58, %v526_v46  ;;  %2717 = vtanh.f32 %v514_v54  ;;  %vm549_vm1 = vweird.f32 %v2714_v58  ;;  %vm535_vm4 = vmor %vm533_vm2, %vm534_vm0  ;;  %v555_v54 = vor.u32 1.1754944e-38, %v554_v53  ;;  %v2522_v53 = vld [vmem:[%s3277_s9 + $0x21] ss:$8 sm:$0xf] }
  0xef   : > { %v530_v62 = vsub.f32 1.0, %v529_v0  ;;  %vm550_vm5 = vmor %vm548_vm3, %vm549_vm1  ;;  %v389_v0 = vld [vmem:[#allocation3] sm:$0xff]  ;;  %vm581_vm11 = vcmp.lt.s32.totalorder %v580_v50, 32  ;;  %663 = vst [vmem:[#allocation1 + $0x1] ss:$9 sm:$0xff] %v2522_v53 }
  0xf0   : > { %v545_v45 = vsub.f32 1.0, %v544_v61 }
  0xf1   : > { %v531_v44 = vmul.f32 %v2712_v55, %v530_v62 }
  0xf2   : > { %v546_v60 = vmul.f32 %v2714_v58, %v545_v45 }
  0xf3   : > { %v2716_v40 = vpop.eup %2715  ;;  %v532_v63 = vadd.f32 %v2712_v55, %v531_v44 }
  0xf4   : > { %v2718_v43 = vpop.eup %2717  ;;  %v559_v48 = vmul.f32 %v2716_v40, %v527_v49  ;;  %v547_v39 = vadd.f32 %v2714_v58, %v546_v60  ;;  %vm564_vm8 = vweird.f32 %v2716_v40  ;;  %v569_v60 = vand.u32 2147483648, %v527_v49 }
  0xf5   : > { %v536_v61 = vsel %vm535_vm4, %v2712_v55, %v532_v63  ;;  %v567_v63 = vand.u32 2147483647, %v527_v49  ;;  %vm565_vm10 = vmor %vm563_vm9, %vm564_vm8  ;;  %v2521_v49 = vld [vmem:[%s3277_s9 + $0x1] ss:$8 sm:$0xf] }
  0xf6   : > { %v560_v62 = vsub.f32 1.0, %v559_v48  ;;  %v541_v38 = vsel %vm538_vm6, %v540_v51, %v536_v61  ;;  %v551_v37 = vsel %vm550_vm5, %v2714_v58, %v547_v39  ;;  %v570_v39 = vor.u32 1.1754944e-38, %v569_v60  ;;  %661 = vst [vmem:[#allocation1] ss:$9 sm:$0xff] %v2521_v49 }
  0xf7   : > { %v556_v45 = vsel %vm553_vm7, %v555_v54, %v551_v37  ;;  %v575_v59 = vmul.f32 %v2718_v43, %v541_v38  ;;  %vm568_vm12 = vcmp.eq.f32.partialorder %v567_v63, 8.507059e+37  ;;  %v3622_v58 = vsel %vm581_vm11, 1.0, %v3128_v42  ;;  %v2524_v43 = vld [vmem:[%s3277_s9 + $0x61] ss:$8 sm:$0xf] }
  0xf8   : > { %v561_v44 = vmul.f32 %v2716_v40, %v560_v62  ;;  %v574_v56 = vmul.f32 %v556_v45, %v389_v0  ;;  %v2525_v48 = vld [vmem:[%s3277_s9 + $0x81] ss:$8 sm:$0xf]  ;;  %667 = vst [vmem:[#allocation1 + $0x3] ss:$9 sm:$0xff] %v2524_v43 }
  0xf9   : > { %v2526_v51 = vld [vmem:[%s3277_s9 + $0xa1] ss:$8 sm:$0xf]  ;;  %669 = vst [vmem:[#allocation1 + $0x4] ss:$9 sm:$0xff] %v2525_v48 }
  0xfa   : > { %v3619_v34 = vadd.f32 %v575_v59, %v574_v56  ;;  %v562_v46 = vadd.f32 %v2716_v40, %v561_v44  ;;  %v2527_v54 = vld [vmem:[%s3277_s9 + $0xc1] ss:$8 sm:$0xf]  ;;  %671 = vst [vmem:[#allocation1 + $0x5] ss:$9 sm:$0xff] %v2526_v51 }
  0xfb   : > { %v2528_v0 = vld [vmem:[%s3277_s9 + $0xe1] ss:$8 sm:$0xf]  ;;  %673 = vst [vmem:[#allocation1 + $0x6] ss:$9 sm:$0xff] %v2527_v54 }
  0xfc   : > { %2719 = vtanh.f32 %v3619_v34  ;;  %v566_v55 = vsel %vm565_vm10, %v2716_v40, %v562_v46  ;;  %v4690_v40 = vld [vmem:[#allocation47_spill] sm:$0xff]  ;;  %675 = vst [vmem:[#allocation1 + $0x7] ss:$9 sm:$0xff] %v2528_v0 }
  0xfd   : > { %v571_v38 = vsel %vm568_vm12, %v570_v39, %v566_v55 }
 0x102   : > { %v2720_v37 = vpop.eup %2719 }
 0x103   : > { %v3624_v59 = vmul.f32 %v2720_v37, %v571_v38  ;;  %v676_v61 = vld [vmem:[#allocation1] sm:$0xff]  ;;  %v677_v62 = vld [vmem:[#allocation1 + $0x9] sm:$0xff]  ;;  %v678_v63 = vld [vmem:[#allocation1 + $0x12] sm:$0xff] }
 0x104   : > { %v679_v53 = vld [vmem:[#allocation1 + $0x1b] sm:$0xff] }
 0x105   : > { %4663 = vst [vmem:[#allocation48_spill] sm:$0xff] %v3624_v59  ;;  %700 = vmatmul.f32.vlgmr.msrb.gmra.mxu0 %v3624_v59  ;;  %720 = vmatmul.f32.vlgmr.msrb.gmra.mxu1 %v3624_v59  ;;  %v584_v35 = vmul.f32 %v3622_v58, %v3624_v59 }
 0x106   : > { %740 = vmatmul.f32.vlgmr.msrb.gmra.mxu2 %v3624_v59  ;;  %760 = vmatmul.f32.vlgmr.msrb.gmra.mxu3 %v3624_v59 }
 0x107   : > { %585 = vadd.xlane.f32.xlu0 %v584_v35  ;;  %1158 = vmatpush.msrb.mxu0 %v3291_v1  ;;  %v4664_v1 = vld [vmem:[#allocation21_spill] sm:$0xff] }
 0x108   : > { %1178 = vmatpush.msrb.mxu1 %v3293_v2  ;;  %1198 = vmatpush.msrb.mxu2 %v3295_v3  ;;  %v4665_v2 = vld [vmem:[#allocation22_spill] sm:$0xff] }
 0x109   : > { %1218 = vmatpush.msrb.mxu3 %v3337_v18  ;;  %1159 = vmatpush.msrb.mxu0 %v3299_v4  ;;  %v4666_v3 = vld [vmem:[#allocation38_spill] sm:$0xff]  ;;  %v4667_v4 = vld [vmem:[#allocation23_spill] sm:$0xff] }
 0x10a   : > { %1179 = vmatpush.msrb.mxu1 %v3301_v5  ;;  %1199 = vmatpush.msrb.mxu2 %v3303_v6  ;;  %v4668_v5 = vld [vmem:[#allocation24_spill] sm:$0xff]  ;;  %v4669_v6 = vld [vmem:[#allocation25_spill] sm:$0xff] }
 0x10b   : > { %1219 = vmatpush.msrb.mxu3 %v3343_v20  ;;  %1160 = vmatpush.msrb.mxu0 %v3306_v7  ;;  %v4670_v7 = vld [vmem:[#allocation41_spill] sm:$0xff] }
 0x10c   : > { %1180 = vmatpush.msrb.mxu1 %v3308_v8  ;;  %1200 = vmatpush.msrb.mxu2 %v3312_v9  ;;  %v4671_v8 = vld [vmem:[#allocation26_spill] sm:$0xff]  ;;  %v4672_v9 = vld [vmem:[#allocation27_spill] sm:$0xff] }
 0x10d   : > { %1220 = vmatpush.msrb.mxu3 %v3355_v24  ;;  %1161 = vmatpush.msrb.mxu0 %v3315_v10  ;;  %v4673_v10 = vld [vmem:[#allocation28_spill] sm:$0xff] }
 0x10e   : > { %1181 = vmatpush.msrb.mxu1 %v3317_v11  ;;  %1201 = vmatpush.msrb.mxu2 %v3321_v12  ;;  %v4674_v11 = vld [vmem:[#allocation43_spill] sm:$0xff]  ;;  %v4675_v12 = vld [vmem:[#allocation29_spill] sm:$0xff] }
 0x10f   : > { %1221 = vmatpush.msrb.mxu3 %v3367_v28  ;;  %1162 = vmatpush.msrb.mxu0 %v3324_v13  ;;  %v4676_v13 = vld [vmem:[#allocation30_spill] sm:$0xff] }
 0x110   : > { %1182 = vmatpush.msrb.mxu1 %v3326_v14  ;;  %1202 = vmatpush.msrb.mxu2 %v3330_v15  ;;  %v4677_v14 = vld [vmem:[#allocation31_spill] sm:$0xff]  ;;  %v4678_v15 = vld [vmem:[#allocation44_spill] sm:$0xff] }
 0x111   : > { %1222 = vmatpush.msrb.mxu3 %v3379_v32  ;;  %1163 = vmatpush.msrb.mxu0 %v3333_v16  ;;  %v4679_v16 = vld [vmem:[#allocation32_spill] sm:$0xff] }
 0x112   : > { %1183 = vmatpush.msrb.mxu1 %v3335_v17  ;;  %1203 = vmatpush.msrb.mxu2 %v3341_v19  ;;  %v4680_v17 = vld [vmem:[#allocation33_spill] sm:$0xff]  ;;  %v4681_v19 = vld [vmem:[#allocation34_spill] sm:$0xff] }
 0x113   : > { %1223 = vmatpush.msrb.mxu3 %v3391_v36  ;;  %1164 = vmatpush.msrb.mxu0 %v3346_v21  ;;  %v4682_v21 = vld [vmem:[#allocation45_spill] sm:$0xff] }
 0x114   : > { %1184 = vmatpush.msrb.mxu1 %v3348_v22  ;;  %1204 = vmatpush.msrb.mxu2 %v3353_v23  ;;  %v4683_v22 = vld [vmem:[#allocation35_spill] sm:$0xff]  ;;  %v4684_v23 = vld [vmem:[#allocation36_spill] sm:$0xff] }
 0x115   : > { %1224 = vmatpush.msrb.mxu3 %v3405_v41  ;;  %1165 = vmatpush.msrb.mxu0 %v3358_v25  ;;  %v4685_v25 = vld [vmem:[#allocation37_spill] sm:$0xff] }
 0x116   : > { %1185 = vmatpush.msrb.mxu1 %v3360_v26  ;;  %1205 = vmatpush.msrb.mxu2 %v3365_v27  ;;  %v4686_v26 = vld [vmem:[#allocation46_spill] sm:$0xff]  ;;  %v4687_v27 = vld [vmem:[#allocation39_spill] sm:$0xff] }
 0x117   : > { %1225 = vmatpush.msrb.mxu3 %v3421_v47  ;;  %1166 = vmatpush.msrb.mxu0 %v3370_v29  ;;  %v4688_v29 = vld [vmem:[#allocation40_spill] sm:$0xff] }
 0x118   : > { %1186 = vmatpush.msrb.mxu1 %v3372_v30  ;;  %1206 = vmatpush.msrb.mxu2 %v3377_v31  ;;  %v4689_v30 = vld [vmem:[#allocation42_spill] sm:$0xff] }
 0x119   : > { %1226 = vmatpush.msrb.mxu3 %v3434_v52  ;;  %1167 = vmatpush.msrb.mxu0 %v3382_v33 }
 0x11a   : > { %1187 = vmatpush.msrb.mxu1 %v4664_v1  ;;  %1207 = vmatpush.msrb.mxu2 %v4665_v2 }
 0x11b   : > { %1227 = vmatpush.msrb.mxu3 %v4666_v3  ;;  %1168 = vmatpush.msrb.mxu0 %v4667_v4 }
 0x11c   : > { %1188 = vmatpush.msrb.mxu1 %v4668_v5  ;;  %1208 = vmatpush.msrb.mxu2 %v4669_v6 }
 0x11d   : > { %1228 = vmatpush.msrb.mxu3 %v4670_v7  ;;  %1169 = vmatpush.msrb.mxu0 %v4671_v8 }
 0x11e   : > { %1189 = vmatpush.msrb.mxu1 %v4672_v9  ;;  %1209 = vmatpush.msrb.mxu2 %v4673_v10 }
 0x11f   : > { %1229 = vmatpush.msrb.mxu3 %v4674_v11  ;;  %1170 = vmatpush.msrb.mxu0 %v4675_v12 }
 0x120   : > { %1190 = vmatpush.msrb.mxu1 %v4676_v13  ;;  %1210 = vmatpush.msrb.mxu2 %v4677_v14 }
 0x121   : > { %1230 = vmatpush.msrb.mxu3 %v4678_v15  ;;  %1171 = vmatpush.msrb.mxu0 %v4679_v16 }
 0x122   : > { %1191 = vmatpush.msrb.mxu1 %v4680_v17  ;;  %1211 = vmatpush.msrb.mxu2 %v4681_v19 }
 0x123   : > { %1231 = vmatpush.msrb.mxu3 %v4682_v21  ;;  %1172 = vmatpush.msrb.mxu0 %v4683_v22 }
 0x124   : > { %1192 = vmatpush.msrb.mxu1 %v4684_v23  ;;  %1212 = vmatpush.msrb.mxu2 %v4685_v25 }
 0x125   : > { %1232 = vmatpush.msrb.mxu3 %v4686_v26  ;;  %1173 = vmatpush.msrb.mxu0 %v4687_v27 }
 0x126   : > { %1193 = vmatpush.msrb.mxu1 %v4688_v29  ;;  %1213 = vmatpush.msrb.mxu2 %v4689_v30 }
 0x127   : > { %1233 = vmatpush.msrb.mxu3 %v4690_v40 }
 0x182   : > { %v701_v45 = vpop.f32.mrf.mxu0  ;;  %v721_v44 = vpop.f32.mrf.mxu1 }
 0x183   : > { %v702_v56 = vadd.f32 %v701_v45, %v676_v61  ;;  %v722_v46 = vadd.f32 %v721_v44, %v677_v62 }
 0x185   : > { %v2529_v50 = vmul.f32 -1.442695, %v702_v56  ;;  %v2530_v60 = vmul.f32 -1.442695, %v722_v46 }
 0x187   : > { %2721 = vpow2.f32 %v2529_v50 }
 0x188   : > { %2723 = vpow2.f32 %v2530_v60 }
 0x189   : > { %v741_v55 = vpop.f32.mrf.mxu2  ;;  %v761_v57 = vpop.f32.mrf.mxu3 }
 0x18a   : > { %v742_v39 = vadd.f32 %v741_v55, %v678_v63  ;;  %v762_v54 = vadd.f32 %v761_v57, %v679_v53 }
 0x18c   : > { %v2531_v37 = vmul.f32 -1.442695, %v742_v39 }
 0x18d   : > { %v2722_v38 = vpop.eup %2721 }
 0x18e   : > { %v2724_v42 = vpop.eup %2723  ;;  %v773_v35 = vadd.f32 1.0, %v2722_v38  ;;  %2725 = vpow2.f32 %v2531_v37 }
 0x18f   : > { %v774_v49 = vadd.f32 1.0, %v2724_v42 }
 0x190   : > { %2727 = vrcp.f32 %v773_v35  ;;  %v787_v56 = vand.u32 2147483648, %v773_v35  ;;  %v785_v60 = vand.u32 2147483647, %v773_v35  ;;  %vm781_vm15 = vweird.f32 %v773_v35 }
 0x191   : > { %2729 = vrcp.f32 %v774_v49  ;;  %v802_v46 = vand.u32 2147483648, %v774_v49  ;;  %v800_v55 = vand.u32 2147483647, %v774_v49  ;;  %vm796_vm0 = vweird.f32 %v774_v49 }
 0x192   : > { %v788_v42 = vor.u32 1.1754944e-38, %v787_v56  ;;  %vm786_vm3 = vcmp.eq.f32.partialorder %v785_v60, 8.507059e+37 }
 0x193   : > { %v803_v57 = vor.u32 1.1754944e-38, %v802_v46  ;;  %vm801_vm4 = vcmp.eq.f32.partialorder %v800_v55, 8.507059e+37 }
 0x194   : > { %v2726_v43 = vpop.eup %2725 }
 0x195   : > { %v775_v48 = vadd.f32 1.0, %v2726_v43 }
 0x196   : > { %v2728_v51 = vpop.eup %2727 }
 0x197   : > { %v2730_v0 = vpop.eup %2729  ;;  %v777_v61 = vmul.f32 %v2728_v51, %v773_v35  ;;  %2731 = vrcp.f32 %v775_v48  ;;  %vm782_vm13 = vweird.f32 %v2728_v51  ;;  %v817_v56 = vand.u32 2147483648, %v775_v48 }
 0x198   : > { %v792_v62 = vmul.f32 %v2730_v0, %v774_v49  ;;  %2733 = vtanh.f32 %v762_v54  ;;  %vm797_vm14 = vweird.f32 %v2730_v0  ;;  %vm783_vm1 = vmor %vm781_vm15, %vm782_vm13  ;;  %vm811_vm6 = vweird.f32 %v775_v48 }
 0x199   : > { %v778_v45 = vsub.f32 1.0, %v777_v61  ;;  %vm798_vm2 = vmor %vm796_vm0, %vm797_vm14  ;;  %v818_v60 = vor.u32 1.1754944e-38, %v817_v56  ;;  %v3789_v56 = vld [vmem:[#allocation7 + $0x108] sm:$0xff] }
 0x19a   : > { %v793_v44 = vsub.f32 1.0, %v792_v62 }
 0x19b   : > { %v779_v50 = vmul.f32 %v2728_v51, %v778_v45 }
 0x19c   : > { %v794_v63 = vmul.f32 %v2730_v0, %v793_v44 }
 0x19d   : > { %v2732_v39 = vpop.eup %2731  ;;  %v780_v37 = vadd.f32 %v2728_v51, %v779_v50 }
 0x19e   : > { %v807_v38 = vmul.f32 %v2732_v39, %v775_v48  ;;  %v795_v53 = vadd.f32 %v2730_v0, %v794_v63  ;;  %v2734_v54 = vpop.eup %2733  ;;  %vm812_vm5 = vweird.f32 %v2732_v39 }
 0x19f   : > { %v784_v43 = vsel %vm783_vm1, %v2728_v51, %v780_v37  ;;  %v815_v51 = vand.u32 2147483647, %v775_v48  ;;  %vm813_vm7 = vmor %vm811_vm6, %vm812_vm5  ;;  %v3722_v48 = vld [vmem:[#allocation7 + $0x1f0] sm:$0xff]  ;;  %v3729_v37 = vld [vmem:[#allocation7 + $0x1c8] sm:$0xff] }
 0x1a0   : > { %v808_v61 = vsub.f32 1.0, %v807_v38  ;;  %v789_v62 = vsel %vm786_vm3, %v788_v42, %v784_v43  ;;  %v799_v45 = vsel %vm798_vm2, %v2730_v0, %v795_v53  ;;  %v3732_v38 = vld [vmem:[#allocation7 + $0x1d0] sm:$0xff]  ;;  %v3736_v42 = vld [vmem:[#allocation7 + $0x1a0] sm:$0xff]  ;;  %v3739_v53 = vld [vmem:[#allocation7 + $0x1a8] sm:$0xff] }
 0x1a1   : > { %v804_v44 = vsel %vm801_vm4, %v803_v57, %v799_v45  ;;  %v823_v59 = vmul.f32 %v2734_v54, %v789_v62  ;;  %vm816_vm8 = vcmp.eq.f32.partialorder %v815_v51, 8.507059e+37  ;;  %v3746_v57 = vld [vmem:[#allocation7 + $0x180] sm:$0xff]  ;;  %v3749_v43 = vld [vmem:[#allocation7 + $0x188] sm:$0xff] }
 0x1a2   : > { %v809_v40 = vmul.f32 %v2732_v39, %v808_v61  ;;  %v822_v50 = vmul.f32 %v804_v44, %v3619_v34  ;;  %v3756_v54 = vld [vmem:[#allocation7 + $0x160] sm:$0xff]  ;;  %v3759_v61 = vld [vmem:[#allocation7 + $0x168] sm:$0xff] }
 0x1a3   : > { %v3766_v62 = vld [vmem:[#allocation7 + $0x140] sm:$0xff]  ;;  %v3769_v45 = vld [vmem:[#allocation7 + $0x148] sm:$0xff] }
 0x1a4   : > { %v3705_v35 = vadd.f32 %v823_v59, %v822_v50  ;;  %v810_v49 = vadd.f32 %v2732_v39, %v809_v40  ;;  %v3716_v59 = vld [vmem:[#allocation7 + $0x1e0] sm:$0xff]  ;;  %v3719_v40 = vld [vmem:[#allocation7 + $0x1e8] sm:$0xff] }
 0x1a5   : > { %v3776_v44 = vld [vmem:[#allocation7 + $0x120] sm:$0xff]  ;;  %v3779_v50 = vld [vmem:[#allocation7 + $0x128] sm:$0xff] }
 0x1a6   : > { %2735 = vtanh.f32 %v3705_v35  ;;  %v814_v46 = vsel %vm813_vm7, %v2732_v39, %v810_v49  ;;  %v3726_v39 = vld [vmem:[#allocation7 + $0x1c0] sm:$0xff] }
 0x1a7   : > { %v819_v63 = vsel %vm816_vm8, %v818_v60, %v814_v46  ;;  %v3786_v49 = vld [vmem:[#allocation7 + $0x100] sm:$0xff]  ;;  %v3799_v46 = vld [vmem:[#allocation7 + $0xe8] sm:$0xff] }
 0x1a8   : > { %v3796_v51 = vld [vmem:[#allocation7 + $0xe0] sm:$0xff] }
 0x1ac   : > { %v2736_v0 = vpop.eup %2735 }
 0x1ad   : > { %v3708_v55 = vmul.f32 %v2736_v0, %v819_v63 }
 0x1af   : > { %4691 = vst [vmem:[#allocation21_spill] sm:$0xff] %v3708_v55  ;;  %937 = vmatmul.f32.vlgmr.msra.gmra.mxu0 %v3708_v55  ;;  %957 = vmatmul.f32.vlgmr.msra.gmra.mxu1 %v3708_v55  ;;  %v827_v34 = vmul.f32 %v3622_v58, %v3708_v55 }
 0x1b0   : > { %977 = vmatmul.f32.vlgmr.msra.gmra.mxu2 %v3708_v55  ;;  %997 = vmatmul.f32.vlgmr.msra.gmra.mxu3 %v3708_v55  ;;  %v3983_v55 = vld [vmem:[#allocation7 + $0x8] sm:$0xff] }
 0x1b1   : > { %828 = vadd.xlane.f32.xlu0 %v827_v34  ;;  %1395 = vmatpush.msra.mxu0 %v3716_v59 }
 0x1b2   : > { %1415 = vmatpush.msra.mxu1 %v3719_v40  ;;  %1435 = vmatpush.msra.mxu2 %v3722_v48 }
 0x1b3   : > { %1455 = vmatpush.msra.mxu3 %v3337_v18  ;;  %1396 = vmatpush.msra.mxu0 %v3726_v39  ;;  %v3742_v18 = vld [vmem:[#allocation7 + $0x1b0] sm:$0xff] }
 0x1b4   : > { %1416 = vmatpush.msra.mxu1 %v3729_v37  ;;  %1436 = vmatpush.msra.mxu2 %v3732_v38 }
 0x1b5   : > { %1456 = vmatpush.msra.mxu3 %v3343_v20  ;;  %1397 = vmatpush.msra.mxu0 %v3736_v42  ;;  %v3752_v20 = vld [vmem:[#allocation7 + $0x190] sm:$0xff] }
 0x1b6   : > { %1417 = vmatpush.msra.mxu1 %v3739_v53  ;;  %1437 = vmatpush.msra.mxu2 %v3742_v18 }
 0x1b7   : > { %1457 = vmatpush.msra.mxu3 %v3355_v24  ;;  %1398 = vmatpush.msra.mxu0 %v3746_v57  ;;  %v3762_v24 = vld [vmem:[#allocation7 + $0x170] sm:$0xff] }
 0x1b8   : > { %1418 = vmatpush.msra.mxu1 %v3749_v43  ;;  %1438 = vmatpush.msra.mxu2 %v3752_v20 }
 0x1b9   : > { %1458 = vmatpush.msra.mxu3 %v3367_v28  ;;  %1399 = vmatpush.msra.mxu0 %v3756_v54  ;;  %v3772_v28 = vld [vmem:[#allocation7 + $0x150] sm:$0xff] }
 0x1ba   : > { %1419 = vmatpush.msra.mxu1 %v3759_v61  ;;  %1439 = vmatpush.msra.mxu2 %v3762_v24 }
 0x1bb   : > { %1459 = vmatpush.msra.mxu3 %v3379_v32  ;;  %1400 = vmatpush.msra.mxu0 %v3766_v62  ;;  %v3782_v32 = vld [vmem:[#allocation7 + $0x130] sm:$0xff] }
 0x1bc   : > { %1420 = vmatpush.msra.mxu1 %v3769_v45  ;;  %1440 = vmatpush.msra.mxu2 %v3772_v28 }
 0x1bd   : > { %1460 = vmatpush.msra.mxu3 %v3391_v36  ;;  %1401 = vmatpush.msra.mxu0 %v3776_v44  ;;  %v3792_v36 = vld [vmem:[#allocation7 + $0x110] sm:$0xff] }
 0x1be   : > { %1421 = vmatpush.msra.mxu1 %v3779_v50  ;;  %1441 = vmatpush.msra.mxu2 %v3782_v32 }
 0x1bf   : > { %1461 = vmatpush.msra.mxu3 %v3405_v41  ;;  %1402 = vmatpush.msra.mxu0 %v3786_v49  ;;  %v2533_v41 = vld [vmem:[%s3277_s9 + $0x22] ss:$8 sm:$0xf] }
 0x1c0   : > { %1422 = vmatpush.msra.mxu1 %v3789_v56  ;;  %1442 = vmatpush.msra.mxu2 %v3792_v36  ;;  %900 = vst [vmem:[#allocation1 + $0x1] ss:$9 sm:$0xff] %v2533_v41 }
 0x1c1   : > { %1462 = vmatpush.msra.mxu3 %v3421_v47  ;;  %1403 = vmatpush.msra.mxu0 %v3796_v51  ;;  %v2534_v47 = vld [vmem:[%s3277_s9 + $0x42] ss:$8 sm:$0xf] }
 0x1c2   : > { %1423 = vmatpush.msra.mxu1 %v3799_v46  ;;  %1443 = vmatpush.msra.mxu2 %v3377_v31  ;;  %v4692_v31 = vld [vmem:[#allocation47_spill] sm:$0xff]  ;;  %902 = vst [vmem:[#allocation1 + $0x2] ss:$9 sm:$0xff] %v2534_v47 }
 0x1c3   : > { %1463 = vmatpush.msra.mxu3 %v3434_v52  ;;  %1404 = vmatpush.msra.mxu0 %v3382_v33  ;;  %v2532_v33 = vld [vmem:[%s3277_s9 + $0x2] ss:$8 sm:$0xf]  ;;  %4718 = vst [vmem:[#allocation47_spill] sm:$0xff] %v3983_v55 }
 0x1c4   : > { %1424 = vmatpush.msra.mxu1 %v4664_v1  ;;  %1444 = vmatpush.msra.mxu2 %v4665_v2  ;;  %v2535_v52 = vld [vmem:[%s3277_s9 + $0x62] ss:$8 sm:$0xf]  ;;  %898 = vst [vmem:[#allocation1] ss:$9 sm:$0xff] %v2532_v33 }
 0x1c5   : > { %1464 = vmatpush.msra.mxu3 %v4666_v3  ;;  %1405 = vmatpush.msra.mxu0 %v4667_v4  ;;  %v2536_v1 = vld [vmem:[%s3277_s9 + $0x82] ss:$8 sm:$0xf]  ;;  %904 = vst [vmem:[#allocation1 + $0x3] ss:$9 sm:$0xff] %v2535_v52 }
 0x1c6   : > { %1425 = vmatpush.msra.mxu1 %v4668_v5  ;;  %1445 = vmatpush.msra.mxu2 %v4669_v6  ;;  %v2537_v2 = vld [vmem:[%s3277_s9 + $0xa2] ss:$8 sm:$0xf]  ;;  %906 = vst [vmem:[#allocation1 + $0x4] ss:$9 sm:$0xff] %v2536_v1 }
 0x1c7   : > { %1465 = vmatpush.msra.mxu3 %v4670_v7  ;;  %1406 = vmatpush.msra.mxu0 %v4671_v8  ;;  %v2538_v3 = vld [vmem:[%s3277_s9 + $0xc2] ss:$8 sm:$0xf]  ;;  %908 = vst [vmem:[#allocation1 + $0x5] ss:$9 sm:$0xff] %v2537_v2 }
 0x1c8   : > { %1426 = vmatpush.msra.mxu1 %v4672_v9  ;;  %1446 = vmatpush.msra.mxu2 %v4673_v10  ;;  %v2539_v4 = vld [vmem:[%s3277_s9 + $0xe2] ss:$8 sm:$0xf]  ;;  %910 = vst [vmem:[#allocation1 + $0x6] ss:$9 sm:$0xff] %v2538_v3 }
 0x1c9   : > { %1466 = vmatpush.msra.mxu3 %v4674_v11  ;;  %1407 = vmatpush.msra.mxu0 %v4675_v12  ;;  %912 = vst [vmem:[#allocation1 + $0x7] ss:$9 sm:$0xff] %v2539_v4 }
 0x1ca   : > { %1427 = vmatpush.msra.mxu1 %v4676_v13  ;;  %1447 = vmatpush.msra.mxu2 %v4677_v14 }
 0x1cb   : > { %1467 = vmatpush.msra.mxu3 %v4678_v15  ;;  %1408 = vmatpush.msra.mxu0 %v4679_v16 }
 0x1cc   : > { %1428 = vmatpush.msra.mxu1 %v4680_v17  ;;  %1448 = vmatpush.msra.mxu2 %v4681_v19 }
 0x1cd   : > { %1468 = vmatpush.msra.mxu3 %v4682_v21  ;;  %1409 = vmatpush.msra.mxu0 %v4683_v22 }
 0x1ce   : > { %1429 = vmatpush.msra.mxu1 %v4684_v23  ;;  %1449 = vmatpush.msra.mxu2 %v4685_v25 }
 0x1cf   : > { %1469 = vmatpush.msra.mxu3 %v4686_v26  ;;  %1410 = vmatpush.msra.mxu0 %v4687_v27 }
 0x1d0   : > { %1430 = vmatpush.msra.mxu1 %v4688_v29  ;;  %1450 = vmatpush.msra.mxu2 %v4689_v30  ;;  %v913_v5 = vld [vmem:[#allocation1] sm:$0xff]  ;;  %v914_v6 = vld [vmem:[#allocation1 + $0x9] sm:$0xff]  ;;  %v915_v13 = vld [vmem:[#allocation1 + $0x12] sm:$0xff] }
 0x1d1   : > { %1470 = vmatpush.msra.mxu3 %v4692_v31  ;;  %v916_v23 = vld [vmem:[#allocation1 + $0x1b] sm:$0xff] }
 0x22c   : > { %v938_v7 = vpop.f32.mrf.mxu0  ;;  %v958_v8 = vpop.f32.mrf.mxu1 }
 0x22d   : > { %v939_v9 = vadd.f32 %v938_v7, %v913_v5  ;;  %v959_v10 = vadd.f32 %v958_v8, %v914_v6 }
 0x22f   : > { %v2540_v11 = vmul.f32 -1.442695, %v939_v9  ;;  %v2541_v12 = vmul.f32 -1.442695, %v959_v10 }
 0x231   : > { %2737 = vpow2.f32 %v2540_v11 }
 0x232   : > { %2739 = vpow2.f32 %v2541_v12 }
 0x233   : > { %v978_v14 = vpop.f32.mrf.mxu2  ;;  %v998_v25 = vpop.f32.mrf.mxu3 }
 0x234   : > { %v979_v15 = vadd.f32 %v978_v14, %v915_v13  ;;  %v999_v30 = vadd.f32 %v998_v25, %v916_v23 }
 0x236   : > { %v2542_v16 = vmul.f32 -1.442695, %v979_v15 }
 0x237   : > { %v2738_v17 = vpop.eup %2737 }
 0x238   : > { %v2740_v19 = vpop.eup %2739  ;;  %v1010_v21 = vadd.f32 1.0, %v2738_v17  ;;  %2741 = vpow2.f32 %v2542_v16 }
 0x239   : > { %v1011_v22 = vadd.f32 1.0, %v2740_v19 }
 0x23a   : > { %2743 = vrcp.f32 %v1010_v21  ;;  %v1024_v33 = vand.u32 2147483648, %v1010_v21  ;;  %v1022_v52 = vand.u32 2147483647, %v1010_v21  ;;  %vm1018_vm11 = vweird.f32 %v1010_v21 }
 0x23b   : > { %2745 = vrcp.f32 %v1011_v22  ;;  %v1039_v41 = vand.u32 2147483648, %v1011_v22  ;;  %v1037_v2 = vand.u32 2147483647, %v1011_v22  ;;  %vm1033_vm12 = vweird.f32 %v1011_v22 }
 0x23c   : > { %v1025_v6 = vor.u32 1.1754944e-38, %v1024_v33  ;;  %vm1023_vm15 = vcmp.eq.f32.partialorder %v1022_v52, 8.507059e+37  ;;  %v3885_v33 = vld [vmem:[#allocation7 + $0x158] sm:$0xff]  ;;  %v3902_v52 = vld [vmem:[#allocation7 + $0xf0] sm:$0xff] }
 0x23d   : > { %v1040_v8 = vor.u32 1.1754944e-38, %v1039_v41  ;;  %vm1038_vm0 = vcmp.eq.f32.partialorder %v1037_v2, 8.507059e+37  ;;  %v3891_v41 = vld [vmem:[#allocation7 + $0x138] sm:$0xff]  ;;  %v3908_v2 = vld [vmem:[#allocation7 + $0xc0] sm:$0xff] }
 0x23e   : > { %v2742_v26 = vpop.eup %2741 }
 0x23f   : > { %v1012_v27 = vadd.f32 1.0, %v2742_v26 }
 0x240   : > { %v2744_v29 = vpop.eup %2743 }
 0x241   : > { %v2746_v60 = vpop.eup %2745  ;;  %v1014_v0 = vmul.f32 %v2744_v29, %v1010_v21  ;;  %2747 = vrcp.f32 %v1012_v27  ;;  %vm1019_vm9 = vweird.f32 %v2744_v29  ;;  %vm1048_vm2 = vweird.f32 %v1012_v27 }
 0x242   : > { %v1029_v63 = vmul.f32 %v2746_v60, %v1011_v22  ;;  %2749 = vtanh.f32 %v999_v30  ;;  %vm1034_vm10 = vweird.f32 %v2746_v60  ;;  %vm1020_vm13 = vmor %vm1018_vm11, %vm1019_vm9  ;;  %v1054_v22 = vand.u32 2147483648, %v1012_v27 }
 0x243   : > { %v1015_v34 = vsub.f32 1.0, %v1014_v0  ;;  %vm1035_vm14 = vmor %vm1033_vm12, %vm1034_vm10  ;;  %v1052_v23 = vand.u32 2147483647, %v1012_v27  ;;  %v3861_v0 = vld [vmem:[#allocation7 + $0x1d8] sm:$0xff] }
 0x244   : > { %v1030_v31 = vsub.f32 1.0, %v1029_v63  ;;  %v1055_v26 = vor.u32 1.1754944e-38, %v1054_v22  ;;  %v3867_v63 = vld [vmem:[#allocation7 + $0x1b8] sm:$0xff]  ;;  %v3959_v22 = vld [vmem:[#allocation7 + $0x48] sm:$0xff] }
 0x245   : > { %v1016_v47 = vmul.f32 %v2744_v29, %v1015_v34  ;;  %vm1053_vm4 = vcmp.eq.f32.partialorder %v1052_v23, 8.507059e+37  ;;  %v3873_v34 = vld [vmem:[#allocation7 + $0x198] sm:$0xff]  ;;  %4710 = vst [vmem:[#allocation45_spill] sm:$0xff] %v3959_v22  ;;  %v3962_v23 = vld [vmem:[#allocation7 + $0x50] sm:$0xff] }
 0x246   : > { %v1031_v1 = vmul.f32 %v2746_v60, %v1030_v31  ;;  %v3879_v31 = vld [vmem:[#allocation7 + $0x178] sm:$0xff]  ;;  %4711 = vst [vmem:[#allocation35_spill] sm:$0xff] %v3962_v23 }
 0x247   : > { %v2748_v3 = vpop.eup %2747  ;;  %v1017_v4 = vadd.f32 %v2744_v29, %v1016_v47  ;;  %v3897_v47 = vld [vmem:[#allocation7 + $0x118] sm:$0xff] }
 0x248   : > { %v1044_v5 = vmul.f32 %v2748_v3, %v1012_v27  ;;  %v1032_v7 = vadd.f32 %v2746_v60, %v1031_v1  ;;  %v2750_v10 = vpop.eup %2749  ;;  %vm1049_vm1 = vweird.f32 %v2748_v3  ;;  %v3855_v27 = vld [vmem:[#allocation7 + $0x1f8] sm:$0xff] }
 0x249   : > { %v1021_v9 = vsel %vm1020_vm13, %v2744_v29, %v1017_v4  ;;  %vm1050_vm3 = vmor %vm1048_vm2, %vm1049_vm1  ;;  %v3905_v1 = vld [vmem:[#allocation7 + $0xf8] sm:$0xff]  ;;  %v3914_v4 = vld [vmem:[#allocation7 + $0xd0] sm:$0xff] }
 0x24a   : > { %v1045_v11 = vsub.f32 1.0, %v1044_v5  ;;  %v1026_v12 = vsel %vm1023_vm15, %v1025_v6, %v1021_v9  ;;  %v1036_v13 = vsel %vm1035_vm14, %v2746_v60, %v1032_v7  ;;  %4695 = vst [vmem:[#allocation23_spill] sm:$0xff] %v3914_v4  ;;  %v3917_v5 = vld [vmem:[#allocation7 + $0xd8] sm:$0xff]  ;;  %v3920_v6 = vld [vmem:[#allocation7 + $0xa0] sm:$0xff]  ;;  %v3923_v7 = vld [vmem:[#allocation7 + $0xa8] sm:$0xff] }
 0x24b   : > { %v1041_v14 = vsel %vm1038_vm0, %v1040_v8, %v1036_v13  ;;  %v1060_v15 = vmul.f32 %v2750_v10, %v1026_v12  ;;  %4696 = vst [vmem:[#allocation24_spill] sm:$0xff] %v3917_v5  ;;  %v3926_v8 = vld [vmem:[#allocation7 + $0xb0] sm:$0xff]  ;;  %v3929_v9 = vld [vmem:[#allocation7 + $0xb8] sm:$0xff]  ;;  %v3932_v10 = vld [vmem:[#allocation7 + $0x80] sm:$0xff] }
 0x24c   : > { %v1046_v16 = vmul.f32 %v2748_v3, %v1045_v11  ;;  %v1059_v17 = vmul.f32 %v1041_v14, %v3705_v35  ;;  %4697 = vst [vmem:[#allocation25_spill] sm:$0xff] %v3920_v6  ;;  %v3935_v11 = vld [vmem:[#allocation7 + $0x88] sm:$0xff]  ;;  %v3938_v12 = vld [vmem:[#allocation7 + $0x90] sm:$0xff]  ;;  %v3941_v13 = vld [vmem:[#allocation7 + $0x98] sm:$0xff] }
 0x24d   : > { %4698 = vst [vmem:[#allocation41_spill] sm:$0xff] %v3923_v7  ;;  %v3944_v14 = vld [vmem:[#allocation7 + $0x60] sm:$0xff] }
 0x24e   : > { %v3841_v19 = vadd.f32 %v1060_v15, %v1059_v17  ;;  %v1047_v21 = vadd.f32 %v2748_v3, %v1046_v16  ;;  %4699 = vst [vmem:[#allocation26_spill] sm:$0xff] %v3926_v8  ;;  %v3947_v15 = vld [vmem:[#allocation7 + $0x68] sm:$0xff]  ;;  %v3950_v16 = vld [vmem:[#allocation7 + $0x70] sm:$0xff]  ;;  %v3953_v17 = vld [vmem:[#allocation7 + $0x78] sm:$0xff] }
 0x24f   : > { %4700 = vst [vmem:[#allocation27_spill] sm:$0xff] %v3929_v9 }
 0x250   : > { %2751 = vtanh.f32 %v3841_v19  ;;  %v1051_v25 = vsel %vm1050_vm3, %v2748_v3, %v1047_v21  ;;  %v3911_v3 = vld [vmem:[#allocation7 + $0xc8] sm:$0xff]  ;;  %4701 = vst [vmem:[#allocation28_spill] sm:$0xff] %v3932_v10  ;;  %v3956_v21 = vld [vmem:[#allocation7 + $0x40] sm:$0xff] }
 0x251   : > { %v1056_v30 = vsel %vm1053_vm4, %v1055_v26, %v1051_v25  ;;  %4694 = vst [vmem:[#allocation38_spill] sm:$0xff] %v3911_v3  ;;  %v3965_v25 = vld [vmem:[#allocation7 + $0x58] sm:$0xff]  ;;  %v3968_v26 = vld [vmem:[#allocation7 + $0x20] sm:$0xff] }
 0x252   : > { %4702 = vst [vmem:[#allocation43_spill] sm:$0xff] %v3935_v11 }
 0x253   : > { %4703 = vst [vmem:[#allocation29_spill] sm:$0xff] %v3938_v12 }
 0x254   : > { %4704 = vst [vmem:[#allocation30_spill] sm:$0xff] %v3941_v13 }
 0x255   : > { %4705 = vst [vmem:[#allocation31_spill] sm:$0xff] %v3944_v14 }
 0x256   : > { %v2752_v29 = vpop.eup %2751  ;;  %4706 = vst [vmem:[#allocation44_spill] sm:$0xff] %v3947_v15 }
 0x257   : > { %v3844_v60 = vmul.f32 %v2752_v29, %v1056_v30  ;;  %4707 = vst [vmem:[#allocation32_spill] sm:$0xff] %v3950_v16  ;;  %v3971_v29 = vld [vmem:[#allocation7 + $0x28] sm:$0xff]  ;;  %v3974_v30 = vld [vmem:[#allocation7 + $0x30] sm:$0xff] }
 0x258   : > { %4708 = vst [vmem:[#allocation33_spill] sm:$0xff] %v3953_v17 }
 0x259   : > { %4693 = vst [vmem:[#allocation22_spill] sm:$0xff] %v3844_v60  ;;  %1174 = vmatmul.f32.vlgmr.msrb.gmra.mxu0 %v3844_v60  ;;  %1194 = vmatmul.f32.vlgmr.msrb.gmra.mxu1 %v3844_v60  ;;  %v1064_v35 = vmul.f32 %v3622_v58, %v3844_v60 }
 0x25a   : > { %1214 = vmatmul.f32.vlgmr.msrb.gmra.mxu2 %v3844_v60  ;;  %1234 = vmatmul.f32.vlgmr.msrb.gmra.mxu3 %v3844_v60  ;;  %4709 = vst [vmem:[#allocation34_spill] sm:$0xff] %v3956_v21  ;;  %v3980_v60 = vld [vmem:[#allocation7] sm:$0xff] }
 0x25b   : > { %1065 = vadd.xlane.f32.xlu1 %v1064_v35  ;;  %1632 = vmatpush.msrb.mxu0 %v3716_v59  ;;  %4712 = vst [vmem:[#allocation36_spill] sm:$0xff] %v3965_v25  ;;  %v3977_v35 = vld [vmem:[#allocation7 + $0x38] sm:$0xff] }
 0x25c   : > { %1652 = vmatpush.msrb.mxu1 %v3719_v40  ;;  %1672 = vmatpush.msrb.mxu2 %v3722_v48  ;;  %4713 = vst [vmem:[#allocation37_spill] sm:$0xff] %v3968_v26 }
 0x25d   : > { %1692 = vmatpush.msrb.mxu3 %v3855_v27  ;;  %1633 = vmatpush.msrb.mxu0 %v3726_v39  ;;  %4714 = vst [vmem:[#allocation46_spill] sm:$0xff] %v3971_v29 }
 0x25e   : > { %1653 = vmatpush.msrb.mxu1 %v3729_v37  ;;  %1673 = vmatpush.msrb.mxu2 %v3732_v38  ;;  %4715 = vst [vmem:[#allocation39_spill] sm:$0xff] %v3974_v30 }
 0x25f   : > { %1693 = vmatpush.msrb.mxu3 %v3861_v0  ;;  %1634 = vmatpush.msrb.mxu0 %v3736_v42  ;;  %4716 = vst [vmem:[#allocation40_spill] sm:$0xff] %v3977_v35 }
 0x260   : > { %1654 = vmatpush.msrb.mxu1 %v3739_v53  ;;  %1674 = vmatpush.msrb.mxu2 %v3742_v18  ;;  %4717 = vst [vmem:[#allocation42_spill] sm:$0xff] %v3980_v60 }
 0x261   : > { %1694 = vmatpush.msrb.mxu3 %v3867_v63  ;;  %1635 = vmatpush.msrb.mxu0 %v3746_v57 }
 0x262   : > { %1655 = vmatpush.msrb.mxu1 %v3749_v43  ;;  %1675 = vmatpush.msrb.mxu2 %v3752_v20 }
 0x263   : > { %1695 = vmatpush.msrb.mxu3 %v3873_v34  ;;  %1636 = vmatpush.msrb.mxu0 %v3756_v54 }
 0x264   : > { %1656 = vmatpush.msrb.mxu1 %v3759_v61  ;;  %1676 = vmatpush.msrb.mxu2 %v3762_v24 }
 0x265   : > { %1696 = vmatpush.msrb.mxu3 %v3879_v31  ;;  %1637 = vmatpush.msrb.mxu0 %v3766_v62 }
 0x266   : > { %1657 = vmatpush.msrb.mxu1 %v3769_v45  ;;  %1677 = vmatpush.msrb.mxu2 %v3772_v28 }
 0x267   : > { %1697 = vmatpush.msrb.mxu3 %v3885_v33  ;;  %1638 = vmatpush.msrb.mxu0 %v3776_v44 }
 0x268   : > { %1658 = vmatpush.msrb.mxu1 %v3779_v50  ;;  %1678 = vmatpush.msrb.mxu2 %v3782_v32 }
 0x269   : > { %1698 = vmatpush.msrb.mxu3 %v3891_v41  ;;  %1639 = vmatpush.msrb.mxu0 %v3786_v49 }
 0x26a   : > { %1659 = vmatpush.msrb.mxu1 %v3789_v56  ;;  %1679 = vmatpush.msrb.mxu2 %v3792_v36 }
 0x26b   : > { %1699 = vmatpush.msrb.mxu3 %v3897_v47  ;;  %1640 = vmatpush.msrb.mxu0 %v3796_v51 }
 0x26c   : > { %1660 = vmatpush.msrb.mxu1 %v3799_v46  ;;  %1680 = vmatpush.msrb.mxu2 %v3902_v52 }
 0x26d   : > { %1700 = vmatpush.msrb.mxu3 %v3905_v1  ;;  %1641 = vmatpush.msrb.mxu0 %v3908_v2 }
 0x26e   : > { %1661 = vmatpush.msrb.mxu1 %v3911_v3  ;;  %1681 = vmatpush.msrb.mxu2 %v3914_v4 }
 0x26f   : > { %1701 = vmatpush.msrb.mxu3 %v3917_v5  ;;  %1642 = vmatpush.msrb.mxu0 %v3920_v6 }
 0x270   : > { %1662 = vmatpush.msrb.mxu1 %v3923_v7  ;;  %1682 = vmatpush.msrb.mxu2 %v3926_v8 }
 0x271   : > { %1702 = vmatpush.msrb.mxu3 %v3929_v9  ;;  %1643 = vmatpush.msrb.mxu0 %v3932_v10 }
 0x272   : > { %1663 = vmatpush.msrb.mxu1 %v3935_v11  ;;  %1683 = vmatpush.msrb.mxu2 %v3938_v12 }
 0x273   : > { %1703 = vmatpush.msrb.mxu3 %v3941_v13  ;;  %1644 = vmatpush.msrb.mxu0 %v3944_v14 }
 0x274   : > { %1664 = vmatpush.msrb.mxu1 %v3947_v15  ;;  %1684 = vmatpush.msrb.mxu2 %v3950_v16 }
 0x275   : > { %1704 = vmatpush.msrb.mxu3 %v3953_v17  ;;  %1645 = vmatpush.msrb.mxu0 %v3956_v21  ;;  %v2549_v21 = vld [vmem:[%s3277_s9 + $0xc3] ss:$8 sm:$0xf] }
 0x276   : > { %1665 = vmatpush.msrb.mxu1 %v3959_v22  ;;  %1685 = vmatpush.msrb.mxu2 %v3962_v23  ;;  %v2546_v23 = vld [vmem:[%s3277_s9 + $0x63] ss:$8 sm:$0xf]  ;;  %1147 = vst [vmem:[#allocation1 + $0x6] ss:$9 sm:$0xff] %v2549_v21 }
 0x277   : > { %1705 = vmatpush.msrb.mxu3 %v3965_v25  ;;  %1646 = vmatpush.msrb.mxu0 %v3968_v26  ;;  %v2544_v26 = vld [vmem:[%s3277_s9 + $0x23] ss:$8 sm:$0xf]  ;;  %1141 = vst [vmem:[#allocation1 + $0x3] ss:$9 sm:$0xff] %v2546_v23 }
 0x278   : > { %1666 = vmatpush.msrb.mxu1 %v3971_v29  ;;  %1686 = vmatpush.msrb.mxu2 %v3974_v30  ;;  %v3986_v29 = vld [vmem:[#allocation7 + $0x10] sm:$0xff]  ;;  %v3989_v30 = vld [vmem:[#allocation7 + $0x18] sm:$0xff]  ;;  %1137 = vst [vmem:[#allocation1 + $0x1] ss:$9 sm:$0xff] %v2544_v26 }
 0x279   : > { %1706 = vmatpush.msrb.mxu3 %v3977_v35  ;;  %1647 = vmatpush.msrb.mxu0 %v3980_v60  ;;  %4719 = vst [vmem:[#allocation49_spill] sm:$0xff] %v3986_v29  ;;  %v2543_v35 = vld [vmem:[%s3277_s9 + $0x3] ss:$8 sm:$0xf] }
 0x27a   : > { %1667 = vmatpush.msrb.mxu1 %v3983_v55  ;;  %1687 = vmatpush.msrb.mxu2 %v3986_v29  ;;  %4720 = vst [vmem:[#allocation50_spill] sm:$0xff] %v3989_v30  ;;  %v2545_v25 = vld [vmem:[%s3277_s9 + $0x43] ss:$8 sm:$0xf] }
 0x27b   : > { %1707 = vmatpush.msrb.mxu3 %v3989_v30  ;;  %1135 = vst [vmem:[#allocation1] ss:$9 sm:$0xff] %v2543_v35  ;;  %v2547_v60 = vld [vmem:[%s3277_s9 + $0x83] ss:$8 sm:$0xf] }
 0x27c   : > { %v2548_v22 = vld [vmem:[%s3277_s9 + $0xa3] ss:$8 sm:$0xf]  ;;  %1139 = vst [vmem:[#allocation1 + $0x2] ss:$9 sm:$0xff] %v2545_v25 }
 0x27d   : > { %v2550_v55 = vld [vmem:[%s3277_s9 + $0xe3] ss:$8 sm:$0xf]  ;;  %1143 = vst [vmem:[#allocation1 + $0x4] ss:$9 sm:$0xff] %v2547_v60 }
 0x27e   : > { %1145 = vst [vmem:[#allocation1 + $0x5] ss:$9 sm:$0xff] %v2548_v22 }
 0x27f   : > { %1149 = vst [vmem:[#allocation1 + $0x7] ss:$9 sm:$0xff] %v2550_v55 }
 0x286   : > { %v1150_v29 = vld [vmem:[#allocation1] sm:$0xff]  ;;  %v1151_v17 = vld [vmem:[#allocation1 + $0x9] sm:$0xff]  ;;  %v1152_v35 = vld [vmem:[#allocation1 + $0x12] sm:$0xff] }
 0x287   : > { %v1153_v55 = vld [vmem:[#allocation1 + $0x1b] sm:$0xff] }
 0x2d6   : > { %v1175_v16 = vpop.f32.mrf.mxu0  ;;  %v1195_v30 = vpop.f32.mrf.mxu1 }
 0x2d7   : > { %v1176_v15 = vadd.f32 %v1175_v16, %v1150_v29  ;;  %v1196_v14 = vadd.f32 %v1195_v30, %v1151_v17 }
 0x2d9   : > { %v2551_v13 = vmul.f32 -1.442695, %v1176_v15  ;;  %v2552_v12 = vmul.f32 -1.442695, %v1196_v14 }
 0x2db   : > { %2753 = vpow2.f32 %v2551_v13 }
 0x2dc   : > { %2755 = vpow2.f32 %v2552_v12 }
 0x2dd   : > { %v1215_v26 = vpop.f32.mrf.mxu2  ;;  %v1235_v22 = vpop.f32.mrf.mxu3 }
 0x2de   : > { %v1216_v25 = vadd.f32 %v1215_v26, %v1152_v35  ;;  %v1236_v15 = vadd.f32 %v1235_v22, %v1153_v55 }
 0x2e0   : > { %v2553_v11 = vmul.f32 -1.442695, %v1216_v25 }
 0x2e1   : > { %v2754_v23 = vpop.eup %2753 }
 0x2e2   : > { %v2756_v10 = vpop.eup %2755  ;;  %v1247_v60 = vadd.f32 1.0, %v2754_v23  ;;  %2757 = vpow2.f32 %v2553_v11 }
 0x2e3   : > { %v1248_v21 = vadd.f32 1.0, %v2756_v10 }
 0x2e4   : > { %2759 = vrcp.f32 %v1247_v60  ;;  %v1261_v35 = vand.u32 2147483648, %v1247_v60  ;;  %v1259_v10 = vand.u32 2147483647, %v1247_v60  ;;  %vm1255_vm7 = vweird.f32 %v1247_v60 }
 0x2e5   : > { %2761 = vrcp.f32 %v1248_v21  ;;  %v1276_v26 = vand.u32 2147483648, %v1248_v21  ;;  %v1274_v23 = vand.u32 2147483647, %v1248_v21  ;;  %vm1270_vm8 = vweird.f32 %v1248_v21 }
 0x2e6   : > { %v1262_v55 = vor.u32 1.1754944e-38, %v1261_v35  ;;  %vm1260_vm11 = vcmp.eq.f32.partialorder %v1259_v10, 8.507059e+37 }
 0x2e7   : > { %vm1275_vm12 = vcmp.eq.f32.partialorder %v1274_v23, 8.507059e+37  ;;  %v4728_v23 = vld [vmem:[#allocation27_spill] sm:$0xff] }
 0x2e8   : > { %v2758_v9 = vpop.eup %2757 }
 0x2e9   : > { %v1249_v16 = vadd.f32 1.0, %v2758_v9 }
 0x2ea   : > { %v2760_v17 = vpop.eup %2759 }
 0x2eb   : > { %v2762_v14 = vpop.eup %2761  ;;  %v1251_v13 = vmul.f32 %v2760_v17, %v1247_v60  ;;  %2763 = vrcp.f32 %v1249_v16  ;;  %vm1256_vm5 = vweird.f32 %v2760_v17  ;;  %v1291_v35 = vand.u32 2147483648, %v1249_v16 }
 0x2ec   : > { %v1266_v12 = vmul.f32 %v2762_v14, %v1248_v21  ;;  %2765 = vtanh.f32 %v1236_v15  ;;  %vm1271_vm6 = vweird.f32 %v2762_v14  ;;  %vm1257_vm9 = vmor %vm1255_vm7, %vm1256_vm5  ;;  %vm1285_vm14 = vweird.f32 %v1249_v16 }
 0x2ed   : > { %v1252_v29 = vsub.f32 1.0, %v1251_v13  ;;  %vm1272_vm10 = vmor %vm1270_vm8, %vm1271_vm6  ;;  %v1277_v13 = vor.u32 1.1754944e-38, %v1276_v26  ;;  %v1292_v26 = vor.u32 1.1754944e-38, %v1291_v35  ;;  %v4739_v35 = vld [vmem:[#allocation35_spill] sm:$0xff] }
 0x2ee   : > { %v1267_v30 = vsub.f32 1.0, %v1266_v12 }
 0x2ef   : > { %v1253_v25 = vmul.f32 %v2760_v17, %v1252_v29 }
 0x2f0   : > { %v1268_v11 = vmul.f32 %v2762_v14, %v1267_v30 }
 0x2f1   : > { %v2764_v8 = vpop.eup %2763  ;;  %v1254_v7 = vadd.f32 %v2760_v17, %v1253_v25 }
 0x2f2   : > { %v1281_v9 = vmul.f32 %v2764_v8, %v1249_v16  ;;  %v1269_v22 = vadd.f32 %v2762_v14, %v1268_v11  ;;  %v2766_v15 = vpop.eup %2765  ;;  %vm1286_vm13 = vweird.f32 %v2764_v8  ;;  %v4727_v11 = vld [vmem:[#allocation26_spill] sm:$0xff] }
 0x2f3   : > { %v1258_v12 = vsel %vm1257_vm9, %v2760_v17, %v1254_v7  ;;  %v1289_v7 = vand.u32 2147483647, %v1249_v16  ;;  %vm1287_vm15 = vmor %vm1285_vm14, %vm1286_vm13  ;;  %v4726_v16 = vld [vmem:[#allocation41_spill] sm:$0xff] }
 0x2f4   : > { %v1282_v6 = vsub.f32 1.0, %v1281_v9  ;;  %v1263_v29 = vsel %vm1260_vm11, %v1262_v55, %v1258_v12  ;;  %v1273_v5 = vsel %vm1272_vm10, %v2762_v14, %v1269_v22  ;;  %v4729_v9 = vld [vmem:[#allocation28_spill] sm:$0xff]  ;;  %v4730_v55 = vld [vmem:[#allocation43_spill] sm:$0xff]  ;;  %v4731_v22 = vld [vmem:[#allocation29_spill] sm:$0xff] }
 0x2f5   : > { %v1278_v30 = vsel %vm1275_vm12, %v1277_v13, %v1273_v5  ;;  %v1297_v4 = vmul.f32 %v2766_v15, %v1263_v29  ;;  %vm1290_vm0 = vcmp.eq.f32.partialorder %v1289_v7, 8.507059e+37  ;;  %v4732_v13 = vld [vmem:[#allocation30_spill] sm:$0xff]  ;;  %v4733_v12 = vld [vmem:[#allocation31_spill] sm:$0xff]  ;;  %v4734_v15 = vld [vmem:[#allocation44_spill] sm:$0xff] }
 0x2f6   : > { %v1283_v3 = vmul.f32 %v2764_v8, %v1282_v6  ;;  %v1296_v25 = vmul.f32 %v1278_v30, %v3841_v19  ;;  %v4724_v6 = vld [vmem:[#allocation24_spill] sm:$0xff]  ;;  %v4736_v30 = vld [vmem:[#allocation33_spill] sm:$0xff] }
 0x2f7   : > { %v4735_v29 = vld [vmem:[#allocation32_spill] sm:$0xff] }
 0x2f8   : > { %v4001_v60 = vadd.f32 %v1297_v4, %v1296_v25  ;;  %v1284_v21 = vadd.f32 %v2764_v8, %v1283_v3  ;;  %v4722_v3 = vld [vmem:[#allocation38_spill] sm:$0xff]  ;;  %v4723_v4 = vld [vmem:[#allocation23_spill] sm:$0xff]  ;;  %v4740_v7 = vld [vmem:[#allocation36_spill] sm:$0xff] }
 0x2f9   : > { %v4737_v25 = vld [vmem:[#allocation34_spill] sm:$0xff] }
 0x2fa   : > { %2767 = vtanh.f32 %v4001_v60  ;;  %v1288_v17 = vsel %vm1287_vm15, %v2764_v8, %v1284_v21  ;;  %v4725_v8 = vld [vmem:[#allocation25_spill] sm:$0xff] }
 0x2fb   : > { %v1293_v10 = vsel %vm1290_vm0, %v1292_v26, %v1288_v17  ;;  %v4738_v21 = vld [vmem:[#allocation45_spill] sm:$0xff]  ;;  %v4742_v26 = vld [vmem:[#allocation46_spill] sm:$0xff] }
 0x2fc   : > { %v4741_v17 = vld [vmem:[#allocation37_spill] sm:$0xff] }
 0x300   : > { %v2768_v14 = vpop.eup %2767 }
 0x301   : > { %v4004_v5 = vmul.f32 %v2768_v14, %v1293_v10  ;;  %v4743_v14 = vld [vmem:[#allocation39_spill] sm:$0xff]  ;;  %v4744_v10 = vld [vmem:[#allocation40_spill] sm:$0xff] }
 0x303   : > { %4721 = vst [vmem:[#allocation51_spill] sm:$0xff] %v4004_v5  ;;  %1411 = vmatmul.f32.vlgmr.msra.gmra.mxu0 %v4004_v5  ;;  %1431 = vmatmul.f32.vlgmr.msra.gmra.mxu1 %v4004_v5  ;;  %v1301_v19 = vmul.f32 %v3622_v58, %v4004_v5 }
 0x304   : > { %1451 = vmatmul.f32.vlgmr.msra.gmra.mxu2 %v4004_v5  ;;  %1471 = vmatmul.f32.vlgmr.msra.gmra.mxu3 %v4004_v5  ;;  %v4746_v5 = vld [vmem:[#allocation47_spill] sm:$0xff] }
 0x305   : > { %1302 = vadd.xlane.f32.xlu1 %v1301_v19  ;;  %1869 = vmatpush.msra.mxu0 %v3716_v59  ;;  %v4745_v19 = vld [vmem:[#allocation42_spill] sm:$0xff] }
 0x306   : > { %1889 = vmatpush.msra.mxu1 %v3719_v40  ;;  %1909 = vmatpush.msra.mxu2 %v3722_v48 }
 0x307   : > { %1929 = vmatpush.msra.mxu3 %v3855_v27  ;;  %1870 = vmatpush.msra.mxu0 %v3726_v39 }
 0x308   : > { %1890 = vmatpush.msra.mxu1 %v3729_v37  ;;  %1910 = vmatpush.msra.mxu2 %v3732_v38 }
 0x309   : > { %1930 = vmatpush.msra.mxu3 %v3861_v0  ;;  %1871 = vmatpush.msra.mxu0 %v3736_v42 }
 0x30a   : > { %1891 = vmatpush.msra.mxu1 %v3739_v53  ;;  %1911 = vmatpush.msra.mxu2 %v3742_v18 }
 0x30b   : > { %1931 = vmatpush.msra.mxu3 %v3867_v63  ;;  %1872 = vmatpush.msra.mxu0 %v3746_v57 }
 0x30c   : > { %1892 = vmatpush.msra.mxu1 %v3749_v43  ;;  %1912 = vmatpush.msra.mxu2 %v3752_v20 }
 0x30d   : > { %1932 = vmatpush.msra.mxu3 %v3873_v34  ;;  %1873 = vmatpush.msra.mxu0 %v3756_v54 }
 0x30e   : > { %1893 = vmatpush.msra.mxu1 %v3759_v61  ;;  %1913 = vmatpush.msra.mxu2 %v3762_v24 }
 0x30f   : > { %1933 = vmatpush.msra.mxu3 %v3879_v31  ;;  %1874 = vmatpush.msra.mxu0 %v3766_v62 }
 0x310   : > { %1894 = vmatpush.msra.mxu1 %v3769_v45  ;;  %1914 = vmatpush.msra.mxu2 %v3772_v28 }
 0x311   : > { %1934 = vmatpush.msra.mxu3 %v3885_v33  ;;  %1875 = vmatpush.msra.mxu0 %v3776_v44 }
 0x312   : > { %1895 = vmatpush.msra.mxu1 %v3779_v50  ;;  %1915 = vmatpush.msra.mxu2 %v3782_v32 }
 0x313   : > { %1935 = vmatpush.msra.mxu3 %v3891_v41  ;;  %1876 = vmatpush.msra.mxu0 %v3786_v49 }
 0x314   : > { %1896 = vmatpush.msra.mxu1 %v3789_v56  ;;  %1916 = vmatpush.msra.mxu2 %v3792_v36 }
 0x315   : > { %1936 = vmatpush.msra.mxu3 %v3897_v47  ;;  %1877 = vmatpush.msra.mxu0 %v3796_v51 }
 0x316   : > { %1897 = vmatpush.msra.mxu1 %v3799_v46  ;;  %1917 = vmatpush.msra.mxu2 %v3902_v52 }
 0x317   : > { %1937 = vmatpush.msra.mxu3 %v3905_v1  ;;  %1878 = vmatpush.msra.mxu0 %v3908_v2 }
 0x318   : > { %1898 = vmatpush.msra.mxu1 %v4722_v3  ;;  %1918 = vmatpush.msra.mxu2 %v4723_v4 }
 0x319   : > { %1938 = vmatpush.msra.mxu3 %v4724_v6  ;;  %1879 = vmatpush.msra.mxu0 %v4725_v8 }
 0x31a   : > { %1899 = vmatpush.msra.mxu1 %v4726_v16  ;;  %1919 = vmatpush.msra.mxu2 %v4727_v11 }
 0x31b   : > { %1939 = vmatpush.msra.mxu3 %v4728_v23  ;;  %1880 = vmatpush.msra.mxu0 %v4729_v9 }
 0x31c   : > { %1900 = vmatpush.msra.mxu1 %v4730_v55  ;;  %1920 = vmatpush.msra.mxu2 %v4731_v22 }
 0x31d   : > { %1940 = vmatpush.msra.mxu3 %v4732_v13  ;;  %1881 = vmatpush.msra.mxu0 %v4733_v12 }
 0x31e   : > { %1901 = vmatpush.msra.mxu1 %v4734_v15  ;;  %1921 = vmatpush.msra.mxu2 %v4735_v29  ;;  %v2559_v29 = vld [vmem:[%s3277_s9 + $0xa4] ss:$8 sm:$0xf] }
 0x31f   : > { %1941 = vmatpush.msra.mxu3 %v4736_v30  ;;  %1882 = vmatpush.msra.mxu0 %v4737_v25  ;;  %v2555_v25 = vld [vmem:[%s3277_s9 + $0x24] ss:$8 sm:$0xf]  ;;  %1382 = vst [vmem:[#allocation1 + $0x5] ss:$9 sm:$0xff] %v2559_v29 }
 0x320   : > { %1902 = vmatpush.msra.mxu1 %v4738_v21  ;;  %1922 = vmatpush.msra.mxu2 %v4739_v35  ;;  %v4747_v21 = vld [vmem:[#allocation49_spill] sm:$0xff]  ;;  %v4748_v35 = vld [vmem:[#allocation50_spill] sm:$0xff]  ;;  %1374 = vst [vmem:[#allocation1 + $0x1] ss:$9 sm:$0xff] %v2555_v25 }
 0x321   : > { %1942 = vmatpush.msra.mxu3 %v4740_v7  ;;  %1883 = vmatpush.msra.mxu0 %v4741_v17  ;;  %v2554_v7 = vld [vmem:[%s3277_s9 + $0x4] ss:$8 sm:$0xf] }
 0x322   : > { %1903 = vmatpush.msra.mxu1 %v4742_v26  ;;  %1923 = vmatpush.msra.mxu2 %v4743_v14  ;;  %v2556_v30 = vld [vmem:[%s3277_s9 + $0x44] ss:$8 sm:$0xf]  ;;  %1372 = vst [vmem:[#allocation1] ss:$9 sm:$0xff] %v2554_v7 }
 0x323   : > { %1943 = vmatpush.msra.mxu3 %v4744_v10  ;;  %1884 = vmatpush.msra.mxu0 %v4745_v19  ;;  %v2557_v17 = vld [vmem:[%s3277_s9 + $0x64] ss:$8 sm:$0xf]  ;;  %1376 = vst [vmem:[#allocation1 + $0x2] ss:$9 sm:$0xff] %v2556_v30 }
 0x324   : > { %1904 = vmatpush.msra.mxu1 %v4746_v5  ;;  %1924 = vmatpush.msra.mxu2 %v4747_v21  ;;  %v2558_v26 = vld [vmem:[%s3277_s9 + $0x84] ss:$8 sm:$0xf]  ;;  %1378 = vst [vmem:[#allocation1 + $0x3] ss:$9 sm:$0xff] %v2557_v17 }
 0x325   : > { %1944 = vmatpush.msra.mxu3 %v4748_v35  ;;  %v2560_v14 = vld [vmem:[%s3277_s9 + $0xc4] ss:$8 sm:$0xf]  ;;  %1380 = vst [vmem:[#allocation1 + $0x4] ss:$9 sm:$0xff] %v2558_v26 }
 0x326   : > { %v2561_v10 = vld [vmem:[%s3277_s9 + $0xe4] ss:$8 sm:$0xf]  ;;  %1384 = vst [vmem:[#allocation1 + $0x6] ss:$9 sm:$0xff] %v2560_v14 }
 0x327   : > { %1386 = vst [vmem:[#allocation1 + $0x7] ss:$9 sm:$0xff] %v2561_v10 }
 0x32e   : > { %v1387_v5 = vld [vmem:[#allocation1] sm:$0xff]  ;;  %v1388_v21 = vld [vmem:[#allocation1 + $0x9] sm:$0xff]  ;;  %v1389_v7 = vld [vmem:[#allocation1 + $0x12] sm:$0xff] }
 0x32f   : > { %v1390_v14 = vld [vmem:[#allocation1 + $0x1b] sm:$0xff] }
 0x380   : > { %v1412_v19 = vpop.f32.mrf.mxu0  ;;  %v1432_v35 = vpop.f32.mrf.mxu1 }
 0x381   : > { %v1413_v15 = vadd.f32 %v1412_v19, %v1387_v5  ;;  %v1433_v12 = vadd.f32 %v1432_v35, %v1388_v21 }
 0x383   : > { %v2562_v13 = vmul.f32 -1.442695, %v1413_v15  ;;  %v2563_v22 = vmul.f32 -1.442695, %v1433_v12 }
 0x385   : > { %2769 = vpow2.f32 %v2562_v13 }
 0x386   : > { %2771 = vpow2.f32 %v2563_v22 }
 0x387   : > { %v1452_v25 = vpop.f32.mrf.mxu2  ;;  %v1472_v10 = vpop.f32.mrf.mxu3 }
 0x388   : > { %v1453_v30 = vadd.f32 %v1452_v25, %v1389_v7  ;;  %v1473_v15 = vadd.f32 %v1472_v10, %v1390_v14 }
 0x38a   : > { %v2564_v55 = vmul.f32 -1.442695, %v1453_v30 }
 0x38b   : > { %v2770_v17 = vpop.eup %2769 }
 0x38c   : > { %v2772_v9 = vpop.eup %2771  ;;  %v1484_v26 = vadd.f32 1.0, %v2770_v17  ;;  %2773 = vpow2.f32 %v2564_v55 }
 0x38d   : > { %v1485_v29 = vadd.f32 1.0, %v2772_v9 }
 0x38e   : > { %2775 = vrcp.f32 %v1484_v26  ;;  %v1498_v7 = vand.u32 2147483648, %v1484_v26  ;;  %v1496_v9 = vand.u32 2147483647, %v1484_v26  ;;  %vm1492_vm3 = vweird.f32 %v1484_v26 }
 0x38f   : > { %2777 = vrcp.f32 %v1485_v29  ;;  %v1513_v25 = vand.u32 2147483648, %v1485_v29  ;;  %v1511_v17 = vand.u32 2147483647, %v1485_v29  ;;  %vm1507_vm4 = vweird.f32 %v1485_v29 }
 0x390   : > { %v1499_v14 = vor.u32 1.1754944e-38, %v1498_v7  ;;  %vm1497_vm7 = vcmp.eq.f32.partialorder %v1496_v9, 8.507059e+37 }
 0x391   : > { %vm1512_vm8 = vcmp.eq.f32.partialorder %v1511_v17, 8.507059e+37 }
 0x392   : > { %v2774_v23 = vpop.eup %2773 }
 0x393   : > { %v1486_v5 = vadd.f32 1.0, %v2774_v23 }
 0x394   : > { %v2776_v21 = vpop.eup %2775 }
 0x395   : > { %v2778_v12 = vpop.eup %2777  ;;  %v1488_v13 = vmul.f32 %v2776_v21, %v1484_v26  ;;  %2779 = vrcp.f32 %v1486_v5  ;;  %vm1493_vm1 = vweird.f32 %v2776_v21  ;;  %v1528_v7 = vand.u32 2147483648, %v1486_v5 }
 0x396   : > { %v1503_v22 = vmul.f32 %v2778_v12, %v1485_v29  ;;  %2781 = vtanh.f32 %v1473_v15  ;;  %vm1508_vm2 = vweird.f32 %v2778_v12  ;;  %vm1494_vm5 = vmor %vm1492_vm3, %vm1493_vm1  ;;  %vm1522_vm10 = vweird.f32 %v1486_v5 }
 0x397   : > { %v1489_v35 = vsub.f32 1.0, %v1488_v13  ;;  %vm1509_vm6 = vmor %vm1507_vm4, %vm1508_vm2  ;;  %v1514_v13 = vor.u32 1.1754944e-38, %v1513_v25  ;;  %v1529_v25 = vor.u32 1.1754944e-38, %v1528_v7 }
 0x398   : > { %v1504_v19 = vsub.f32 1.0, %v1503_v22 }
 0x399   : > { %v1490_v30 = vmul.f32 %v2776_v21, %v1489_v35 }
 0x39a   : > { %v1505_v55 = vmul.f32 %v2778_v12, %v1504_v19 }
 0x39b   : > { %v2780_v11 = vpop.eup %2779  ;;  %v1491_v16 = vadd.f32 %v2776_v21, %v1490_v30 }
 0x39c   : > { %v1518_v23 = vmul.f32 %v2780_v11, %v1486_v5  ;;  %v1506_v10 = vadd.f32 %v2778_v12, %v1505_v55  ;;  %v2782_v15 = vpop.eup %2781  ;;  %vm1523_vm9 = vweird.f32 %v2780_v11 }
 0x39d   : > { %v1495_v22 = vsel %vm1494_vm5, %v2776_v21, %v1491_v16  ;;  %v1526_v16 = vand.u32 2147483647, %v1486_v5  ;;  %vm1524_vm11 = vmor %vm1522_vm10, %vm1523_vm9 }
 0x39e   : > { %v1519_v8 = vsub.f32 1.0, %v1518_v23  ;;  %v1500_v35 = vsel %vm1497_vm7, %v1499_v14, %v1495_v22  ;;  %v1510_v6 = vsel %vm1509_vm6, %v2778_v12, %v1506_v10 }
 0x39f   : > { %v1515_v19 = vsel %vm1512_vm8, %v1514_v13, %v1510_v6  ;;  %v1534_v4 = vmul.f32 %v2782_v15, %v1500_v35  ;;  %vm1527_vm12 = vcmp.eq.f32.partialorder %v1526_v16, 8.507059e+37 }
 0x3a0   : > { %v1520_v3 = vmul.f32 %v2780_v11, %v1519_v8  ;;  %v1533_v30 = vmul.f32 %v1515_v19, %v4001_v60 }
 0x3a2   : > { %v4085_v26 = vadd.f32 %v1534_v4, %v1533_v30  ;;  %v1521_v29 = vadd.f32 %v2780_v11, %v1520_v3 }
 0x3a4   : > { %2783 = vtanh.f32 %v4085_v26  ;;  %v1525_v21 = vsel %vm1524_vm11, %v2780_v11, %v1521_v29 }
 0x3a5   : > { %v1530_v9 = vsel %vm1527_vm12, %v1529_v25, %v1525_v21 }
 0x3aa   : > { %v2784_v12 = vpop.eup %2783 }
 0x3ab   : > { %v4088_v6 = vmul.f32 %v2784_v12, %v1530_v9 }
 0x3ad   : > { %1648 = vmatmul.f32.vlgmr.msrb.gmra.mxu0 %v4088_v6  ;;  %1668 = vmatmul.f32.vlgmr.msrb.gmra.mxu1 %v4088_v6  ;;  %v1538_v60 = vmul.f32 %v3622_v58, %v4088_v6 }
 0x3ae   : > { %1688 = vmatmul.f32.vlgmr.msrb.gmra.mxu2 %v4088_v6  ;;  %1708 = vmatmul.f32.vlgmr.msrb.gmra.mxu3 %v4088_v6 }
 0x3af   : > { %1539 = vadd.xlane.f32.xlu2 %v1538_v60  ;;  %2106 = vmatpush.msrb.mxu0 %v3716_v59  ;;  %v4749_v59 = vld [vmem:[#allocation38_spill] sm:$0xff] }
 0x3b0   : > { %2126 = vmatpush.msrb.mxu1 %v3719_v40  ;;  %2146 = vmatpush.msrb.mxu2 %v3722_v48  ;;  %v4750_v40 = vld [vmem:[#allocation23_spill] sm:$0xff]  ;;  %v4751_v48 = vld [vmem:[#allocation24_spill] sm:$0xff] }
 0x3b1   : > { %2166 = vmatpush.msrb.mxu3 %v3855_v27  ;;  %2107 = vmatpush.msrb.mxu0 %v3726_v39  ;;  %v4752_v39 = vld [vmem:[#allocation25_spill] sm:$0xff]  ;;  %v4775_v27 = vld [vmem:[#allocation50_spill] sm:$0xff] }
 0x3b2   : > { %2127 = vmatpush.msrb.mxu1 %v3729_v37  ;;  %2147 = vmatpush.msrb.mxu2 %v3732_v38  ;;  %v4753_v37 = vld [vmem:[#allocation41_spill] sm:$0xff]  ;;  %v4754_v38 = vld [vmem:[#allocation26_spill] sm:$0xff] }
 0x3b3   : > { %2167 = vmatpush.msrb.mxu3 %v3861_v0  ;;  %2108 = vmatpush.msrb.mxu0 %v3736_v42  ;;  %v4755_v42 = vld [vmem:[#allocation27_spill] sm:$0xff] }
 0x3b4   : > { %2128 = vmatpush.msrb.mxu1 %v3739_v53  ;;  %2148 = vmatpush.msrb.mxu2 %v3742_v18  ;;  %v4756_v53 = vld [vmem:[#allocation28_spill] sm:$0xff]  ;;  %v4757_v18 = vld [vmem:[#allocation43_spill] sm:$0xff] }
 0x3b5   : > { %2168 = vmatpush.msrb.mxu3 %v3867_v63  ;;  %2109 = vmatpush.msrb.mxu0 %v3746_v57  ;;  %v4758_v57 = vld [vmem:[#allocation29_spill] sm:$0xff] }
 0x3b6   : > { %2129 = vmatpush.msrb.mxu1 %v3749_v43  ;;  %2149 = vmatpush.msrb.mxu2 %v3752_v20  ;;  %v4759_v43 = vld [vmem:[#allocation30_spill] sm:$0xff]  ;;  %v4760_v20 = vld [vmem:[#allocation31_spill] sm:$0xff] }
 0x3b7   : > { %2169 = vmatpush.msrb.mxu3 %v3873_v34  ;;  %2110 = vmatpush.msrb.mxu0 %v3756_v54  ;;  %v4761_v54 = vld [vmem:[#allocation44_spill] sm:$0xff] }
 0x3b8   : > { %2130 = vmatpush.msrb.mxu1 %v3759_v61  ;;  %2150 = vmatpush.msrb.mxu2 %v3762_v24  ;;  %v4762_v61 = vld [vmem:[#allocation32_spill] sm:$0xff]  ;;  %v4763_v24 = vld [vmem:[#allocation33_spill] sm:$0xff] }
 0x3b9   : > { %2170 = vmatpush.msrb.mxu3 %v3879_v31  ;;  %2111 = vmatpush.msrb.mxu0 %v3766_v62  ;;  %v4764_v62 = vld [vmem:[#allocation34_spill] sm:$0xff] }
 0x3ba   : > { %2131 = vmatpush.msrb.mxu1 %v3769_v45  ;;  %2151 = vmatpush.msrb.mxu2 %v3772_v28  ;;  %v4765_v45 = vld [vmem:[#allocation45_spill] sm:$0xff]  ;;  %v4766_v28 = vld [vmem:[#allocation35_spill] sm:$0xff] }
 0x3bb   : > { %2171 = vmatpush.msrb.mxu3 %v3885_v33  ;;  %2112 = vmatpush.msrb.mxu0 %v3776_v44  ;;  %v4767_v44 = vld [vmem:[#allocation36_spill] sm:$0xff] }
 0x3bc   : > { %2132 = vmatpush.msrb.mxu1 %v3779_v50  ;;  %2152 = vmatpush.msrb.mxu2 %v3782_v32  ;;  %v4768_v50 = vld [vmem:[#allocation37_spill] sm:$0xff]  ;;  %v4769_v32 = vld [vmem:[#allocation46_spill] sm:$0xff] }
 0x3bd   : > { %2172 = vmatpush.msrb.mxu3 %v3891_v41  ;;  %2113 = vmatpush.msrb.mxu0 %v3786_v49  ;;  %v4770_v49 = vld [vmem:[#allocation39_spill] sm:$0xff] }
 0x3be   : > { %2133 = vmatpush.msrb.mxu1 %v3789_v56  ;;  %2153 = vmatpush.msrb.mxu2 %v3792_v36  ;;  %v4771_v56 = vld [vmem:[#allocation40_spill] sm:$0xff]  ;;  %v4772_v36 = vld [vmem:[#allocation42_spill] sm:$0xff] }
 0x3bf   : > { %2173 = vmatpush.msrb.mxu3 %v3897_v47  ;;  %2114 = vmatpush.msrb.mxu0 %v3796_v51  ;;  %v4773_v51 = vld [vmem:[#allocation47_spill] sm:$0xff] }
 0x3c0   : > { %2134 = vmatpush.msrb.mxu1 %v3799_v46  ;;  %2154 = vmatpush.msrb.mxu2 %v3902_v52  ;;  %v4774_v46 = vld [vmem:[#allocation49_spill] sm:$0xff] }
 0x3c1   : > { %2174 = vmatpush.msrb.mxu3 %v3905_v1  ;;  %2115 = vmatpush.msrb.mxu0 %v3908_v2  ;;  %v2565_v0 = vld [vmem:[%s3277_s9 + $0x5] ss:$8 sm:$0xf] }
 0x3c2   : > { %2135 = vmatpush.msrb.mxu1 %v4749_v59  ;;  %2155 = vmatpush.msrb.mxu2 %v4750_v40  ;;  %v2566_v63 = vld [vmem:[%s3277_s9 + $0x25] ss:$8 sm:$0xf]  ;;  %1609 = vst [vmem:[#allocation1] ss:$9 sm:$0xff] %v2565_v0  ;;  %v4172_v0 = vpop.xlane.xlu1 %1065 }
 0x3c3   : > { %2175 = vmatpush.msrb.mxu3 %v4751_v48  ;;  %2116 = vmatpush.msrb.mxu0 %v4752_v39  ;;  %v2567_v34 = vld [vmem:[%s3277_s9 + $0x45] ss:$8 sm:$0xf]  ;;  %1611 = vst [vmem:[#allocation1 + $0x1] ss:$9 sm:$0xff] %v2566_v63 }
 0x3c4   : > { %2136 = vmatpush.msrb.mxu1 %v4753_v37  ;;  %2156 = vmatpush.msrb.mxu2 %v4754_v38  ;;  %v2568_v31 = vld [vmem:[%s3277_s9 + $0x65] ss:$8 sm:$0xf]  ;;  %1613 = vst [vmem:[#allocation1 + $0x2] ss:$9 sm:$0xff] %v2567_v34 }
 0x3c5   : > { %2176 = vmatpush.msrb.mxu3 %v4755_v42  ;;  %2117 = vmatpush.msrb.mxu0 %v4756_v53  ;;  %v2569_v33 = vld [vmem:[%s3277_s9 + $0x85] ss:$8 sm:$0xf]  ;;  %1615 = vst [vmem:[#allocation1 + $0x3] ss:$9 sm:$0xff] %v2568_v31 }
 0x3c6   : > { %2137 = vmatpush.msrb.mxu1 %v4757_v18  ;;  %2157 = vmatpush.msrb.mxu2 %v4758_v57  ;;  %v2570_v41 = vld [vmem:[%s3277_s9 + $0xa5] ss:$8 sm:$0xf]  ;;  %1617 = vst [vmem:[#allocation1 + $0x4] ss:$9 sm:$0xff] %v2569_v33 }
 0x3c7   : > { %2177 = vmatpush.msrb.mxu3 %v4759_v43  ;;  %2118 = vmatpush.msrb.mxu0 %v4760_v20  ;;  %v2571_v47 = vld [vmem:[%s3277_s9 + $0xc5] ss:$8 sm:$0xf]  ;;  %1619 = vst [vmem:[#allocation1 + $0x5] ss:$9 sm:$0xff] %v2570_v41 }
 0x3c8   : > { %2138 = vmatpush.msrb.mxu1 %v4761_v54  ;;  %2158 = vmatpush.msrb.mxu2 %v4762_v61  ;;  %v2572_v52 = vld [vmem:[%s3277_s9 + $0xe5] ss:$8 sm:$0xf]  ;;  %1621 = vst [vmem:[#allocation1 + $0x6] ss:$9 sm:$0xff] %v2571_v47 }
 0x3c9   : > { %2178 = vmatpush.msrb.mxu3 %v4763_v24  ;;  %2119 = vmatpush.msrb.mxu0 %v4764_v62  ;;  %1623 = vst [vmem:[#allocation1 + $0x7] ss:$9 sm:$0xff] %v2572_v52  ;;  %v4776_v47 = vld [vmem:[#allocation48_spill] sm:$0xff] }
 0x3ca   : > { %2139 = vmatpush.msrb.mxu1 %v4765_v45  ;;  %2159 = vmatpush.msrb.mxu2 %v4766_v28 }
 0x3cb   : > { %2179 = vmatpush.msrb.mxu3 %v4767_v44  ;;  %2120 = vmatpush.msrb.mxu0 %v4768_v50 }
 0x3cc   : > { %2140 = vmatpush.msrb.mxu1 %v4769_v32  ;;  %2160 = vmatpush.msrb.mxu2 %v4770_v49 }
 0x3cd   : > { %2180 = vmatpush.msrb.mxu3 %v4771_v56  ;;  %2121 = vmatpush.msrb.mxu0 %v4772_v36 }
 0x3ce   : > { %2141 = vmatpush.msrb.mxu1 %v4773_v51  ;;  %2161 = vmatpush.msrb.mxu2 %v4774_v46 }
 0x3cf   : > { %2181 = vmatpush.msrb.mxu3 %v4775_v27  ;;  %v586_v27 = vpop.xlane.xlu0 %585 }
 0x3d0   : > { %v1624_v1 = vld [vmem:[#allocation1] sm:$0xff]  ;;  %v1625_v2 = vld [vmem:[#allocation1 + $0x9] sm:$0xff]  ;;  %v1626_v17 = vld [vmem:[#allocation1 + $0x12] sm:$0xff]  ;;  %v587_v31 = vmul.f32 0.03125, %v586_v27 }
 0x3d1   : > { %v1627_v19 = vld [vmem:[#allocation1 + $0x1b] sm:$0xff] }
 0x3d2   : > { %v588_v52 = vsub.f32 %v4776_v47, %v587_v31 }
 0x42a   : > { %v1649_v3 = vpop.f32.mrf.mxu0  ;;  %v1669_v4 = vpop.f32.mrf.mxu1 }
 0x42b   : > { %v1650_v8 = vadd.f32 %v1649_v3, %v1624_v1  ;;  %v1670_v11 = vadd.f32 %v1669_v4, %v1625_v2  ;;  %v1303_v2 = vpop.xlane.xlu1 %1302  ;;  %v4184_v4 = vmul.f32 %v3622_v58, %v588_v52  ;;  %v4221_v52 = vld [vmem:[%s4493_s2] ss:$0 sm:$0xff] }
 0x42c   : > { %v1304_v3 = vmul.f32 0.03125, %v1303_v2 }
 0x42d   : > { %v2573_v5 = vmul.f32 -1.442695, %v1650_v8  ;;  %v2574_v55 = vmul.f32 -1.442695, %v1670_v11  ;;  %v4777_v8 = vld [vmem:[#allocation51_spill] sm:$0xff] }
 0x42e   : > { %v1305_v11 = vsub.f32 %v4777_v8, %v1304_v3 }
 0x42f   : > { %2785 = vpow2.f32 %v2573_v5  ;;  %v590_v5 = vmul.f32 %v4184_v4, %v4184_v4 }
 0x430   : > { %2787 = vpow2.f32 %v2574_v55  ;;  %v4190_v55 = vmul.f32 %v3622_v58, %v1305_v11 }
 0x431   : > { %v1689_v23 = vpop.f32.mrf.mxu2  ;;  %v1709_v30 = vpop.f32.mrf.mxu3 }
 0x432   : > { %v1690_v14 = vadd.f32 %v1689_v23, %v1626_v17  ;;  %v1710_v21 = vadd.f32 %v1709_v30, %v1627_v19  ;;  %v1307_v17 = vmul.f32 %v4190_v55, %v4190_v55  ;;  %v2576_v23 = vld [vmem:[%s3277_s9 + $0x6] ss:$8 sm:$0xf]  ;;  %v4202_v30 = vpop.xlane.xlu2 %1539 }
 0x433   : > { %1846 = vst [vmem:[#allocation1] ss:$9 sm:$0xff] %v2576_v23  ;;  %v2583_v19 = vld [vmem:[%s3277_s9 + $0xe6] ss:$8 sm:$0xf] }
 0x434   : > { %v2575_v10 = vmul.f32 -1.442695, %v1690_v14  ;;  %v2577_v14 = vld [vmem:[%s3277_s9 + $0x26] ss:$8 sm:$0xf] }
 0x435   : > { %v2786_v13 = vpop.eup %2785  ;;  %1848 = vst [vmem:[#allocation1 + $0x1] ss:$9 sm:$0xff] %v2577_v14 }
 0x436   : > { %v2788_v22 = vpop.eup %2787  ;;  %v1721_v15 = vadd.f32 1.0, %v2786_v13  ;;  %2789 = vpow2.f32 %v2575_v10  ;;  %v2578_v10 = vld [vmem:[%s3277_s9 + $0x46] ss:$8 sm:$0xf]  ;;  %1860 = vst [vmem:[#allocation1 + $0x7] ss:$9 sm:$0xff] %v2583_v19 }
 0x437   : > { %v1722_v35 = vadd.f32 1.0, %v2788_v22  ;;  %v2579_v13 = vld [vmem:[%s3277_s9 + $0x66] ss:$8 sm:$0xf]  ;;  %1850 = vst [vmem:[#allocation1 + $0x2] ss:$9 sm:$0xff] %v2578_v10 }
 0x438   : > { %2791 = vrcp.f32 %v1721_v15  ;;  %v1735_v40 = vand.u32 2147483648, %v1721_v15  ;;  %v1733_v37 = vand.u32 2147483647, %v1721_v15  ;;  %vm1729_vm15 = vweird.f32 %v1721_v15  ;;  %v2580_v22 = vld [vmem:[%s3277_s9 + $0x86] ss:$8 sm:$0xf] }
 0x439   : > { %2793 = vrcp.f32 %v1722_v35  ;;  %v1750_v48 = vand.u32 2147483648, %v1722_v35  ;;  %v1748_v42 = vand.u32 2147483647, %v1722_v35  ;;  %vm1744_vm0 = vweird.f32 %v1722_v35  ;;  %1852 = vst [vmem:[#allocation1 + $0x3] ss:$9 sm:$0xff] %v2579_v13 }
 0x43a   : > { %v1736_v43 = vor.u32 1.1754944e-38, %v1735_v40  ;;  %vm1734_vm3 = vcmp.eq.f32.partialorder %v1733_v37, 8.507059e+37  ;;  %1854 = vst [vmem:[#allocation1 + $0x4] ss:$9 sm:$0xff] %v2580_v22 }
 0x43b   : > { %v1751_v54 = vor.u32 1.1754944e-38, %v1750_v48  ;;  %vm1749_vm4 = vcmp.eq.f32.partialorder %v1748_v42, 8.507059e+37 }
 0x43c   : > { %v2790_v29 = vpop.eup %2789 }
 0x43d   : > { %v1723_v7 = vadd.f32 1.0, %v2790_v29 }
 0x43e   : > { %v2792_v16 = vpop.eup %2791 }
 0x43f   : > { %v2794_v25 = vpop.eup %2793  ;;  %v1725_v12 = vmul.f32 %v2792_v16, %v1721_v15  ;;  %2795 = vrcp.f32 %v1723_v7  ;;  %vm1730_vm13 = vweird.f32 %v2792_v16  ;;  %v1765_v51 = vand.u32 2147483648, %v1723_v7  ;;  %v2581_v15 = vld [vmem:[%s3277_s9 + $0xa6] ss:$8 sm:$0xf] }
 0x440   : > { %v1740_v9 = vmul.f32 %v2794_v25, %v1722_v35  ;;  %2797 = vtanh.f32 %v1710_v21  ;;  %vm1745_vm14 = vweird.f32 %v2794_v25  ;;  %vm1731_vm1 = vmor %vm1729_vm15, %vm1730_vm13  ;;  %vm1759_vm6 = vweird.f32 %v1723_v7  ;;  %v2582_v35 = vld [vmem:[%s3277_s9 + $0xc6] ss:$8 sm:$0xf]  ;;  %1856 = vst [vmem:[#allocation1 + $0x5] ss:$9 sm:$0xff] %v2581_v15 }
 0x441   : > { %v1726_v60 = vsub.f32 1.0, %v1725_v12  ;;  %vm1746_vm2 = vmor %vm1744_vm0, %vm1745_vm14  ;;  %v1763_v46 = vand.u32 2147483647, %v1723_v7  ;;  %v1766_v34 = vor.u32 1.1754944e-38, %v1765_v51  ;;  %1858 = vst [vmem:[#allocation1 + $0x6] ss:$9 sm:$0xff] %v2582_v35 }
 0x442   : > { %v1741_v59 = vsub.f32 1.0, %v1740_v9 }
 0x443   : > { %v1727_v39 = vmul.f32 %v2792_v16, %v1726_v60  ;;  %vm1764_vm8 = vcmp.eq.f32.partialorder %v1763_v46, 8.507059e+37 }
 0x444   : > { %v1742_v38 = vmul.f32 %v2794_v25, %v1741_v59 }
 0x445   : > { %v2796_v53 = vpop.eup %2795  ;;  %v1728_v18 = vadd.f32 %v2792_v16, %v1727_v39 }
 0x446   : > { %v1755_v57 = vmul.f32 %v2796_v53, %v1723_v7  ;;  %v1743_v20 = vadd.f32 %v2794_v25, %v1742_v38  ;;  %v2798_v24 = vpop.eup %2797  ;;  %vm1760_vm5 = vweird.f32 %v2796_v53 }
 0x447   : > { %v1732_v61 = vsel %vm1731_vm1, %v2792_v16, %v1728_v18  ;;  %vm1761_vm7 = vmor %vm1759_vm6, %vm1760_vm5 }
 0x448   : > { %v1756_v62 = vsub.f32 1.0, %v1755_v57  ;;  %v1737_v45 = vsel %vm1734_vm3, %v1736_v43, %v1732_v61  ;;  %v1747_v28 = vsel %vm1746_vm2, %v2794_v25, %v1743_v20  ;;  %v1861_v7 = vld [vmem:[#allocation1] sm:$0xff]  ;;  %v1862_v16 = vld [vmem:[#allocation1 + $0x9] sm:$0xff]  ;;  %v1863_v37 = vld [vmem:[#allocation1 + $0x12] sm:$0xff] }
 0x449   : > { %v1752_v44 = vsel %vm1749_vm4, %v1751_v54, %v1747_v28  ;;  %v1771_v50 = vmul.f32 %v2798_v24, %v1737_v45 }
 0x44a   : > { %v1757_v32 = vmul.f32 %v2796_v53, %v1756_v62  ;;  %v1770_v49 = vmul.f32 %v1752_v44, %v4085_v26  ;;  %v1864_v44 = vld [vmem:[#allocation1 + $0x1b] sm:$0xff] }
 0x44c   : > { %v4169_v56 = vadd.f32 %v1771_v50, %v1770_v49  ;;  %v1758_v36 = vadd.f32 %v2796_v53, %v1757_v32 }
 0x44e   : > { %2799 = vtanh.f32 %v4169_v56  ;;  %v1762_v63 = vsel %vm1761_vm7, %v2796_v53, %v1758_v36 }
 0x44f   : > { %v1767_v41 = vsel %vm1764_vm8, %v1766_v34, %v1762_v63 }
 0x454   : > { %v2800_v33 = vpop.eup %2799 }
 0x455   : > { %v4174_v26 = vmul.f32 %v2800_v33, %v1767_v41 }
 0x457   : > { %1885 = vmatmul.f32.vlgmr.msra.gmra.mxu0 %v4174_v26  ;;  %1905 = vmatmul.f32.vlgmr.msra.gmra.mxu1 %v4174_v26  ;;  %v1775_v1 = vmul.f32 %v3622_v58, %v4174_v26 }
 0x458   : > { %1925 = vmatmul.f32.vlgmr.msra.gmra.mxu2 %v4174_v26  ;;  %1945 = vmatmul.f32.vlgmr.msra.gmra.mxu3 %v4174_v26 }
 0x459   : > { %1776 = vadd.xlane.f32.xlu2 %v1775_v1 }
 0x461   : > { %591 = vadd.xlane.f32.xlu2 %v590_v5  ;;  %v4228_v5 = vld [vmem:[%s4494_s3] ss:$0 sm:$0xff] }
 0x469   : > { %1308 = vadd.xlane.f32.xlu2 %v1307_v17 }
 0x4cc   : > { %v4204_v29 = vpop.xlane.xlu2 %1776 }
 0x4d4   : > { %v1886_v21 = vpop.f32.mrf.mxu0  ;;  %v1906_v25 = vpop.f32.mrf.mxu1 }
 0x4d5   : > { %v1887_v12 = vadd.f32 %v1886_v21, %v1861_v7  ;;  %v1907_v9 = vadd.f32 %v1906_v25, %v1862_v16  ;;  %v592_v60 = vpop.xlane.xlu2 %591 }
 0x4d6   : > { %v593_v59 = vmul.f32 0.03125, %v592_v60 }
 0x4d7   : > { %v2584_v40 = vmul.f32 -1.442695, %v1887_v12  ;;  %v2585_v48 = vmul.f32 -1.442695, %v1907_v9 }
 0x4d8   : > { %v594_v39 = vadd.f32 1e-05, %v593_v59  ;;  %v2594_v12 = vld [vmem:[%s3277_s9 + $0xe7] ss:$8 sm:$0xf] }
 0x4d9   : > { %2801 = vpow2.f32 %v2584_v40  ;;  %2097 = vst [vmem:[#allocation1 + $0x7] ss:$9 sm:$0xff] %v2594_v12 }
 0x4da   : > { %2803 = vpow2.f32 %v2585_v48  ;;  %vm601_vm10 = vweird.f32 %v594_v39 }
 0x4db   : > { %2805 = vrsqrt.f32 %v594_v39  ;;  %v1926_v38 = vpop.f32.mrf.mxu2  ;;  %v1946_v50 = vpop.f32.mrf.mxu3 }
 0x4dc   : > { %v1927_v42 = vadd.f32 %v1926_v38, %v1863_v37  ;;  %v1947_v51 = vadd.f32 %v1946_v50, %v1864_v44 }
 0x4dd   : > { %v1309_v53 = vpop.xlane.xlu2 %1308 }
 0x4de   : > { %v2586_v18 = vmul.f32 -1.442695, %v1927_v42  ;;  %v1310_v57 = vmul.f32 0.03125, %v1309_v53 }
 0x4df   : > { %v2802_v43 = vpop.eup %2801 }
 0x4e0   : > { %v2804_v20 = vpop.eup %2803  ;;  %v1958_v54 = vadd.f32 1.0, %v2802_v43  ;;  %2807 = vpow2.f32 %v2586_v18  ;;  %v4206_v61 = vadd.f32 1e-05, %v1310_v57 }
 0x4e1   : > { %v2806_v24 = vpop.eup %2805  ;;  %v4208_v62 = vadd.f32 1.0, %v2804_v20 }
 0x4e2   : > { %2809 = vrcp.f32 %v1958_v54  ;;  %v596_v45 = vmul.f32 %v2806_v24, %v594_v39  ;;  %vm602_vm9 = vweird.f32 %v2806_v24  ;;  %v1970_v8 = vand.u32 2147483647, %v1958_v54 }
 0x4e3   : > { %2811 = vrcp.f32 %v4208_v62  ;;  %vm603_vm11 = vmor %vm601_vm10, %vm602_vm9  ;;  %v1972_v11 = vand.u32 2147483648, %v1958_v54  ;;  %v1987_v13 = vand.u32 2147483648, %v4208_v62  ;;  %vm1966_vm14 = vweird.f32 %v1958_v54 }
 0x4e4   : > { %v597_v28 = vmul.f32 %v2806_v24, %v596_v45  ;;  %2813 = vrsqrt.f32 %v4206_v61  ;;  %vm1981_vm15 = vweird.f32 %v4208_v62  ;;  %v1985_v21 = vand.u32 2147483647, %v4208_v62 }
 0x4e5   : > { %v1973_v7 = vor.u32 1.1754944e-38, %v1972_v11  ;;  %vm1971_vm2 = vcmp.eq.f32.partialorder %v1970_v8, 8.507059e+37  ;;  %v1988_v40 = vor.u32 1.1754944e-38, %v1987_v13  ;;  %vm1318_vm5 = vweird.f32 %v4206_v61 }
 0x4e6   : > { %v2808_v32 = vpop.eup %2807  ;;  %v598_v49 = vmul.f32 0.5, %v597_v28  ;;  %vm1986_vm4 = vcmp.eq.f32.partialorder %v1985_v21, 8.507059e+37  ;;  %v2591_v21 = vld [vmem:[%s3277_s9 + $0x87] ss:$8 sm:$0xf] }
 0x4e7   : > { %v4212_v36 = vadd.f32 1.0, %v2808_v32  ;;  %2091 = vst [vmem:[#allocation1 + $0x4] ss:$9 sm:$0xff] %v2591_v21 }
 0x4e8   : > { %v2810_v46 = vpop.eup %2809  ;;  %v599_v27 = vsub.f32 1.5, %v598_v49 }
 0x4e9   : > { %v2812_v63 = vpop.eup %2811  ;;  %v1962_v34 = vmul.f32 %v2810_v46, %v1958_v54  ;;  %2815 = vrcp.f32 %v4212_v36  ;;  %vm1967_vm12 = vweird.f32 %v2810_v46  ;;  %v2002_v49 = vand.u32 2147483648, %v4212_v36 }
 0x4ea   : > { %v4215_v31 = vpop.eup %2813  ;;  %v1977_v33 = vmul.f32 %v2812_v63, %v4208_v62  ;;  %v600_v41 = vmul.f32 %v2806_v24, %v599_v27  ;;  %2817 = vtanh.f32 %v1947_v51  ;;  %vm1982_vm13 = vweird.f32 %v2812_v63  ;;  %vm1968_vm0 = vmor %vm1966_vm14, %vm1967_vm12 }
 0x4eb   : > { %v1963_v47 = vsub.f32 1.0, %v1962_v34  ;;  %v1313_v1 = vmul.f32 %v4215_v31, %v4206_v61  ;;  %vm4240_vm1 = vmor %vm1981_vm15, %vm1982_vm13  ;;  %vm1319_vm3 = vweird.f32 %v4215_v31  ;;  %vm1996_vm8 = vweird.f32 %v4212_v36 }
 0x4ec   : > { %v1978_v2 = vsub.f32 1.0, %v1977_v33  ;;  %v604_v3 = vsel %vm603_vm11, %v2806_v24, %v600_v41  ;;  %vm1320_vm6 = vmor %vm1318_vm5, %vm1319_vm3  ;;  %v2000_v51 = vand.u32 2147483647, %v4212_v36 }
 0x4ed   : > { %v605_v17 = vmul.f32 %v604_v3, %v4184_v4  ;;  %v1964_v23 = vmul.f32 %v2810_v46, %v1963_v47  ;;  %v1314_v14 = vmul.f32 %v4215_v31, %v1313_v1 }
 0x4ee   : > { %v1979_v10 = vmul.f32 %v2812_v63, %v1978_v2  ;;  %vm2001_vm10 = vcmp.eq.f32.partialorder %v2000_v51, 8.507059e+37 }
 0x4ef   : > { %v4233_v22 = vpop.eup %2815  ;;  %v609_v15 = vmul.f32 %v4221_v52, %v605_v17  ;;  %v1965_v35 = vadd.f32 %v2810_v46, %v1964_v23  ;;  %v1315_v19 = vmul.f32 0.5, %v1314_v14  ;;  %v4780_v17 = vld [vmem:[#allocation21_spill] sm:$0xff] }
 0x4f0   : > { %v1992_v4 = vmul.f32 %v4233_v22, %v4212_v36  ;;  %v1980_v16 = vadd.f32 %v2812_v63, %v1979_v10  ;;  %v2818_v25 = vpop.eup %2817  ;;  %vm1997_vm7 = vweird.f32 %v4233_v22  ;;  %v1541_v10 = vmul.f32 0.03125, %v4202_v30  ;;  %v2588_v30 = vld [vmem:[%s3277_s9 + $0x27] ss:$8 sm:$0xf] }
 0x4f1   : > { %v613_v9 = vadd.f32 %v4228_v5, %v609_v15  ;;  %v1969_v60 = vsel %vm1968_vm0, %v2810_v46, %v1965_v35  ;;  %v1316_v59 = vsub.f32 1.5, %v1315_v19  ;;  %vm1998_vm9 = vmor %vm1996_vm8, %vm1997_vm7  ;;  %2085 = vst [vmem:[#allocation1 + $0x1] ss:$9 sm:$0xff] %v2588_v30 }
 0x4f2   : > { %v1993_v48 = vsub.f32 1.0, %v1992_v4  ;;  %v1974_v39 = vsel %vm1971_vm2, %v1973_v7, %v1969_v60  ;;  %v1984_v37 = vsel %vm4240_vm1, %v2812_v63, %v1980_v16  ;;  %v2003_v63 = vor.u32 1.1754944e-38, %v2002_v49  ;;  %v2587_v4 = vld [vmem:[%s3277_s9 + $0x7] ss:$8 sm:$0xf] }
 0x4f3   : > { %v615_v38 = vrot.slane %v613_v9, 1  ;;  %v616_v42 = vrot.slane %v613_v9, 2  ;;  %v617_v53 = vrot.slane %v613_v9, 3  ;;  %629 = vst [vmem:[%s3288_s21] sm:$0x1] %v613_v9  ;;  %v618_v18 = vrot.slane %v613_v9, 4 }
 0x4f4   : > { %v619_v57 = vrot.slane %v613_v9, 5  ;;  %v1994_v43 = vmul.f32 %v4233_v22, %v1993_v48  ;;  %v1989_v20 = vsel %vm1986_vm4, %v1988_v40, %v1984_v37  ;;  %v2008_v54 = vmul.f32 %v2818_v25, %v1974_v39  ;;  %v2589_v7 = vld [vmem:[%s3277_s9 + $0x47] ss:$8 sm:$0xf]  ;;  %2083 = vst [vmem:[#allocation1] ss:$9 sm:$0xff] %v2587_v4 }
 0x4f5   : > { %630 = vst [vmem:[%s3288_s21 + $0x8] sm:$0x1] %v615_v38  ;;  %v1317_v24 = vmul.f32 %v4215_v31, %v1316_v59  ;;  %v620_v62 = vrot.slane %v613_v9, 6  ;;  %v2007_v45 = vmul.f32 %v1989_v20, %v4169_v56  ;;  %v621_v28 = vrot.slane %v613_v9, 7 }
 0x4f6   : > { %631 = vst [vmem:[%s3288_s21 + $0x10] sm:$0x1] %v616_v42  ;;  %v1995_v32 = vadd.f32 %v4233_v22, %v1994_v43  ;;  %v2590_v16 = vld [vmem:[%s3277_s9 + $0x67] ss:$8 sm:$0xf] }
 0x4f7   : > { %632 = vst [vmem:[%s3288_s21 + $0x18] sm:$0x1] %v617_v53  ;;  %v1321_v44 = vsel %vm1320_vm6, %v4215_v31, %v1317_v24  ;;  %v4258_v61 = vadd.f32 %v2008_v54, %v2007_v45  ;;  %v2593_v25 = vld [vmem:[%s3277_s9 + $0xc7] ss:$8 sm:$0xf] }
 0x4f8   : > { %633 = vst [vmem:[%s3288_s21 + $0x20] sm:$0x1] %v618_v18  ;;  %v1322_v50 = vmul.f32 %v1321_v44, %v4190_v55  ;;  %v829_v55 = vpop.xlane.xlu0 %828  ;;  %v1999_v27 = vsel %vm1998_vm9, %v4233_v22, %v1995_v32  ;;  %v1542_v22 = vsub.f32 %v4088_v6, %v1541_v10  ;;  %v2592_v6 = vld [vmem:[%s3277_s9 + $0xa7] ss:$8 sm:$0xf] }
 0x4f9   : > { %634 = vst [vmem:[%s3288_s21 + $0x28] sm:$0x1] %v619_v57  ;;  %2819 = vtanh.f32 %v4258_v61  ;;  %v830_v41 = vmul.f32 0.03125, %v829_v55  ;;  %v2004_v2 = vsel %vm2001_vm10, %v2003_v63, %v1999_v27 }
 0x4fa   : > { %635 = vst [vmem:[%s3288_s21 + $0x30] sm:$0x1] %v620_v62  ;;  %v1323_v56 = vmul.f32 %v4221_v52, %v1322_v50  ;;  %v4291_v35 = vmul.f32 %v3622_v58, %v1542_v22 }
 0x4fb   : > { %636 = vst [vmem:[%s3288_s21 + $0x38] sm:$0x1] %v621_v28  ;;  %v831_v23 = vsub.f32 %v4780_v17, %v830_v41 }
 0x4fc   : > { %v1324_v46 = vadd.f32 %v4228_v5, %v1323_v56  ;;  %v1544_v19 = vmul.f32 %v4291_v35, %v4291_v35  ;;  %2087 = vst [vmem:[#allocation1 + $0x2] ss:$9 sm:$0xff] %v2589_v7 }
 0x4fd   : > { %v4285_v13 = vmul.f32 %v3622_v58, %v831_v23  ;;  %2089 = vst [vmem:[#allocation1 + $0x3] ss:$9 sm:$0xff] %v2590_v16 }
 0x4fe   : > { %v1326_v34 = vrot.slane %v1324_v46, 1  ;;  %v1327_v31 = vrot.slane %v1324_v46, 2  ;;  %v1328_v33 = vrot.slane %v1324_v46, 3  ;;  %1340 = vst [vmem:[%s3288_s21 + $0x3] sm:$0x1] %v1324_v46  ;;  %v1329_v47 = vrot.slane %v1324_v46, 4 }
 0x4ff   : > { %v2820_v1 = vpop.eup %2819  ;;  %v1330_v36 = vrot.slane %v1324_v46, 5  ;;  %v1331_v3 = vrot.slane %v1324_v46, 6  ;;  %v1332_v11 = vrot.slane %v1324_v46, 7  ;;  %v833_v15 = vmul.f32 %v4285_v13, %v4285_v13  ;;  %2093 = vst [vmem:[#allocation1 + $0x5] ss:$9 sm:$0xff] %v2592_v6 }
 0x500   : > { %1341 = vst [vmem:[%s3288_s21 + $0xb] sm:$0x1] %v1326_v34  ;;  %v2011_v8 = vmul.f32 %v2820_v1, %v2004_v2 }
 0x501   : > { %1342 = vst [vmem:[%s3288_s21 + $0x13] sm:$0x1] %v1327_v31 }
 0x502   : > { %1343 = vst [vmem:[%s3288_s21 + $0x1b] sm:$0x1] %v1328_v33  ;;  %2122 = vmatmul.f32.vlgmr.msrb.gmra.mxu0 %v2011_v8  ;;  %2142 = vmatmul.f32.vlgmr.msrb.gmra.mxu1 %v2011_v8  ;;  %v2012_v14 = vmul.f32 %v3622_v58, %v2011_v8 }
 0x503   : > { %1344 = vst [vmem:[%s3288_s21 + $0x23] sm:$0x1] %v1329_v47  ;;  %2162 = vmatmul.f32.vlgmr.msrb.gmra.mxu2 %v2011_v8  ;;  %2182 = vmatmul.f32.vlgmr.msrb.gmra.mxu3 %v2011_v8 }
 0x504   : > { %1345 = vst [vmem:[%s3288_s21 + $0x2b] sm:$0x1] %v1330_v36  ;;  %2013 = vadd.xlane.f32.xlu0 %v2012_v14 }
 0x505   : > { %1346 = vst [vmem:[%s3288_s21 + $0x33] sm:$0x1] %v1331_v3 }
 0x506   : > { %1347 = vst [vmem:[%s3288_s21 + $0x3b] sm:$0x1] %v1332_v11 }
 0x507   : > { %2095 = vst [vmem:[#allocation1 + $0x6] ss:$9 sm:$0xff] %v2593_v25 }
 0x50c   : > { %834 = vadd.xlane.f32.xlu0 %v833_v15 }
 0x50e   : > { %v2098_v48 = vld [vmem:[#allocation1] sm:$0xff]  ;;  %v2099_v39 = vld [vmem:[#allocation1 + $0x9] sm:$0xff]  ;;  %v2100_v62 = vld [vmem:[#allocation1 + $0x12] sm:$0xff] }
 0x50f   : > { %v2101_v31 = vld [vmem:[#allocation1 + $0x1b] sm:$0xff] }
 0x514   : > { %1545 = vadd.xlane.f32.xlu0 %v1544_v19 }
 0x577   : > { %v2014_v9 = vpop.xlane.xlu0 %2013 }
 0x578   : > { %v2015_v60 = vmul.f32 0.03125, %v2014_v9 }
 0x57a   : > { %v2016_v59 = vsub.f32 %v2011_v8, %v2015_v60 }
 0x57c   : > { %v4304_v40 = vmul.f32 %v3622_v58, %v2016_v59 }
 0x57e   : > { %v2018_v37 = vmul.f32 %v4304_v40, %v4304_v40 }
 0x57f   : > { %v2123_v38 = vpop.f32.mrf.mxu0  ;;  %v2143_v42 = vpop.f32.mrf.mxu1 }
 0x580   : > { %v2124_v53 = vadd.f32 %v2123_v38, %v2098_v48  ;;  %v2144_v18 = vadd.f32 %v2143_v42, %v2099_v39  ;;  %v835_v57 = vpop.xlane.xlu0 %834  ;;  %2019 = vadd.xlane.f32.xlu2 %v2018_v37 }
 0x581   : > { %v836_v43 = vmul.f32 0.03125, %v835_v57 }
 0x582   : > { %v2595_v20 = vmul.f32 -1.442695, %v2124_v53  ;;  %v2596_v54 = vmul.f32 -1.442695, %v2144_v18 }
 0x583   : > { %v837_v24 = vadd.f32 1e-05, %v836_v43 }
 0x584   : > { %2821 = vpow2.f32 %v2595_v20 }
 0x585   : > { %2823 = vpow2.f32 %v2596_v54  ;;  %vm844_vm12 = vweird.f32 %v837_v24 }
 0x586   : > { %2825 = vrsqrt.f32 %v837_v24  ;;  %v2163_v45 = vpop.f32.mrf.mxu2  ;;  %v2183_v33 = vpop.f32.mrf.mxu3 }
 0x587   : > { %v2164_v28 = vadd.f32 %v2163_v45, %v2100_v62  ;;  %v2184_v36 = vadd.f32 %v2183_v33, %v2101_v31 }
 0x588   : > { %v1546_v44 = vpop.xlane.xlu0 %1545 }
 0x589   : > { %v2597_v50 = vmul.f32 -1.442695, %v2164_v28  ;;  %v1547_v32 = vmul.f32 0.03125, %v1546_v44 }
 0x58a   : > { %v2822_v49 = vpop.eup %2821 }
 0x58b   : > { %v2824_v56 = vpop.eup %2823  ;;  %v2195_v51 = vadd.f32 1.0, %v2822_v49  ;;  %2827 = vpow2.f32 %v2597_v50  ;;  %v4308_v55 = vadd.f32 1e-05, %v1547_v32 }
 0x58c   : > { %v2826_v46 = vpop.eup %2825  ;;  %v2196_v27 = vadd.f32 1.0, %v2824_v56 }
 0x58d   : > { %2829 = vrcp.f32 %v2195_v51  ;;  %v839_v63 = vmul.f32 %v2826_v46, %v837_v24  ;;  %vm845_vm11 = vweird.f32 %v2826_v46  ;;  %v2207_v30 = vand.u32 2147483647, %v2195_v51 }
 0x58e   : > { %2831 = vrcp.f32 %v2196_v27  ;;  %v2224_v22 = vand.u32 2147483648, %v2196_v27  ;;  %vm846_vm13 = vmor %vm844_vm12, %vm845_vm11  ;;  %v2209_v7 = vand.u32 2147483648, %v2195_v51  ;;  %vm2203_vm0 = vweird.f32 %v2195_v51 }
 0x58f   : > { %v840_v34 = vmul.f32 %v2826_v46, %v839_v63  ;;  %2833 = vrsqrt.f32 %v4308_v55  ;;  %v2222_v12 = vand.u32 2147483647, %v2196_v27  ;;  %vm2218_vm1 = vweird.f32 %v2196_v27 }
 0x590   : > { %v2225_v39 = vor.u32 1.1754944e-38, %v2224_v22  ;;  %vm2208_vm4 = vcmp.eq.f32.partialorder %v2207_v30, 8.507059e+37  ;;  %vm1555_vm7 = vweird.f32 %v4308_v55 }
 0x591   : > { %v2828_v41 = vpop.eup %2827  ;;  %v841_v47 = vmul.f32 0.5, %v840_v34  ;;  %vm2223_vm5 = vcmp.eq.f32.partialorder %v2222_v12, 8.507059e+37 }
 0x592   : > { %v4311_v1 = vadd.f32 1.0, %v2828_v41 }
 0x593   : > { %v2830_v2 = vpop.eup %2829  ;;  %v842_v3 = vsub.f32 1.5, %v841_v47 }
 0x594   : > { %v2832_v8 = vpop.eup %2831  ;;  %v2199_v11 = vmul.f32 %v2830_v2, %v2195_v51  ;;  %2835 = vrcp.f32 %v4311_v1  ;;  %vm2204_vm14 = vweird.f32 %v2830_v2  ;;  %v2239_v33 = vand.u32 2147483648, %v4311_v1 }
 0x595   : > { %v4314_v17 = vpop.eup %2833  ;;  %v2214_v23 = vmul.f32 %v2832_v8, %v2196_v27  ;;  %v843_v14 = vmul.f32 %v2826_v46, %v842_v3  ;;  %2837 = vtanh.f32 %v2184_v36  ;;  %vm2219_vm15 = vweird.f32 %v2832_v8  ;;  %vm2205_vm2 = vmor %vm2203_vm0, %vm2204_vm14 }
 0x596   : > { %v2200_v10 = vsub.f32 1.0, %v2199_v11  ;;  %v1550_v15 = vmul.f32 %v4314_v17, %v4308_v55  ;;  %vm4325_vm3 = vmor %vm2218_vm1, %vm2219_vm15  ;;  %vm1556_vm6 = vweird.f32 %v4314_v17  ;;  %vm2233_vm10 = vweird.f32 %v4311_v1 }
 0x597   : > { %v2215_v19 = vsub.f32 1.0, %v2214_v23  ;;  %v847_v4 = vsel %vm846_vm13, %v2826_v46, %v843_v14  ;;  %vm1557_vm8 = vmor %vm1555_vm7, %vm1556_vm6  ;;  %v2237_v47 = vand.u32 2147483647, %v4311_v1  ;;  %v2240_v3 = vor.u32 1.1754944e-38, %v2239_v33 }
 0x598   : > { %v848_v16 = vmul.f32 %v847_v4, %v4285_v13  ;;  %v2201_v21 = vmul.f32 %v2830_v2, %v2200_v10  ;;  %v1551_v6 = vmul.f32 %v4314_v17, %v1550_v15  ;;  %v2210_v13 = vor.u32 1.1754944e-38, %v2209_v7 }
 0x599   : > { %v2216_v25 = vmul.f32 %v2832_v8, %v2215_v19  ;;  %vm2238_vm12 = vcmp.eq.f32.partialorder %v2237_v47, 8.507059e+37  ;;  %v1778_v7 = vmul.f32 0.03125, %v4204_v29 }
 0x59a   : > { %v4320_v9 = vpop.eup %2835  ;;  %v849_v60 = vmul.f32 %v4221_v52, %v848_v16  ;;  %v2202_v59 = vadd.f32 %v2830_v2, %v2201_v21  ;;  %v1552_v48 = vmul.f32 0.5, %v1551_v6 }
 0x59b   : > { %v2229_v37 = vmul.f32 %v4320_v9, %v4311_v1  ;;  %v2217_v38 = vadd.f32 %v2832_v8, %v2216_v25  ;;  %v2838_v42 = vpop.eup %2837  ;;  %vm2234_vm9 = vweird.f32 %v4320_v9  ;;  %v1779_v21 = vsub.f32 %v4174_v26, %v1778_v7 }
 0x59c   : > { %v850_v18 = vadd.f32 %v4228_v5, %v849_v60  ;;  %v2206_v57 = vsel %vm2205_vm2, %v2830_v2, %v2202_v59  ;;  %v1553_v43 = vsub.f32 1.5, %v1552_v48  ;;  %vm2235_vm11 = vmor %vm2233_vm10, %vm2234_vm9  ;;  %v1067_v2 = vmul.f32 0.03125, %v4172_v0  ;;  %v4783_v0 = vld [vmem:[#allocation22_spill] sm:$0xff] }
 0x59d   : > { %v2230_v20 = vsub.f32 1.0, %v2229_v37  ;;  %v2211_v54 = vsel %vm2208_vm4, %v2210_v13, %v2206_v57  ;;  %v2221_v24 = vsel %vm4325_vm3, %v2832_v8, %v2217_v38  ;;  %v4378_v25 = vmul.f32 %v3622_v58, %v1779_v21 }
 0x59e   : > { %v852_v62 = vrot.slane %v850_v18, 1  ;;  %v853_v45 = vrot.slane %v850_v18, 2  ;;  %v854_v28 = vrot.slane %v850_v18, 3  ;;  %866 = vst [vmem:[%s3288_s21 + $0x1] sm:$0x1] %v850_v18  ;;  %v855_v44 = vrot.slane %v850_v18, 4 }
 0x59f   : > { %v856_v50 = vrot.slane %v850_v18, 5  ;;  %v2226_v32 = vsel %vm2223_vm5, %v2225_v39, %v2221_v24  ;;  %v2245_v56 = vmul.f32 %v2838_v42, %v2211_v54  ;;  %v1554_v51 = vmul.f32 %v4314_v17, %v1553_v43 }
 0x5a0   : > { %867 = vst [vmem:[%s3288_s21 + $0x9] sm:$0x1] %v852_v62  ;;  %v2244_v49 = vmul.f32 %v2226_v32, %v4258_v61  ;;  %v2231_v46 = vmul.f32 %v4320_v9, %v2230_v20  ;;  %v857_v27 = vrot.slane %v850_v18, 6  ;;  %v858_v63 = vrot.slane %v850_v18, 7 }
 0x5a1   : > { %868 = vst [vmem:[%s3288_s21 + $0x11] sm:$0x1] %v853_v45  ;;  %v1558_v55 = vsel %vm1557_vm8, %v4314_v17, %v1554_v51  ;;  %v1068_v19 = vsub.f32 %v4783_v0, %v1067_v2  ;;  %v1781_v12 = vmul.f32 %v4378_v25, %v4378_v25 }
 0x5a2   : > { %869 = vst [vmem:[%s3288_s21 + $0x19] sm:$0x1] %v854_v28  ;;  %v4341_v34 = vadd.f32 %v2245_v56, %v2244_v49  ;;  %v1559_v31 = vmul.f32 %v1558_v55, %v4291_v35  ;;  %v2232_v61 = vadd.f32 %v4320_v9, %v2231_v46 }
 0x5a3   : > { %870 = vst [vmem:[%s3288_s21 + $0x21] sm:$0x1] %v855_v44  ;;  %v4372_v16 = vmul.f32 %v3622_v58, %v1068_v19 }
 0x5a4   : > { %871 = vst [vmem:[%s3288_s21 + $0x29] sm:$0x1] %v856_v50  ;;  %2839 = vtanh.f32 %v4341_v34  ;;  %v1560_v41 = vmul.f32 %v4221_v52, %v1559_v31  ;;  %v2236_v36 = vsel %vm2235_vm11, %v4320_v9, %v2232_v61 }
 0x5a5   : > { %872 = vst [vmem:[%s3288_s21 + $0x31] sm:$0x1] %v857_v27  ;;  %v2241_v14 = vsel %vm2238_vm12, %v2240_v3, %v2236_v36  ;;  %v1070_v6 = vmul.f32 %v4372_v16, %v4372_v16 }
 0x5a6   : > { %873 = vst [vmem:[%s3288_s21 + $0x39] sm:$0x1] %v858_v63  ;;  %v1561_v35 = vadd.f32 %v4228_v5, %v1560_v41 }
 0x5a7   : > { %2297 = vst [vmem:[#allocation3] sm:$0xff] %v4341_v34 }
 0x5a8   : > { %v1563_v8 = vrot.slane %v1561_v35, 1  ;;  %v1564_v11 = vrot.slane %v1561_v35, 2  ;;  %v1565_v17 = vrot.slane %v1561_v35, 3  ;;  %1577 = vst [vmem:[%s3288_s21 + $0x4] sm:$0x1] %v1561_v35  ;;  %v1566_v23 = vrot.slane %v1561_v35, 4 }
 0x5a9   : > { %v1567_v10 = vrot.slane %v1561_v35, 5  ;;  %v1568_v15 = vrot.slane %v1561_v35, 6  ;;  %v1569_v4 = vrot.slane %v1561_v35, 7 }
 0x5aa   : > { %v2840_v1 = vpop.eup %2839  ;;  %1578 = vst [vmem:[%s3288_s21 + $0xc] sm:$0x1] %v1563_v8 }
 0x5ab   : > { %v2248_v22 = vmul.f32 %v2840_v1, %v2241_v14  ;;  %1579 = vst [vmem:[%s3288_s21 + $0x14] sm:$0x1] %v1564_v11 }
 0x5ac   : > { %1580 = vst [vmem:[%s3288_s21 + $0x1c] sm:$0x1] %v1565_v17 }
 0x5ad   : > { %v2249_v30 = vmul.f32 %v3622_v58, %v2248_v22  ;;  %1581 = vst [vmem:[%s3288_s21 + $0x24] sm:$0x1] %v1566_v23 }
 0x5ae   : > { %1582 = vst [vmem:[%s3288_s21 + $0x2c] sm:$0x1] %v1567_v10 }
 0x5af   : > { %2250 = vadd.xlane.f32.xlu1 %v2249_v30  ;;  %1583 = vst [vmem:[%s3288_s21 + $0x34] sm:$0x1] %v1568_v15 }
 0x5b0   : > { %1584 = vst [vmem:[%s3288_s21 + $0x3c] sm:$0x1] %v1569_v4 }
 0x5b1   : > { %2296 = vst [vmem:[#allocation2] sm:$0xff] %v2248_v22 }
 0x5b7   : > { %1071 = vadd.xlane.f32.xlu1 %v1070_v6 }
 0x5bf   : > { %1782 = vadd.xlane.f32.xlu1 %v1781_v12 }
 0x5f3   : > { %v2020_v9 = vpop.xlane.xlu2 %2019 }
 0x5f4   : > { %v2021_v29 = vmul.f32 0.03125, %v2020_v9 }
 0x5f6   : > { %v2022_v60 = vadd.f32 1e-05, %v2021_v29 }
 0x5f8   : > { %2841 = vrsqrt.f32 %v2022_v60  ;;  %vm2029_vm14 = vweird.f32 %v2022_v60 }
 0x5fe   : > { %v2842_v59 = vpop.eup %2841 }
 0x5ff   : > { %v2024_v48 = vmul.f32 %v2842_v59, %v2022_v60  ;;  %vm2030_vm13 = vweird.f32 %v2842_v59 }
 0x600   : > { %vm2031_vm15 = vmor %vm2029_vm14, %vm2030_vm13 }
 0x601   : > { %v2025_v39 = vmul.f32 %v2842_v59, %v2024_v48 }
 0x603   : > { %v2026_v26 = vmul.f32 0.5, %v2025_v39 }
 0x605   : > { %v2027_v37 = vsub.f32 1.5, %v2026_v26 }
 0x607   : > { %v2028_v13 = vmul.f32 %v2842_v59, %v2027_v37 }
 0x609   : > { %v2032_v38 = vsel %vm2031_vm15, %v2842_v59, %v2028_v13 }
 0x60a   : > { %v2033_v42 = vmul.f32 %v2032_v38, %v4304_v40 }
 0x60c   : > { %v2034_v53 = vmul.f32 %v4221_v52, %v2033_v42 }
 0x60e   : > { %v2035_v18 = vadd.f32 %v4228_v5, %v2034_v53 }
 0x610   : > { %v2037_v57 = vrot.slane %v2035_v18, 1  ;;  %v2038_v43 = vrot.slane %v2035_v18, 2  ;;  %v2039_v20 = vrot.slane %v2035_v18, 3  ;;  %2051 = vst [vmem:[%s3288_s21 + $0x6] sm:$0x1] %v2035_v18  ;;  %v2040_v54 = vrot.slane %v2035_v18, 4 }
 0x611   : > { %v2041_v24 = vrot.slane %v2035_v18, 5  ;;  %v2042_v62 = vrot.slane %v2035_v18, 6  ;;  %v2043_v45 = vrot.slane %v2035_v18, 7 }
 0x612   : > { %2052 = vst [vmem:[%s3288_s21 + $0xe] sm:$0x1] %v2037_v57 }
 0x613   : > { %2053 = vst [vmem:[%s3288_s21 + $0x16] sm:$0x1] %v2038_v43 }
 0x614   : > { %2054 = vst [vmem:[%s3288_s21 + $0x1e] sm:$0x1] %v2039_v20 }
 0x615   : > { %2055 = vst [vmem:[%s3288_s21 + $0x26] sm:$0x1] %v2040_v54 }
 0x616   : > { %2056 = vst [vmem:[%s3288_s21 + $0x2e] sm:$0x1] %v2041_v24 }
 0x617   : > { %2057 = vst [vmem:[%s3288_s21 + $0x36] sm:$0x1] %v2042_v62 }
 0x618   : > { %2058 = vst [vmem:[%s3288_s21 + $0x3e] sm:$0x1] %v2043_v45 }
 0x622   : > { %v2251_v40 = vpop.xlane.xlu1 %2250 }
 0x623   : > { %v2252_v28 = vmul.f32 0.03125, %v2251_v40 }
 0x625   : > { %v2253_v44 = vsub.f32 %v2248_v22, %v2252_v28 }
 0x627   : > { %v4394_v50 = vmul.f32 %v3622_v58, %v2253_v44 }
 0x629   : > { %v2255_v32 = vmul.f32 %v4394_v50, %v4394_v50 }
 0x62a   : > { %v1072_v49 = vpop.xlane.xlu1 %1071 }
 0x62b   : > { %v1073_v56 = vmul.f32 0.03125, %v1072_v49  ;;  %2256 = vadd.xlane.f32.xlu0 %v2255_v32 }
 0x62d   : > { %v1074_v51 = vadd.f32 1e-05, %v1073_v56 }
 0x62f   : > { %2843 = vrsqrt.f32 %v1074_v51  ;;  %vm1081_vm1 = vweird.f32 %v1074_v51 }
 0x632   : > { %v1783_v46 = vpop.xlane.xlu1 %1782 }
 0x633   : > { %v1784_v27 = vmul.f32 0.03125, %v1783_v46 }
 0x635   : > { %v2844_v63 = vpop.eup %2843  ;;  %v1785_v55 = vadd.f32 1e-05, %v1784_v27 }
 0x636   : > { %v1076_v31 = vmul.f32 %v2844_v63, %v1074_v51  ;;  %vm1082_vm0 = vweird.f32 %v2844_v63 }
 0x637   : > { %2845 = vrsqrt.f32 %v1785_v55  ;;  %vm1083_vm2 = vmor %vm1081_vm1, %vm1082_vm0  ;;  %vm1792_vm4 = vweird.f32 %v1785_v55 }
 0x638   : > { %v1077_v61 = vmul.f32 %v2844_v63, %v1076_v31 }
 0x63a   : > { %v1078_v33 = vmul.f32 0.5, %v1077_v61 }
 0x63c   : > { %v1079_v41 = vsub.f32 1.5, %v1078_v33 }
 0x63d   : > { %v2846_v47 = vpop.eup %2845 }
 0x63e   : > { %v1080_v35 = vmul.f32 %v2844_v63, %v1079_v41  ;;  %v1787_v36 = vmul.f32 %v2846_v47, %v1785_v55  ;;  %vm1793_vm3 = vweird.f32 %v2846_v47 }
 0x63f   : > { %vm1794_vm5 = vmor %vm1792_vm4, %vm1793_vm3 }
 0x640   : > { %v1084_v2 = vsel %vm1083_vm2, %v2844_v63, %v1080_v35  ;;  %v1788_v3 = vmul.f32 %v2846_v47, %v1787_v36 }
 0x641   : > { %v1085_v8 = vmul.f32 %v1084_v2, %v4372_v16 }
 0x642   : > { %v1789_v11 = vmul.f32 0.5, %v1788_v3 }
 0x643   : > { %v1086_v17 = vmul.f32 %v4221_v52, %v1085_v8 }
 0x644   : > { %v1790_v1 = vsub.f32 1.5, %v1789_v11 }
 0x645   : > { %v1087_v23 = vadd.f32 %v4228_v5, %v1086_v17 }
 0x646   : > { %v1791_v14 = vmul.f32 %v2846_v47, %v1790_v1 }
 0x647   : > { %v1089_v10 = vrot.slane %v1087_v23, 1  ;;  %v1090_v22 = vrot.slane %v1087_v23, 2  ;;  %v1091_v15 = vrot.slane %v1087_v23, 3  ;;  %1103 = vst [vmem:[%s3288_s21 + $0x2] sm:$0x1] %v1087_v23  ;;  %v1092_v0 = vrot.slane %v1087_v23, 4 }
 0x648   : > { %v1795_v19 = vsel %vm1794_vm5, %v2846_v47, %v1791_v14  ;;  %v1093_v4 = vrot.slane %v1087_v23, 5  ;;  %v1094_v7 = vrot.slane %v1087_v23, 6  ;;  %v1095_v16 = vrot.slane %v1087_v23, 7 }
 0x649   : > { %1104 = vst [vmem:[%s3288_s21 + $0xa] sm:$0x1] %v1089_v10  ;;  %v1796_v30 = vmul.f32 %v1795_v19, %v4378_v25 }
 0x64a   : > { %1105 = vst [vmem:[%s3288_s21 + $0x12] sm:$0x1] %v1090_v22 }
 0x64b   : > { %1106 = vst [vmem:[%s3288_s21 + $0x1a] sm:$0x1] %v1091_v15  ;;  %v1797_v21 = vmul.f32 %v4221_v52, %v1796_v30 }
 0x64c   : > { %1107 = vst [vmem:[%s3288_s21 + $0x22] sm:$0x1] %v1092_v0 }
 0x64d   : > { %1108 = vst [vmem:[%s3288_s21 + $0x2a] sm:$0x1] %v1093_v4  ;;  %v1798_v6 = vadd.f32 %v4228_v5, %v1797_v21 }
 0x64e   : > { %1109 = vst [vmem:[%s3288_s21 + $0x32] sm:$0x1] %v1094_v7 }
 0x64f   : > { %1110 = vst [vmem:[%s3288_s21 + $0x3a] sm:$0x1] %v1095_v16  ;;  %v1800_v25 = vrot.slane %v1798_v6, 1  ;;  %v1801_v12 = vrot.slane %v1798_v6, 2  ;;  %v1802_v9 = vrot.slane %v1798_v6, 3  ;;  %v1803_v29 = vrot.slane %v1798_v6, 4 }
 0x650   : > { %1814 = vst [vmem:[%s3288_s21 + $0x5] sm:$0x1] %v1798_v6  ;;  %v1804_v60 = vrot.slane %v1798_v6, 5  ;;  %v1805_v59 = vrot.slane %v1798_v6, 6  ;;  %v1806_v48 = vrot.slane %v1798_v6, 7 }
 0x651   : > { %1815 = vst [vmem:[%s3288_s21 + $0xd] sm:$0x1] %v1800_v25 }
 0x652   : > { %1816 = vst [vmem:[%s3288_s21 + $0x15] sm:$0x1] %v1801_v12 }
 0x653   : > { %1817 = vst [vmem:[%s3288_s21 + $0x1d] sm:$0x1] %v1802_v9 }
 0x654   : > { %1818 = vst [vmem:[%s3288_s21 + $0x25] sm:$0x1] %v1803_v29 }
 0x655   : > { %1819 = vst [vmem:[%s3288_s21 + $0x2d] sm:$0x1] %v1804_v60 }
 0x656   : > { %1820 = vst [vmem:[%s3288_s21 + $0x35] sm:$0x1] %v1805_v59 }
 0x657   : > { %1821 = vst [vmem:[%s3288_s21 + $0x3d] sm:$0x1] %v1806_v48 }
 0x69e   : > { %v2257_v39 = vpop.xlane.xlu0 %2256 }
 0x69f   : > { %v2258_v26 = vmul.f32 0.03125, %v2257_v39 }
 0x6a1   : > { %v2259_v37 = vadd.f32 1e-05, %v2258_v26 }
 0x6a3   : > { %2847 = vrsqrt.f32 %v2259_v37  ;;  %vm2266_vm7 = vweird.f32 %v2259_v37 }
 0x6a9   : > { %v2848_v13 = vpop.eup %2847 }
 0x6aa   : > { %v2261_v38 = vmul.f32 %v2848_v13, %v2259_v37  ;;  %vm2267_vm6 = vweird.f32 %v2848_v13 }
 0x6ab   : > { %vm2268_vm8 = vmor %vm2266_vm7, %vm2267_vm6 }
 0x6ac   : > { %v2262_v42 = vmul.f32 %v2848_v13, %v2261_v38 }
 0x6ae   : > { %v2263_v53 = vmul.f32 0.5, %v2262_v42 }
 0x6b0   : > { %v2264_v18 = vsub.f32 1.5, %v2263_v53 }
 0x6b2   : > { %v2265_v57 = vmul.f32 %v2848_v13, %v2264_v18 }
 0x6b4   : > { %v2269_v43 = vsel %vm2268_vm8, %v2848_v13, %v2265_v57 }
 0x6b5   : > { %v2270_v20 = vmul.f32 %v2269_v43, %v4394_v50 }
 0x6b7   : > { %v2271_v54 = vmul.f32 %v4221_v52, %v2270_v20 }
 0x6b9   : > { %v2272_v24 = vadd.f32 %v4228_v5, %v2271_v54 }
 0x6bb   : > { %v2274_v62 = vrot.slane %v2272_v24, 1  ;;  %v2275_v45 = vrot.slane %v2272_v24, 2  ;;  %v2276_v40 = vrot.slane %v2272_v24, 3  ;;  %2288 = vst [vmem:[%s3288_s21 + $0x7] sm:$0x1] %v2272_v24  ;;  %v2277_v28 = vrot.slane %v2272_v24, 4 }
 0x6bc   : > { %v2278_v44 = vrot.slane %v2272_v24, 5  ;;  %v2279_v32 = vrot.slane %v2272_v24, 6  ;;  %v2280_v49 = vrot.slane %v2272_v24, 7 }
 0x6bd   : > { %2289 = vst [vmem:[%s3288_s21 + $0xf] sm:$0x1] %v2274_v62 }
 0x6be   : > { %2290 = vst [vmem:[%s3288_s21 + $0x17] sm:$0x1] %v2275_v45 }
 0x6bf   : > { %2291 = vst [vmem:[%s3288_s21 + $0x1f] sm:$0x1] %v2276_v40  ;;  %2301 = sbr.rel (%p2598_p1) target bundleno = 2003 (0x7d3), region = 52 }
 0x6c0   : > { %2292 = vst [vmem:[%s3288_s21 + $0x27] sm:$0x1] %v2277_v28 }
 0x6c1   : > { %2293 = vst [vmem:[%s3288_s21 + $0x2f] sm:$0x1] %v2278_v44 }
 0x6c2   : > { %2294 = vst [vmem:[%s3288_s21 + $0x37] sm:$0x1] %v2279_v32 }
 0x6c3   : > { %2295 = vst [vmem:[%s3288_s21 + $0x3f] sm:$0x1] %v2280_v49 }
 0x6c4   : > { %v2303_v50 = vmul.f32 %v3622_v58, %v4341_v34  ;;  %2302 = vst [vmem:[#allocation10] sm:$0xff] %v2272_v24 }
 0x6c6   : > { %2304 = vadd.xlane.f32.xlu0 %v2303_v50 }
 0x739   : > { %v2305_v56 = vpop.xlane.xlu0 %2304 }
 0x73a   : > { %v2306_v51 = vmul.f32 0.03125, %v2305_v56 }
 0x73c   : > { %v2307_v46 = vsub.f32 %v4341_v34, %v2306_v51 }
 0x73e   : > { %v2308_v27 = vmul.f32 %v3622_v58, %v2307_v46 }
 0x740   : > { %v2309_v63 = vmul.f32 %v2308_v27, %v2308_v27 }
 0x742   : > { %2310 = vadd.xlane.f32.xlu0 %v2309_v63 }
 0x7b5   : > { %v2311_v55 = vpop.xlane.xlu0 %2310 }
 0x7b6   : > { %v2312_v31 = vmul.f32 0.03125, %v2311_v55 }
 0x7b8   : > { %v2313_v61 = vadd.f32 1e-05, %v2312_v31 }
 0x7ba   : > { %2913 = vrsqrt.f32 %v2313_v61  ;;  %vm2320_vm10 = vweird.f32 %v2313_v61 }
 0x7c0   : > { %v2914_v33 = vpop.eup %2913 }
 0x7c1   : > { %v2315_v41 = vmul.f32 %v2914_v33, %v2313_v61  ;;  %vm2321_vm9 = vweird.f32 %v2914_v33 }
 0x7c2   : > { %vm2322_vm11 = vmor %vm2320_vm10, %vm2321_vm9 }
 0x7c3   : > { %v2316_v47 = vmul.f32 %v2914_v33, %v2315_v41 }
 0x7c5   : > { %v2317_v35 = vmul.f32 0.5, %v2316_v47 }
 0x7c7   : > { %v2318_v36 = vsub.f32 1.5, %v2317_v35 }
 0x7c9   : > { %v2319_v2 = vmul.f32 %v2914_v33, %v2318_v36 }
 0x7cb   : > { %v2323_v3 = vsel %vm2322_vm11, %v2914_v33, %v2319_v2 }
 0x7cc   : > { %v2324_v8 = vmul.f32 %v2323_v3, %v2308_v27 }
 0x7ce   : > { %v2325_v34 = vmul.f32 %v4221_v52, %v2324_v8 }
 0x7d0   : > { %v2326_v58 = vadd.f32 %v4228_v5, %v2325_v34 }
 0x7d2   : > { %2327 = vst [vmem:[#allocation12] sm:$0xff] %v2326_v58 }
 0x7d3 PF: > { %s3129_s12 = smov [#allocation10]   ;;  %s2362_s11 = sshll.u32 %s4496_s5, 4  ;;  %s2363_s11 = int_to_ptr.hbm [resolvable:$true] %s2362_s11 }
 0x7d4   : > { %s2360_s17 = sshll.u32 %s3129_s12, 4  ;;  %s2600_s13 = sshll.u32 %s3113_s24, 3  ;;  %s2361_s17 = int_to_ptr.vmem [resolvable:$true] %s2360_s17 }
 0x7d5   : > { %2616 = dma.vmem_to_hbm [thread:$0]  (%p3207_p2), %s2361_s17, 128, %s2363_s11, [#allocation11]  }
 0x7d6   : > { %s2342_s16 = scalar_lea.hbm %s4495_s4, %s2600_s13  ;;  %s2343_s15 = sshll.u32 %s3288_s21, 4  ;;  %s2344_s15 = int_to_ptr.vmem [resolvable:$true] %s2343_s15 }
 0x7d7   : > { %s2345_s9 = sshll.u32 %s2342_s16, 4  ;;  %s2329_s1 = scalar_lea.sflag [#allocation6], %s3273_s18  ;;  %s2346_s9 = int_to_ptr.hbm [resolvable:$true] %s2345_s9 }
 0x7d8   : > { %s3017_s26 = sshra.s32 %s2346_s9, 4  ;;  %s3023_s24 = scalar_lea.hbm %s4495_s4, 128  ;;  %s3018_s26 = int_to_ptr.hbm [resolvable:$true] %s3017_s26 }
 0x7d9   : > { %s3019_s29 = scalar_lea.hbm %s3018_s26, 64  ;;  %p3024_p0 = scmp.lt.s32.totalorder %s3018_s26, %s4495_s4 }
 0x7da   : > { %p3020_p4 = scmp.ne.s32.totalorder %s3018_s26, %s3019_s29  ;;  %p3025_p3 = scmp.lt.s32.totalorder %s3023_s24, %s3019_s29 }
 0x7dc   : > { %p3021_p12 = pnand %p3020_p4, %p3251_p5  ;;  %p3026_p7 = por %p3025_p3, %p3024_p0 }
 0x7de   : > { %p3022_p13 = pneg %p3021_p12 }
 0x7e0   : > { %p3027_p9 = pnand %p3026_p7, %p3022_p13 }
 0x7e2   : > { %3030 = shalt.err (!%p3027_p9)
}
 0x7e3   : > { %s3130_s18 = smov 128   ;;  %s3131_s21 = smov 256  }
 0x7e4   : > { %s3132_s19 = smov 8   ;;  %s2376_s13 = sshll.u32 %s4497_s6, 4  ;;  %s2377_s13 = int_to_ptr.hbm [resolvable:$true] %s2376_s13 }
 0x7e5   : > { %2614 = dma.vmem_to_hbm [thread:$0]  (%p3251_p5), %s2344_s15, 1024, %s2346_s9, %s2329_s1, %s3130_s18, %s3131_s21, %s3132_s19  }
 0x7e6   : > { %s3133_s14 = smov [#allocation12]  }
 0x7e7   : > { %s2374_s27 = sshll.u32 %s3133_s14, 4  ;;  %s2375_s27 = int_to_ptr.vmem [resolvable:$true] %s2374_s27 }
 0x7e8   : > { %2618 = dma.vmem_to_hbm [thread:$0]  (%p3207_p2), %s2375_s27, 128, %s2377_s13, [#allocation11]  }
 0x7e9   : > { %3092 = dma.done.wait (%p3207_p2), [#allocation11], 256  }
 0x7ea   : > { %3094 = vsyncadd (%p3207_p2), [#allocation11], 4294967040 }
 0x7eb PF: > { %s4784_s16 = sld [smem:[#allocation17_spill]]  ;;  %p2633_p5 = pnand %p2501_p11, %p3218_p6 }
 0x7ec   : > { %s4786_s20 = sld [smem:[#allocation18_spill]] }
 0x7ed   : > { %p2634_p10 = pneg %p2633_p5 }
 0x7f1   : > { %s2398_s15 = sand.u32 1, %s4784_s16  }
 0x7f2   : > { %s2399_s9 = scalar_lea.sflag [#allocation6], %s2398_s15 }
 0x7f3   : > { %3096 = dma.done.wait (%p2634_p10), %s2399_s9, 1024  }
 0x7f4   : > { %3098 = vsyncadd (%p2634_p10), %s2399_s9, 4294966272  ;;  %s25_s26 = sadd.s32 1, %s4786_s20   ;;  %s4787_s30 = sld [smem:[#allocation20_spill]] }
 0x7f5   : > { %p22_p8 = scmp.ge.s32.totalorder %s25_s26, 4   ;;  %s4788_s21 = smov %s3105_s22 }
 0x7f6   : > { %s4789_s22 = smov %s3109_s23  ;;  %s4790_s23 = smov %s3260_s10 }
 0x7f7   : > { %s4791_s24 = smov %s3117_s25  ;;  %24 = sbr.rel (!%p22_p8) target bundleno = 10 (0xa), region = 230 }
 0x7fa   : > { %s4792_s25 = smov %s4787_s30 }
 0x7fc   :  { %2405 = vsyncpa [#allocation5], 1 }
 0x7fd   :  { %2407 = vsyncpa [#allocation5 + $0x1], 1 }
 0x7fe   :  { %2408 = vsyncpa [#allocation8], 1 }
 0x7ff   :  { %2409 = vsyncpa [#allocation6], 1 }
 0x800   :  { %2411 = vsyncpa [#allocation6 + $0x1], 1 }
 0x801   :  { %2412 = vsyncpa [#allocation11], 1 }

</bundles_post_ra>
